<compile_context>
chip_gen: v6e
topology: v6e:2x2x1
jax: 0.10.0
libtpu: 0.0.40
codegen_flags: <defaults>
</compile_context>

<pallas_src>
import functools

import numpy as np
import jax
import jax.numpy as jnp
from jax.experimental import pallas as pl
from jax.experimental.pallas import tpu as pltpu

F32 = jnp.float32
BF16 = jnp.bfloat16


# ================================ Pallas kernel ===============================
def _spectral_kernel(x_ref, f_ref, w2_ref, g_ref, o_ref, *, num_modes, b_blk, ck):
    """One batch-block of sparseKernelFT1d: DFT -> complex mode mix -> iDFT."""
    x = x_ref[...]                                                   # (Bb*N, ck)

    # forward truncated real DFT: [XR ; XI] stacked over rows, one MXU dot.
    xri = jnp.dot(f_ref[...], x, preferred_element_type=F32)        # (2*l*Bb, ck)
    half = num_modes * b_blk

    # complex channel mixing as ONE (Bb, 2ck) @ (2ck, 2ck) bf16 MXU dot per mode:
    #   [xr | xi] @ [[Wr, Wi], [-Wi, Wr]] = [OutR | OutI]
    # Results are kept in registers (Python lists), no scratch round-trip.
    outs_r = []
    outs_i = []
    for m in range(num_modes):
        r0 = m * b_blk
        xin = jnp.concatenate(
            [xri[r0:r0 + b_blk], xri[half + r0:half + r0 + b_blk]],
            axis=1).astype(BF16)                                     # (Bb, 2ck)
        out_m = jnp.dot(xin, w2_ref[m], preferred_element_type=F32)  # (Bb, 2ck)
        outs_r.append(out_m[:, :ck])
        outs_i.append(out_m[:, ck:])

    out_ri = jnp.concatenate(outs_r + outs_i, axis=0)                # (2*l*Bb, ck)

    # inverse truncated real DFT: one dot against [Gc | Gs]; lane-dense store.
    o_ref[...] = jnp.dot(g_ref[...], out_ri,
                         preferred_element_type=F32).astype(o_ref.dtype)


# ============================ wrapper / operators =============================
def _dft_operators(n, n_modes, b_blk):
    """Block-diagonal (over the batch block) truncated real-DFT operators,
    row-stacked forward [Fc; Fs] and column-stacked inverse [Gc | Gs]."""
    # TODO(synk): block-diag operators waste b_blk x zero-FLOPs / memory; switch
    # to a short per-batch loop if the batch block ever grows beyond a handful.
    l = min(n_modes, n // 2 + 1)
    m = np.arange(l)
    t = np.arange(n)
    ang = 2.0 * np.pi * np.outer(m, t) / n                   # (l, n)
    fct = np.cos(ang)                                        # Re(rfft) rows
    fsnt = -np.sin(ang)                                      # Im(rfft) rows
    s = np.where(m == 0, 1.0, 2.0)
    if n % 2 == 0:
        s = np.where(m == n // 2, 1.0, s)
    gc = (np.cos(ang) * (s[:, None] / n)).T                  # (n, l)  irfft, Re
    gs = (-np.sin(ang) * (s[:, None] / n)).T                 # (n, l)  irfft, Im
    eye = np.eye(b_blk)
    fc_blk = np.einsum('mt,bc->mbct', fct, eye).reshape(l * b_blk, b_blk * n)
    fs_blk = np.einsum('mt,bc->mbct', fsnt, eye).reshape(l * b_blk, b_blk * n)
    gc_blk = np.einsum('tm,bc->btmc', gc, eye).reshape(b_blk * n, l * b_blk)
    gs_blk = np.einsum('tm,bc->btmc', gs, eye).reshape(b_blk * n, l * b_blk)
    f_blk = np.concatenate([fc_blk, fs_blk], axis=0)         # (2*l*Bb, Bb*N)
    g_blk = np.concatenate([gc_blk, gs_blk], axis=1)         # (Bb*N, 2*l*Bb)
    return jnp.asarray(f_blk, F32), jnp.asarray(g_blk, F32), l


def _two_tensorcore_chip():
    """True only on chips with 2 TensorCores per chip (v7x)."""
    try:
        kind = jax.devices()[0].device_kind.lower()
    except Exception:
        return False
    return ("v7" in kind) or ("tpu7" in kind)


def sparse_kernel_ft1d(x, w_real, w_imag, modes):
    """Pallas forward of sparseKernelFT1d.  x: (B, N, c, k); w_*: (ck, ck, modes)."""
    B, N, c, k = x.shape
    ck = c * k

    # Split the batch across two "parallel" grid steps only on 2-TC chips
    # (v7x); on single-TC chips (v5e/v6e) a split is purely serial overhead.
    split = _two_tensorcore_chip() and (B % 2 == 0) and (((B // 2) * N) % 8 == 0)
    b_blk = B // 2 if split else B
    nb = B // b_blk
    rows = b_blk * N

    f_blk, g_blk, l = _dft_operators(N, modes, b_blk)

    # complex-as-real merged mode-mix weight, cast to bf16 in the wrapper:
    #   W2[m] = [[Wr_m, Wi_m], [-Wi_m, Wr_m]]  of shape (2ck, 2ck)
    wr3 = jnp.transpose(w_real[:, :, :l], (2, 0, 1))         # (l, ck_in, ck_out)
    wi3 = jnp.transpose(w_imag[:, :, :l], (2, 0, 1))
    w2 = jnp.concatenate(
        [jnp.concatenate([wr3, wi3], axis=2),
         jnp.concatenate([-wi3, wr3], axis=2)],
        axis=1).astype(BF16)                                 # (l, 2ck, 2ck)

    x2 = x.reshape(B * N, ck)                                # channels on lanes

    kernel = functools.partial(_spectral_kernel, num_modes=l, b_blk=b_blk, ck=ck)
    y2 = pl.pallas_call(
        kernel,
        grid=(nb,),
        in_specs=[
            pl.BlockSpec((rows, ck), lambda i: (i, 0)),             # x block
            pl.BlockSpec(f_blk.shape, lambda i: (0, 0)),            # fwd DFT [Fc;Fs]
            pl.BlockSpec((l, 2 * ck, 2 * ck), lambda i: (0, 0, 0)),  # W2 (bf16)
            pl.BlockSpec(g_blk.shape, lambda i: (0, 0)),            # inv DFT [Gc|Gs]
        ],
        out_specs=pl.BlockSpec((rows, ck), lambda i: (i, 0)),
        out_shape=jax.ShapeDtypeStruct((B * N, ck), x.dtype),
        compiler_params=pltpu.CompilerParams(
            dimension_semantics=("parallel",),
            vmem_limit_bytes=32 * 1024 * 1024),
    )(x2, f_blk, w2, g_blk)
    return y2.reshape(B, N, c, k)


# ========================== float64 numpy reference ===========================
def ref_sparse_kernel_ft1d(x, w_real, w_imag, modes):
    """Mirrors the PyTorch module exactly (rfft -> mode mix -> irfft)."""
    B, N, c, k = x.shape
    ck = c * k
    xv = x.reshape(B, N, ck).transpose(0, 2, 1)              # (B, ck, N)
    xf = np.fft.rfft(xv, axis=-1)
    l = min(modes, N // 2 + 1)
    w = w_real[:, :, :l] + 1j * w_imag[:, :, :l]
    out_ft = np.zeros((B, ck, N // 2 + 1), dtype=np.complex128)
    out_ft[:, :, :l] = np.einsum('bix,iox->box', xf[:, :, :l], w)
    y = np.fft.irfft(out_ft, n=N, axis=-1)
    return y.transpose(0, 2, 1).reshape(B, N, c, k)


# ==================================== main ====================================
if __name__ == "__main__":
    B, N, c, k, modes = 4, 64, 8, 16, 16                     # ck = 128 (lane-dense)
    ck = c * k
    key = jax.random.PRNGKey(0)
    kx, kr, ki = jax.random.split(key, 3)
    x = jax.random.normal(kx, (B, N, c, k), F32)
    scale = 1.0 / (ck * ck)                                  # torch: scale*rand(ck,ck,modes)
    w_real = scale * jax.random.uniform(kr, (ck, ck, modes), F32)
    w_imag = scale * jax.random.uniform(ki, (ck, ck, modes), F32)

    fwd = jax.jit(functools.partial(sparse_kernel_ft1d, modes=modes))
    out = jax.block_until_ready(fwd(x, w_real, w_imag))

    ref = ref_sparse_kernel_ft1d(np.asarray(x, np.float64),
                                 np.asarray(w_real, np.float64),
                                 np.asarray(w_imag, np.float64), modes)
    assert out.shape == ref.shape, (out.shape, ref.shape)
    err = float(np.max(np.abs(np.asarray(out, np.float64) - ref)))
    den = float(np.max(np.abs(ref)) + 1e-12)
    assert err / den < 1e-2, f"mismatch: max_err={err}, ref_scale={den}"
    print("KERNEL_OK")
</pallas_src>

<mosaic_0001>
module attributes {stable_mosaic.version = 11 : i64} {
  func.func @_spectral_kernel(%arg0: i32, %arg1: memref<256x128xf32, #tpu.memory_space<vmem>>, %arg2: memref<128x256xf32, #tpu.memory_space<vmem>>, %arg3: memref<16x256x256xbf16, #tpu.memory_space<vmem>>, %arg4: memref<256x128xf32, #tpu.memory_space<vmem>>, %arg5: memref<256x128xf32, #tpu.memory_space<vmem>>) attributes {dimension_semantics = [#tpu.dimension_semantics<parallel>], iteration_bounds = array<i64: 1>, scalar_prefetch = 0 : i64, scratch_operands = 0 : i64, tpu.core_type = #tpu.core_type<tc>, window_params = [{transform_indices = @transform_0, window_bounds = array<i64: 256, 128>}, {pipeline_mode = #tpu.pipeline_mode<synchronous>, transform_indices = @transform_1, window_bounds = array<i64: 128, 256>}, {pipeline_mode = #tpu.pipeline_mode<synchronous>, transform_indices = @transform_2, window_bounds = array<i64: 16, 256, 256>}, {pipeline_mode = #tpu.pipeline_mode<synchronous>, transform_indices = @transform_3, window_bounds = array<i64: 256, 128>}, {transform_indices = @transform_4, window_bounds = array<i64: 256, 128>}]} {
    %c0 = arith.constant 0 : index
    %c0_0 = arith.constant 0 : index
    %0 = vector.load %arg1[%c0, %c0_0] : memref<256x128xf32, #tpu.memory_space<vmem>>, vector<256x128xf32>
    %c0_1 = arith.constant 0 : index
    %c0_2 = arith.constant 0 : index
    %1 = vector.load %arg2[%c0_1, %c0_2] : memref<128x256xf32, #tpu.memory_space<vmem>>, vector<128x256xf32>
    %cst = arith.constant dense<0.000000e+00> : vector<128x128xf32>
    %2 = tpu.matmul %1, %0, %cst {dimension_numbers = #tpu.dot_dimension_numbers<[1], [0], [0], [1], [0, 0, 1, 1], [], []>} : vector<128x256xf32>, vector<256x128xf32>, vector<128x128xf32> -> vector<128x128xf32>
    %3 = vector.extract_strided_slice %2 {offsets = [0, 0], sizes = [4, 128], strides = [1, 1]} : vector<128x128xf32> to vector<4x128xf32>
    %4 = vector.extract_strided_slice %2 {offsets = [64, 0], sizes = [4, 128], strides = [1, 1]} : vector<128x128xf32> to vector<4x128xf32>
    %5 = tpu.concatenate %3, %4 in 1 : vector<4x128xf32>, vector<4x128xf32> -> vector<4x256xf32>
    %6 = arith.truncf %5 : vector<4x256xf32> to vector<4x256xbf16>
    %c0_3 = arith.constant 0 : index
    %c0_4 = arith.constant 0 : index
    %c0_5 = arith.constant 0 : index
    %7 = vector.load %arg3[%c0_3, %c0_4, %c0_5] : memref<16x256x256xbf16, #tpu.memory_space<vmem>>, vector<1x256x256xbf16>
    %8 = vector.shape_cast %7 : vector<1x256x256xbf16> to vector<256x256xbf16>
    %cst_6 = arith.constant dense<0.000000e+00> : vector<4x256xf32>
    %9 = tpu.matmul %6, %8, %cst_6 {dimension_numbers = #tpu.dot_dimension_numbers<[1], [0], [0], [1], [0, 0, 1, 1], [], []>} : vector<4x256xbf16>, vector<256x256xbf16>, vector<4x256xf32> -> vector<4x256xf32>
    %10 = vector.extract_strided_slice %9 {offsets = [0, 0], sizes = [4, 128], strides = [1, 1]} : vector<4x256xf32> to vector<4x128xf32>
    %11 = vector.extract_strided_slice %9 {offsets = [0, 128], sizes = [4, 128], strides = [1, 1]} : vector<4x256xf32> to vector<4x128xf32>
    %12 = vector.extract_strided_slice %2 {offsets = [4, 0], sizes = [4, 128], strides = [1, 1]} : vector<128x128xf32> to vector<4x128xf32>
    %13 = vector.extract_strided_slice %2 {offsets = [68, 0], sizes = [4, 128], strides = [1, 1]} : vector<128x128xf32> to vector<4x128xf32>
    %14 = tpu.concatenate %12, %13 in 1 : vector<4x128xf32>, vector<4x128xf32> -> vector<4x256xf32>
    %15 = arith.truncf %14 : vector<4x256xf32> to vector<4x256xbf16>
    %c1 = arith.constant 1 : index
    %c0_7 = arith.constant 0 : index
    %c0_8 = arith.constant 0 : index
    %16 = vector.load %arg3[%c1, %c0_7, %c0_8] : memref<16x256x256xbf16, #tpu.memory_space<vmem>>, vector<1x256x256xbf16>
    %17 = vector.shape_cast %16 : vector<1x256x256xbf16> to vector<256x256xbf16>
    %cst_9 = arith.constant dense<0.000000e+00> : vector<4x256xf32>
    %18 = tpu.matmul %15, %17, %cst_9 {dimension_numbers = #tpu.dot_dimension_numbers<[1], [0], [0], [1], [0, 0, 1, 1], [], []>} : vector<4x256xbf16>, vector<256x256xbf16>, vector<4x256xf32> -> vector<4x256xf32>
    %19 = vector.extract_strided_slice %18 {offsets = [0, 0], sizes = [4, 128], strides = [1, 1]} : vector<4x256xf32> to vector<4x128xf32>
    %20 = vector.extract_strided_slice %18 {offsets = [0, 128], sizes = [4, 128], strides = [1, 1]} : vector<4x256xf32> to vector<4x128xf32>
    %21 = vector.extract_strided_slice %2 {offsets = [8, 0], sizes = [4, 128], strides = [1, 1]} : vector<128x128xf32> to vector<4x128xf32>
    %22 = vector.extract_strided_slice %2 {offsets = [72, 0], sizes = [4, 128], strides = [1, 1]} : vector<128x128xf32> to vector<4x128xf32>
    %23 = tpu.concatenate %21, %22 in 1 : vector<4x128xf32>, vector<4x128xf32> -> vector<4x256xf32>
    %24 = arith.truncf %23 : vector<4x256xf32> to vector<4x256xbf16>
    %c2 = arith.constant 2 : index
    %c0_10 = arith.constant 0 : index
    %c0_11 = arith.constant 0 : index
    %25 = vector.load %arg3[%c2, %c0_10, %c0_11] : memref<16x256x256xbf16, #tpu.memory_space<vmem>>, vector<1x256x256xbf16>
    %26 = vector.shape_cast %25 : vector<1x256x256xbf16> to vector<256x256xbf16>
    %cst_12 = arith.constant dense<0.000000e+00> : vector<4x256xf32>
    %27 = tpu.matmul %24, %26, %cst_12 {dimension_numbers = #tpu.dot_dimension_numbers<[1], [0], [0], [1], [0, 0, 1, 1], [], []>} : vector<4x256xbf16>, vector<256x256xbf16>, vector<4x256xf32> -> vector<4x256xf32>
    %28 = vector.extract_strided_slice %27 {offsets = [0, 0], sizes = [4, 128], strides = [1, 1]} : vector<4x256xf32> to vector<4x128xf32>
    %29 = vector.extract_strided_slice %27 {offsets = [0, 128], sizes = [4, 128], strides = [1, 1]} : vector<4x256xf32> to vector<4x128xf32>
    %30 = vector.extract_strided_slice %2 {offsets = [12, 0], sizes = [4, 128], strides = [1, 1]} : vector<128x128xf32> to vector<4x128xf32>
    %31 = vector.extract_strided_slice %2 {offsets = [76, 0], sizes = [4, 128], strides = [1, 1]} : vector<128x128xf32> to vector<4x128xf32>
    %32 = tpu.concatenate %30, %31 in 1 : vector<4x128xf32>, vector<4x128xf32> -> vector<4x256xf32>
    %33 = arith.truncf %32 : vector<4x256xf32> to vector<4x256xbf16>
    %c3 = arith.constant 3 : index
    %c0_13 = arith.constant 0 : index
    %c0_14 = arith.constant 0 : index
    %34 = vector.load %arg3[%c3, %c0_13, %c0_14] : memref<16x256x256xbf16, #tpu.memory_space<vmem>>, vector<1x256x256xbf16>
    %35 = vector.shape_cast %34 : vector<1x256x256xbf16> to vector<256x256xbf16>
    %cst_15 = arith.constant dense<0.000000e+00> : vector<4x256xf32>
    %36 = tpu.matmul %33, %35, %cst_15 {dimension_numbers = #tpu.dot_dimension_numbers<[1], [0], [0], [1], [0, 0, 1, 1], [], []>} : vector<4x256xbf16>, vector<256x256xbf16>, vector<4x256xf32> -> vector<4x256xf32>
    %37 = vector.extract_strided_slice %36 {offsets = [0, 0], sizes = [4, 128], strides = [1, 1]} : vector<4x256xf32> to vector<4x128xf32>
    %38 = vector.extract_strided_slice %36 {offsets = [0, 128], sizes = [4, 128], strides = [1, 1]} : vector<4x256xf32> to vector<4x128xf32>
    %39 = vector.extract_strided_slice %2 {offsets = [16, 0], sizes = [4, 128], strides = [1, 1]} : vector<128x128xf32> to vector<4x128xf32>
    %40 = vector.extract_strided_slice %2 {offsets = [80, 0], sizes = [4, 128], strides = [1, 1]} : vector<128x128xf32> to vector<4x128xf32>
    %41 = tpu.concatenate %39, %40 in 1 : vector<4x128xf32>, vector<4x128xf32> -> vector<4x256xf32>
    %42 = arith.truncf %41 : vector<4x256xf32> to vector<4x256xbf16>
    %c4 = arith.constant 4 : index
    %c0_16 = arith.constant 0 : index
    %c0_17 = arith.constant 0 : index
    %43 = vector.load %arg3[%c4, %c0_16, %c0_17] : memref<16x256x256xbf16, #tpu.memory_space<vmem>>, vector<1x256x256xbf16>
    %44 = vector.shape_cast %43 : vector<1x256x256xbf16> to vector<256x256xbf16>
    %cst_18 = arith.constant dense<0.000000e+00> : vector<4x256xf32>
    %45 = tpu.matmul %42, %44, %cst_18 {dimension_numbers = #tpu.dot_dimension_numbers<[1], [0], [0], [1], [0, 0, 1, 1], [], []>} : vector<4x256xbf16>, vector<256x256xbf16>, vector<4x256xf32> -> vector<4x256xf32>
    %46 = vector.extract_strided_slice %45 {offsets = [0, 0], sizes = [4, 128], strides = [1, 1]} : vector<4x256xf32> to vector<4x128xf32>
    %47 = vector.extract_strided_slice %45 {offsets = [0, 128], sizes = [4, 128], strides = [1, 1]} : vector<4x256xf32> to vector<4x128xf32>
    %48 = vector.extract_strided_slice %2 {offsets = [20, 0], sizes = [4, 128], strides = [1, 1]} : vector<128x128xf32> to vector<4x128xf32>
    %49 = vector.extract_strided_slice %2 {offsets = [84, 0], sizes = [4, 128], strides = [1, 1]} : vector<128x128xf32> to vector<4x128xf32>
    %50 = tpu.concatenate %48, %49 in 1 : vector<4x128xf32>, vector<4x128xf32> -> vector<4x256xf32>
    %51 = arith.truncf %50 : vector<4x256xf32> to vector<4x256xbf16>
    %c5 = arith.constant 5 : index
    %c0_19 = arith.constant 0 : index
    %c0_20 = arith.constant 0 : index
    %52 = vector.load %arg3[%c5, %c0_19, %c0_20] : memref<16x256x256xbf16, #tpu.memory_space<vmem>>, vector<1x256x256xbf16>
    %53 = vector.shape_cast %52 : vector<1x256x256xbf16> to vector<256x256xbf16>
    %cst_21 = arith.constant dense<0.000000e+00> : vector<4x256xf32>
    %54 = tpu.matmul %51, %53, %cst_21 {dimension_numbers = #tpu.dot_dimension_numbers<[1], [0], [0], [1], [0, 0, 1, 1], [], []>} : vector<4x256xbf16>, vector<256x256xbf16>, vector<4x256xf32> -> vector<4x256xf32>
    %55 = vector.extract_strided_slice %54 {offsets = [0, 0], sizes = [4, 128], strides = [1, 1]} : vector<4x256xf32> to vector<4x128xf32>
    %56 = vector.extract_strided_slice %54 {offsets = [0, 128], sizes = [4, 128], strides = [1, 1]} : vector<4x256xf32> to vector<4x128xf32>
    %57 = vector.extract_strided_slice %2 {offsets = [24, 0], sizes = [4, 128], strides = [1, 1]} : vector<128x128xf32> to vector<4x128xf32>
    %58 = vector.extract_strided_slice %2 {offsets = [88, 0], sizes = [4, 128], strides = [1, 1]} : vector<128x128xf32> to vector<4x128xf32>
    %59 = tpu.concatenate %57, %58 in 1 : vector<4x128xf32>, vector<4x128xf32> -> vector<4x256xf32>
    %60 = arith.truncf %59 : vector<4x256xf32> to vector<4x256xbf16>
    %c6 = arith.constant 6 : index
    %c0_22 = arith.constant 0 : index
    %c0_23 = arith.constant 0 : index
    %61 = vector.load %arg3[%c6, %c0_22, %c0_23] : memref<16x256x256xbf16, #tpu.memory_space<vmem>>, vector<1x256x256xbf16>
    %62 = vector.shape_cast %61 : vector<1x256x256xbf16> to vector<256x256xbf16>
    %cst_24 = arith.constant dense<0.000000e+00> : vector<4x256xf32>
    %63 = tpu.matmul %60, %62, %cst_24 {dimension_numbers = #tpu.dot_dimension_numbers<[1], [0], [0], [1], [0, 0, 1, 1], [], []>} : vector<4x256xbf16>, vector<256x256xbf16>, vector<4x256xf32> -> vector<4x256xf32>
    %64 = vector.extract_strided_slice %63 {offsets = [0, 0], sizes = [4, 128], strides = [1, 1]} : vector<4x256xf32> to vector<4x128xf32>
    %65 = vector.extract_strided_slice %63 {offsets = [0, 128], sizes = [4, 128], strides = [1, 1]} : vector<4x256xf32> to vector<4x128xf32>
    %66 = vector.extract_strided_slice %2 {offsets = [28, 0], sizes = [4, 128], strides = [1, 1]} : vector<128x128xf32> to vector<4x128xf32>
    %67 = vector.extract_strided_slice %2 {offsets = [92, 0], sizes = [4, 128], strides = [1, 1]} : vector<128x128xf32> to vector<4x128xf32>
    %68 = tpu.concatenate %66, %67 in 1 : vector<4x128xf32>, vector<4x128xf32> -> vector<4x256xf32>
    %69 = arith.truncf %68 : vector<4x256xf32> to vector<4x256xbf16>
    %c7 = arith.constant 7 : index
    %c0_25 = arith.constant 0 : index
    %c0_26 = arith.constant 0 : index
    %70 = vector.load %arg3[%c7, %c0_25, %c0_26] : memref<16x256x256xbf16, #tpu.memory_space<vmem>>, vector<1x256x256xbf16>
    %71 = vector.shape_cast %70 : vector<1x256x256xbf16> to vector<256x256xbf16>
    %cst_27 = arith.constant dense<0.000000e+00> : vector<4x256xf32>
    %72 = tpu.matmul %69, %71, %cst_27 {dimension_numbers = #tpu.dot_dimension_numbers<[1], [0], [0], [1], [0, 0, 1, 1], [], []>} : vector<4x256xbf16>, vector<256x256xbf16>, vector<4x256xf32> -> vector<4x256xf32>
    %73 = vector.extract_strided_slice %72 {offsets = [0, 0], sizes = [4, 128], strides = [1, 1]} : vector<4x256xf32> to vector<4x128xf32>
    %74 = vector.extract_strided_slice %72 {offsets = [0, 128], sizes = [4, 128], strides = [1, 1]} : vector<4x256xf32> to vector<4x128xf32>
    %75 = vector.extract_strided_slice %2 {offsets = [32, 0], sizes = [4, 128], strides = [1, 1]} : vector<128x128xf32> to vector<4x128xf32>
    %76 = vector.extract_strided_slice %2 {offsets = [96, 0], sizes = [4, 128], strides = [1, 1]} : vector<128x128xf32> to vector<4x128xf32>
    %77 = tpu.concatenate %75, %76 in 1 : vector<4x128xf32>, vector<4x128xf32> -> vector<4x256xf32>
    %78 = arith.truncf %77 : vector<4x256xf32> to vector<4x256xbf16>
    %c8 = arith.constant 8 : index
    %c0_28 = arith.constant 0 : index
    %c0_29 = arith.constant 0 : index
    %79 = vector.load %arg3[%c8, %c0_28, %c0_29] : memref<16x256x256xbf16, #tpu.memory_space<vmem>>, vector<1x256x256xbf16>
    %80 = vector.shape_cast %79 : vector<1x256x256xbf16> to vector<256x256xbf16>
    %cst_30 = arith.constant dense<0.000000e+00> : vector<4x256xf32>
    %81 = tpu.matmul %78, %80, %cst_30 {dimension_numbers = #tpu.dot_dimension_numbers<[1], [0], [0], [1], [0, 0, 1, 1], [], []>} : vector<4x256xbf16>, vector<256x256xbf16>, vector<4x256xf32> -> vector<4x256xf32>
    %82 = vector.extract_strided_slice %81 {offsets = [0, 0], sizes = [4, 128], strides = [1, 1]} : vector<4x256xf32> to vector<4x128xf32>
    %83 = vector.extract_strided_slice %81 {offsets = [0, 128], sizes = [4, 128], strides = [1, 1]} : vector<4x256xf32> to vector<4x128xf32>
    %84 = vector.extract_strided_slice %2 {offsets = [36, 0], sizes = [4, 128], strides = [1, 1]} : vector<128x128xf32> to vector<4x128xf32>
    %85 = vector.extract_strided_slice %2 {offsets = [100, 0], sizes = [4, 128], strides = [1, 1]} : vector<128x128xf32> to vector<4x128xf32>
    %86 = tpu.concatenate %84, %85 in 1 : vector<4x128xf32>, vector<4x128xf32> -> vector<4x256xf32>
    %87 = arith.truncf %86 : vector<4x256xf32> to vector<4x256xbf16>
    %c9 = arith.constant 9 : index
    %c0_31 = arith.constant 0 : index
    %c0_32 = arith.constant 0 : index
    %88 = vector.load %arg3[%c9, %c0_31, %c0_32] : memref<16x256x256xbf16, #tpu.memory_space<vmem>>, vector<1x256x256xbf16>
    %89 = vector.shape_cast %88 : vector<1x256x256xbf16> to vector<256x256xbf16>
    %cst_33 = arith.constant dense<0.000000e+00> : vector<4x256xf32>
    %90 = tpu.matmul %87, %89, %cst_33 {dimension_numbers = #tpu.dot_dimension_numbers<[1], [0], [0], [1], [0, 0, 1, 1], [], []>} : vector<4x256xbf16>, vector<256x256xbf16>, vector<4x256xf32> -> vector<4x256xf32>
    %91 = vector.extract_strided_slice %90 {offsets = [0, 0], sizes = [4, 128], strides = [1, 1]} : vector<4x256xf32> to vector<4x128xf32>
    %92 = vector.extract_strided_slice %90 {offsets = [0, 128], sizes = [4, 128], strides = [1, 1]} : vector<4x256xf32> to vector<4x128xf32>
    %93 = vector.extract_strided_slice %2 {offsets = [40, 0], sizes = [4, 128], strides = [1, 1]} : vector<128x128xf32> to vector<4x128xf32>
    %94 = vector.extract_strided_slice %2 {offsets = [104, 0], sizes = [4, 128], strides = [1, 1]} : vector<128x128xf32> to vector<4x128xf32>
    %95 = tpu.concatenate %93, %94 in 1 : vector<4x128xf32>, vector<4x128xf32> -> vector<4x256xf32>
    %96 = arith.truncf %95 : vector<4x256xf32> to vector<4x256xbf16>
    %c10 = arith.constant 10 : index
    %c0_34 = arith.constant 0 : index
    %c0_35 = arith.constant 0 : index
    %97 = vector.load %arg3[%c10, %c0_34, %c0_35] : memref<16x256x256xbf16, #tpu.memory_space<vmem>>, vector<1x256x256xbf16>
    %98 = vector.shape_cast %97 : vector<1x256x256xbf16> to vector<256x256xbf16>
    %cst_36 = arith.constant dense<0.000000e+00> : vector<4x256xf32>
    %99 = tpu.matmul %96, %98, %cst_36 {dimension_numbers = #tpu.dot_dimension_numbers<[1], [0], [0], [1], [0, 0, 1, 1], [], []>} : vector<4x256xbf16>, vector<256x256xbf16>, vector<4x256xf32> -> vector<4x256xf32>
    %100 = vector.extract_strided_slice %99 {offsets = [0, 0], sizes = [4, 128], strides = [1, 1]} : vector<4x256xf32> to vector<4x128xf32>
    %101 = vector.extract_strided_slice %99 {offsets = [0, 128], sizes = [4, 128], strides = [1, 1]} : vector<4x256xf32> to vector<4x128xf32>
    %102 = vector.extract_strided_slice %2 {offsets = [44, 0], sizes = [4, 128], strides = [1, 1]} : vector<128x128xf32> to vector<4x128xf32>
    %103 = vector.extract_strided_slice %2 {offsets = [108, 0], sizes = [4, 128], strides = [1, 1]} : vector<128x128xf32> to vector<4x128xf32>
    %104 = tpu.concatenate %102, %103 in 1 : vector<4x128xf32>, vector<4x128xf32> -> vector<4x256xf32>
    %105 = arith.truncf %104 : vector<4x256xf32> to vector<4x256xbf16>
    %c11 = arith.constant 11 : index
    %c0_37 = arith.constant 0 : index
    %c0_38 = arith.constant 0 : index
    %106 = vector.load %arg3[%c11, %c0_37, %c0_38] : memref<16x256x256xbf16, #tpu.memory_space<vmem>>, vector<1x256x256xbf16>
    %107 = vector.shape_cast %106 : vector<1x256x256xbf16> to vector<256x256xbf16>
    %cst_39 = arith.constant dense<0.000000e+00> : vector<4x256xf32>
    %108 = tpu.matmul %105, %107, %cst_39 {dimension_numbers = #tpu.dot_dimension_numbers<[1], [0], [0], [1], [0, 0, 1, 1], [], []>} : vector<4x256xbf16>, vector<256x256xbf16>, vector<4x256xf32> -> vector<4x256xf32>
    %109 = vector.extract_strided_slice %108 {offsets = [0, 0], sizes = [4, 128], strides = [1, 1]} : vector<4x256xf32> to vector<4x128xf32>
    %110 = vector.extract_strided_slice %108 {offsets = [0, 128], sizes = [4, 128], strides = [1, 1]} : vector<4x256xf32> to vector<4x128xf32>
    %111 = vector.extract_strided_slice %2 {offsets = [48, 0], sizes = [4, 128], strides = [1, 1]} : vector<128x128xf32> to vector<4x128xf32>
    %112 = vector.extract_strided_slice %2 {offsets = [112, 0], sizes = [4, 128], strides = [1, 1]} : vector<128x128xf32> to vector<4x128xf32>
    %113 = tpu.concatenate %111, %112 in 1 : vector<4x128xf32>, vector<4x128xf32> -> vector<4x256xf32>
    %114 = arith.truncf %113 : vector<4x256xf32> to vector<4x256xbf16>
    %c12 = arith.constant 12 : index
    %c0_40 = arith.constant 0 : index
    %c0_41 = arith.constant 0 : index
    %115 = vector.load %arg3[%c12, %c0_40, %c0_41] : memref<16x256x256xbf16, #tpu.memory_space<vmem>>, vector<1x256x256xbf16>
    %116 = vector.shape_cast %115 : vector<1x256x256xbf16> to vector<256x256xbf16>
    %cst_42 = arith.constant dense<0.000000e+00> : vector<4x256xf32>
    %117 = tpu.matmul %114, %116, %cst_42 {dimension_numbers = #tpu.dot_dimension_numbers<[1], [0], [0], [1], [0, 0, 1, 1], [], []>} : vector<4x256xbf16>, vector<256x256xbf16>, vector<4x256xf32> -> vector<4x256xf32>
    %118 = vector.extract_strided_slice %117 {offsets = [0, 0], sizes = [4, 128], strides = [1, 1]} : vector<4x256xf32> to vector<4x128xf32>
    %119 = vector.extract_strided_slice %117 {offsets = [0, 128], sizes = [4, 128], strides = [1, 1]} : vector<4x256xf32> to vector<4x128xf32>
    %120 = vector.extract_strided_slice %2 {offsets = [52, 0], sizes = [4, 128], strides = [1, 1]} : vector<128x128xf32> to vector<4x128xf32>
    %121 = vector.extract_strided_slice %2 {offsets = [116, 0], sizes = [4, 128], strides = [1, 1]} : vector<128x128xf32> to vector<4x128xf32>
    %122 = tpu.concatenate %120, %121 in 1 : vector<4x128xf32>, vector<4x128xf32> -> vector<4x256xf32>
    %123 = arith.truncf %122 : vector<4x256xf32> to vector<4x256xbf16>
    %c13 = arith.constant 13 : index
    %c0_43 = arith.constant 0 : index
    %c0_44 = arith.constant 0 : index
    %124 = vector.load %arg3[%c13, %c0_43, %c0_44] : memref<16x256x256xbf16, #tpu.memory_space<vmem>>, vector<1x256x256xbf16>
    %125 = vector.shape_cast %124 : vector<1x256x256xbf16> to vector<256x256xbf16>
    %cst_45 = arith.constant dense<0.000000e+00> : vector<4x256xf32>
    %126 = tpu.matmul %123, %125, %cst_45 {dimension_numbers = #tpu.dot_dimension_numbers<[1], [0], [0], [1], [0, 0, 1, 1], [], []>} : vector<4x256xbf16>, vector<256x256xbf16>, vector<4x256xf32> -> vector<4x256xf32>
    %127 = vector.extract_strided_slice %126 {offsets = [0, 0], sizes = [4, 128], strides = [1, 1]} : vector<4x256xf32> to vector<4x128xf32>
    %128 = vector.extract_strided_slice %126 {offsets = [0, 128], sizes = [4, 128], strides = [1, 1]} : vector<4x256xf32> to vector<4x128xf32>
    %129 = vector.extract_strided_slice %2 {offsets = [56, 0], sizes = [4, 128], strides = [1, 1]} : vector<128x128xf32> to vector<4x128xf32>
    %130 = vector.extract_strided_slice %2 {offsets = [120, 0], sizes = [4, 128], strides = [1, 1]} : vector<128x128xf32> to vector<4x128xf32>
    %131 = tpu.concatenate %129, %130 in 1 : vector<4x128xf32>, vector<4x128xf32> -> vector<4x256xf32>
    %132 = arith.truncf %131 : vector<4x256xf32> to vector<4x256xbf16>
    %c14 = arith.constant 14 : index
    %c0_46 = arith.constant 0 : index
    %c0_47 = arith.constant 0 : index
    %133 = vector.load %arg3[%c14, %c0_46, %c0_47] : memref<16x256x256xbf16, #tpu.memory_space<vmem>>, vector<1x256x256xbf16>
    %134 = vector.shape_cast %133 : vector<1x256x256xbf16> to vector<256x256xbf16>
    %cst_48 = arith.constant dense<0.000000e+00> : vector<4x256xf32>
    %135 = tpu.matmul %132, %134, %cst_48 {dimension_numbers = #tpu.dot_dimension_numbers<[1], [0], [0], [1], [0, 0, 1, 1], [], []>} : vector<4x256xbf16>, vector<256x256xbf16>, vector<4x256xf32> -> vector<4x256xf32>
    %136 = vector.extract_strided_slice %135 {offsets = [0, 0], sizes = [4, 128], strides = [1, 1]} : vector<4x256xf32> to vector<4x128xf32>
    %137 = vector.extract_strided_slice %135 {offsets = [0, 128], sizes = [4, 128], strides = [1, 1]} : vector<4x256xf32> to vector<4x128xf32>
    %138 = vector.extract_strided_slice %2 {offsets = [60, 0], sizes = [4, 128], strides = [1, 1]} : vector<128x128xf32> to vector<4x128xf32>
    %139 = vector.extract_strided_slice %2 {offsets = [124, 0], sizes = [4, 128], strides = [1, 1]} : vector<128x128xf32> to vector<4x128xf32>
    %140 = tpu.concatenate %138, %139 in 1 : vector<4x128xf32>, vector<4x128xf32> -> vector<4x256xf32>
    %141 = arith.truncf %140 : vector<4x256xf32> to vector<4x256xbf16>
    %c15 = arith.constant 15 : index
    %c0_49 = arith.constant 0 : index
    %c0_50 = arith.constant 0 : index
    %142 = vector.load %arg3[%c15, %c0_49, %c0_50] : memref<16x256x256xbf16, #tpu.memory_space<vmem>>, vector<1x256x256xbf16>
    %143 = vector.shape_cast %142 : vector<1x256x256xbf16> to vector<256x256xbf16>
    %cst_51 = arith.constant dense<0.000000e+00> : vector<4x256xf32>
    %144 = tpu.matmul %141, %143, %cst_51 {dimension_numbers = #tpu.dot_dimension_numbers<[1], [0], [0], [1], [0, 0, 1, 1], [], []>} : vector<4x256xbf16>, vector<256x256xbf16>, vector<4x256xf32> -> vector<4x256xf32>
    %145 = vector.extract_strided_slice %144 {offsets = [0, 0], sizes = [4, 128], strides = [1, 1]} : vector<4x256xf32> to vector<4x128xf32>
    %146 = vector.extract_strided_slice %144 {offsets = [0, 128], sizes = [4, 128], strides = [1, 1]} : vector<4x256xf32> to vector<4x128xf32>
    %147 = tpu.concatenate %10, %19, %28, %37, %46, %55, %64, %73, %82, %91, %100, %109, %118, %127, %136, %145 in 0 : vector<4x128xf32>, vector<4x128xf32>, vector<4x128xf32>, vector<4x128xf32>, vector<4x128xf32>, vector<4x128xf32>, vector<4x128xf32>, vector<4x128xf32>, vector<4x128xf32>, vector<4x128xf32>, vector<4x128xf32>, vector<4x128xf32>, vector<4x128xf32>, vector<4x128xf32>, vector<4x128xf32>, vector<4x128xf32> -> vector<64x128xf32>
    %148 = tpu.concatenate %11, %20, %29, %38, %47, %56, %65, %74, %83, %92, %101, %110, %119, %128, %137, %146 in 0 : vector<4x128xf32>, vector<4x128xf32>, vector<4x128xf32>, vector<4x128xf32>, vector<4x128xf32>, vector<4x128xf32>, vector<4x128xf32>, vector<4x128xf32>, vector<4x128xf32>, vector<4x128xf32>, vector<4x128xf32>, vector<4x128xf32>, vector<4x128xf32>, vector<4x128xf32>, vector<4x128xf32>, vector<4x128xf32> -> vector<64x128xf32>
    %149 = tpu.concatenate %147, %148 in 0 : vector<64x128xf32>, vector<64x128xf32> -> vector<128x128xf32>
    %c0_52 = arith.constant 0 : index
    %c0_53 = arith.constant 0 : index
    %150 = vector.load %arg4[%c0_52, %c0_53] : memref<256x128xf32, #tpu.memory_space<vmem>>, vector<256x128xf32>
    %cst_54 = arith.constant dense<0.000000e+00> : vector<256x128xf32>
    %151 = tpu.matmul %150, %149, %cst_54 {dimension_numbers = #tpu.dot_dimension_numbers<[1], [0], [0], [1], [0, 0, 1, 1], [], []>} : vector<256x128xf32>, vector<128x128xf32>, vector<256x128xf32> -> vector<256x128xf32>
    %c0_55 = arith.constant 0 : index
    %c0_56 = arith.constant 0 : index
    %152 = vector.load %arg5[%c0_55, %c0_56] : memref<256x128xf32, #tpu.memory_space<vmem>>, vector<256x128xf32>
    tpu.vector_store %arg5[%c0_55, %c0_56], %151 {strides = array<i32>} : memref<256x128xf32, #tpu.memory_space<vmem>>, vector<256x128xf32>,
    return
  }
  func.func @transform_0(%arg0: i32) -> (i32, i32) {
    %c0_i32 = arith.constant 0 : i32
    %c0_i32_0 = arith.constant 0 : i32
    return %arg0, %c0_i32 : i32, i32
  }
  func.func @transform_1(%arg0: i32) -> (i32, i32) {
    %c0_i32 = arith.constant 0 : i32
    %c0_i32_0 = arith.constant 0 : i32
    %c0_i32_1 = arith.constant 0 : i32
    return %c0_i32, %c0_i32_0 : i32, i32
  }
  func.func @transform_2(%arg0: i32) -> (i32, i32, i32) {
    %c0_i32 = arith.constant 0 : i32
    %c0_i32_0 = arith.constant 0 : i32
    %c0_i32_1 = arith.constant 0 : i32
    %c0_i32_2 = arith.constant 0 : i32
    return %c0_i32, %c0_i32_0, %c0_i32_1 : i32, i32, i32
  }
  func.func @transform_3(%arg0: i32) -> (i32, i32) {
    %c0_i32 = arith.constant 0 : i32
    %c0_i32_0 = arith.constant 0 : i32
    %c0_i32_1 = arith.constant 0 : i32
    return %c0_i32, %c0_i32_0 : i32, i32
  }
  func.func @transform_4(%arg0: i32) -> (i32, i32) {
    %c0_i32 = arith.constant 0 : i32
    %c0_i32_0 = arith.constant 0 : i32
    return %arg0, %c0_i32 : i32, i32
  }
}

</mosaic_0001>

<bundles_post_ra>
// kernel: sparse_kernel_ft1d.1
= control target key start
LH: loop header
LB: loop body
LE: loop exit
PB: predicated region body
PF: predicated region fallthrough
CT: control target
= control target key end

     0   :  { %vm4057_vm0 = vcmask 1043456   ;;  %s8466_s0 = inlined_call_operand.vmem [shape: f32[256,128], index: 0, kind: input, shape index: {}]   ;;  %s8467_s1 = inlined_call_operand.vmem [shape: f32[128,256], index: 1, kind: input, shape index: {}]   ;;  %s8468_s2 = inlined_call_operand.vmem [shape: bf16[16,256,256], index: 2, kind: input, shape index: {}]   ;;  %s8469_s3 = inlined_call_operand.vmem [shape: f32[256,128], index: 3, kind: input, shape index: {}]   ;;  %s8470_s4 = inlined_call_operand.vmem [shape: f32[256,128], index: 4, kind: output, shape index: {}]  }
   0x1   :  { %v48_v0 = vld [vmem:[%s8466_s0 + $0xf8] sm:$0xff]  ;;  %v47_v2 = vld [vmem:[%s8466_s0 + $0xf0] sm:$0xff]  ;;  %v46_v4 = vld [vmem:[%s8466_s0 + $0xe8] sm:$0xff] }
   0x2   :  { %v32_v1 = vld [vmem:[%s8466_s0 + $0x78] sm:$0xff]  ;;  %5383 = vmatprep.subr.mxu0 %v48_v0  ;;  %v31_v3 = vld [vmem:[%s8466_s0 + $0x70] sm:$0xff]  ;;  %v30_v5 = vld [vmem:[%s8466_s0 + $0x68] sm:$0xff] }
   0x3   :  { %5384 = vmatpush3.msra.mxu0 %v32_v1  ;;  %v45_v6 = vld [vmem:[%s8466_s0 + $0xe0] sm:$0xff]  ;;  %v44_v8 = vld [vmem:[%s8466_s0 + $0xd8] sm:$0xff]  ;;  %v43_v10 = vld [vmem:[%s8466_s0 + $0xd0] sm:$0xff] }
   0x4   :  { %5385 = vmatprep.subr.mxu0 %v47_v2  ;;  %v29_v7 = vld [vmem:[%s8466_s0 + $0x60] sm:$0xff]  ;;  %v28_v9 = vld [vmem:[%s8466_s0 + $0x58] sm:$0xff]  ;;  %v27_v11 = vld [vmem:[%s8466_s0 + $0x50] sm:$0xff] }
   0x5   :  { %5386 = vmatpush3.msra.mxu0 %v31_v3  ;;  %v42_v12 = vld [vmem:[%s8466_s0 + $0xc8] sm:$0xff]  ;;  %v41_v15 = vld [vmem:[%s8466_s0 + $0xc0] sm:$0xff]  ;;  %v40_v17 = vld [vmem:[%s8466_s0 + $0xb8] sm:$0xff] }
   0x6   :  { %5387 = vmatprep.subr.mxu0 %v46_v4  ;;  %v50_v13 = vld [vmem:[%s8467_s1 + $0x8] sm:$0xff]  ;;  %v25_v16 = vld [vmem:[%s8466_s0 + $0x40] sm:$0xff]  ;;  %v24_v18 = vld [vmem:[%s8466_s0 + $0x38] sm:$0xff] }
   0x7   :  { %5388 = vmatpush3.msra.mxu0 %v30_v5  ;;  %v26_v14 = vld [vmem:[%s8466_s0 + $0x48] sm:$0xff]  ;;  %145 = vmatprep.mubr.f32.mxu0 %v50_v13  ;;  %v39_v19 = vld [vmem:[%s8466_s0 + $0xb0] sm:$0xff]  ;;  %v37_v23 = vld [vmem:[%s8466_s0 + $0xa0] sm:$0xff] }
   0x8   :  { %5389 = vmatprep.subr.mxu0 %v45_v6  ;;  %v23_v20 = vld [vmem:[%s8466_s0 + $0x30] sm:$0xff]  ;;  %v38_v21 = vld [vmem:[%s8466_s0 + $0xa8] sm:$0xff]  ;;  %v21_v26 = vld [vmem:[%s8466_s0 + $0x20] sm:$0xff] }
   0x9   :  { %5390 = vmatpush3.msra.mxu0 %v29_v7  ;;  %v22_v22 = vld [vmem:[%s8466_s0 + $0x28] sm:$0xff]  ;;  %v5623_v24 = vld [vmem:[%s8468_s2 + $0x74] ss:$8 sps:$4 sm:$0xff]   ;;  %v5625_v25 = vld [vmem:[%s8468_s2 + $0x70] ss:$8 sps:$4 sm:$0xff]  }
   0xa   :  { %5391 = vmatprep.subr.mxu0 %v44_v8  ;;  %v36_v27 = vld [vmem:[%s8466_s0 + $0x98] sm:$0xff]  ;;  %420 = vmatprep.subr.bf16.mxu1 %v5623_v24  ;;  %v5629_v29 = vld [vmem:[%s8468_s2 + $0x64] ss:$8 sps:$4 sm:$0xff]   ;;  %v5631_v30 = vld [vmem:[%s8468_s2 + $0x60] ss:$8 sps:$4 sm:$0xff]  }
   0xb   :  { %5392 = vmatpush3.msra.mxu0 %v28_v9  ;;  %v20_v28 = vld [vmem:[%s8466_s0 + $0x18] sm:$0xff]  ;;  %421 = vmatpush1.bf16.msra.mxu1 %v5625_v25  ;;  %v35_v31 = vld [vmem:[%s8466_s0 + $0x90] sm:$0xff]  ;;  %v34_v33 = vld [vmem:[%s8466_s0 + $0x88] sm:$0xff] }
   0xc   :  { %5393 = vmatprep.subr.mxu0 %v43_v10  ;;  %v19_v32 = vld [vmem:[%s8466_s0 + $0x10] sm:$0xff]  ;;  %422 = vmatprep.subr.bf16.mxu1 %v5629_v29  ;;  %v18_v35 = vld [vmem:[%s8466_s0 + $0x8] sm:$0xff]  ;;  %v33_v38 = vld [vmem:[%s8466_s0 + $0x80] sm:$0xff] }
   0xd   :  { %5394 = vmatpush3.msra.mxu0 %v27_v11  ;;  %v5635_v34 = vld [vmem:[%s8468_s2 + $0x54] ss:$8 sps:$4 sm:$0xff]   ;;  %v5637_v36 = vld [vmem:[%s8468_s2 + $0x50] ss:$8 sps:$4 sm:$0xff]   ;;  %v5641_v37 = vld [vmem:[%s8468_s2 + $0x44] ss:$8 sps:$4 sm:$0xff]  }
   0xe   :  { %5395 = vmatprep.subr.mxu0 %v42_v12  ;;  %v17_v39 = vld [vmem:[%s8466_s0] sm:$0xff]  ;;  %v52_v41 = vld [vmem:[%s8467_s1 + $0x18] sm:$0xff]  ;;  %v51_v46 = vld [vmem:[%s8467_s1 + $0x10] sm:$0xff] }
   0xf   :  { %5396 = vmatpush3.msra.mxu0 %v26_v14  ;;  %423 = vmatpush1.bf16.msra.mxu1 %v5631_v30  ;;  %v49_v40 = vld [vmem:[%s8467_s1] sm:$0xff]  ;;  %v5626_v42 = vld [vmem:[%s8468_s2 + $0x170] ss:$8 sps:$4 sm:$0xff]   ;;  %v5628_v43 = vld [vmem:[%s8468_s2 + $0x174] ss:$8 sps:$4 sm:$0xff]  }
  0x10   :  { %5397 = vmatprep.subr.mxu0 %v41_v15  ;;  %424 = vmatprep.subr.bf16.mxu1 %v5635_v34  ;;  %v5634_v44 = vld [vmem:[%s8468_s2 + $0x164] ss:$8 sps:$4 sm:$0xff]   ;;  %v5643_v45 = vld [vmem:[%s8468_s2 + $0x40] ss:$8 sps:$4 sm:$0xff]   ;;  %v5647_v48 = vld [vmem:[%s8468_s2 + $0x34] ss:$8 sps:$4 sm:$0xff]  }
  0x11   :  { %5398 = vmatpush3.msra.mxu0 %v25_v16  ;;  %v5632_v47 = vld [vmem:[%s8468_s2 + $0x160] ss:$8 sps:$4 sm:$0xff]   ;;  %v5640_v50 = vld [vmem:[%s8468_s2 + $0x154] ss:$8 sps:$4 sm:$0xff]   ;;  %v5649_v51 = vld [vmem:[%s8468_s2 + $0x30] ss:$8 sps:$4 sm:$0xff]  }
  0x12   :  { %5399 = vmatprep.subr.mxu0 %v40_v17  ;;  %v54_v49 = vld [vmem:[%s8467_s1 + $0x28] sm:$0xff]  ;;  %v53_v53 = vld [vmem:[%s8467_s1 + $0x20] sm:$0xff]  ;;  %v5638_v54 = vld [vmem:[%s8468_s2 + $0x150] ss:$8 sps:$4 sm:$0xff]  }
  0x13   :  { %5400 = vmatpush3.msra.mxu0 %v24_v18  ;;  %425 = vmatpush1.bf16.msra.mxu1 %v5637_v36  ;;  %v5653_v52 = vld [vmem:[%s8468_s2 + $0x24] ss:$8 sps:$4 sm:$0xff]   ;;  %v56_v55 = vld [vmem:[%s8467_s1 + $0x38] sm:$0xff]  ;;  %v5655_v57 = vld [vmem:[%s8468_s2 + $0x20] ss:$8 sps:$4 sm:$0xff]  }
  0x14   :  { %5401 = vmatprep.subr.mxu0 %v39_v19  ;;  %426 = vmatprep.subr.bf16.mxu1 %v5641_v37  ;;  %v5646_v56 = vld [vmem:[%s8468_s2 + $0x144] ss:$8 sps:$4 sm:$0xff]   ;;  %v5659_v58 = vld [vmem:[%s8468_s2 + $0x14] ss:$8 sps:$4 sm:$0xff]   ;;  %v5644_v60 = vld [vmem:[%s8468_s2 + $0x140] ss:$8 sps:$4 sm:$0xff]  }
  0x15   :  { %5402 = vmatpush3.msra.mxu0 %v23_v20  ;;  %v55_v59 = vld [vmem:[%s8467_s1 + $0x30] sm:$0xff]  ;;  %v58_v61 = vld [vmem:[%s8467_s1 + $0x48] sm:$0xff]  ;;  %v57_v63 = vld [vmem:[%s8467_s1 + $0x40] sm:$0xff] }
  0x16   :  { %5403 = vmatprep.subr.mxu0 %v38_v21  ;;  %v5652_v62 = vld [vmem:[%s8468_s2 + $0x134] ss:$8 sps:$4 sm:$0xff]   ;;  %v5650_v0 = vld [vmem:[%s8468_s2 + $0x130] ss:$8 sps:$4 sm:$0xff]   ;;  %v5658_v2 = vld [vmem:[%s8468_s2 + $0x124] ss:$8 sps:$4 sm:$0xff]  }
  0x17   :  { %5404 = vmatpush3.msra.mxu0 %v22_v22  ;;  %427 = vmatpush1.bf16.msra.mxu1 %v5643_v45  ;;  %v60_v1 = vld [vmem:[%s8467_s1 + $0x58] sm:$0xff]  ;;  %v59_v3 = vld [vmem:[%s8467_s1 + $0x50] sm:$0xff]  ;;  %v5656_v4 = vld [vmem:[%s8468_s2 + $0x120] ss:$8 sps:$4 sm:$0xff]  }
  0x18   :  { %5405 = vmatprep.subr.mxu0 %v37_v23  ;;  %428 = vmatprep.subr.bf16.mxu1 %v5647_v48  ;;  %v62_v5 = vld [vmem:[%s8467_s1 + $0x68] sm:$0xff]  ;;  %v61_v6 = vld [vmem:[%s8467_s1 + $0x60] sm:$0xff]  ;;  %v64_v7 = vld [vmem:[%s8467_s1 + $0x78] sm:$0xff] }
  0x19   :  { %5406 = vmatpush3.msra.mxu0 %v21_v26  ;;  %v63_v8 = vld [vmem:[%s8467_s1 + $0x70] sm:$0xff]  ;;  %v66_v9 = vld [vmem:[%s8467_s1 + $0x88] sm:$0xff]  ;;  %v65_v10 = vld [vmem:[%s8467_s1 + $0x80] sm:$0xff] }
  0x1a   :  { %5407 = vmatprep.subr.mxu0 %v36_v27  ;;  %v68_v11 = vld [vmem:[%s8467_s1 + $0x98] sm:$0xff]  ;;  %v67_v12 = vld [vmem:[%s8467_s1 + $0x90] sm:$0xff]  ;;  %v70_v13 = vld [vmem:[%s8467_s1 + $0xa8] sm:$0xff] }
  0x1b   :  { %5408 = vmatpush3.msra.mxu0 %v20_v28  ;;  %429 = vmatpush1.bf16.msra.mxu1 %v5649_v51  ;;  %v69_v14 = vld [vmem:[%s8467_s1 + $0xa0] sm:$0xff]  ;;  %v5661_v15 = vld [vmem:[%s8468_s2 + $0x10] ss:$8 sps:$4 sm:$0xff]   ;;  %v5664_v16 = vld [vmem:[%s8468_s2 + $0x114] ss:$8 sps:$4 sm:$0xff]  }
  0x1c   :  { %5409 = vmatprep.subr.mxu0 %v35_v31  ;;  %430 = vmatprep.subr.bf16.mxu1 %v5653_v52  ;;  %v5662_v17 = vld [vmem:[%s8468_s2 + $0x110] ss:$8 sps:$4 sm:$0xff]   ;;  %v5665_v18 = vld [vmem:[%s8468_s2 + $0x4] ss:$8 sps:$4 sm:$0xff]   ;;  %v5667_v19 = vld [vmem:[%s8468_s2] ss:$8 sps:$4 sm:$0xff]  }
  0x1d   :  { %5410 = vmatpush3.msra.mxu0 %v19_v32  ;;  %v5670_v20 = vld [vmem:[%s8468_s2 + $0x104] ss:$8 sps:$4 sm:$0xff]   ;;  %v5668_v21 = vld [vmem:[%s8468_s2 + $0x100] ss:$8 sps:$4 sm:$0xff]   ;;  %v5671_v22 = vld [vmem:[%s8468_s2 + $0xf4] ss:$8 sps:$4 sm:$0xff]  }
  0x1e   :  { %5411 = vmatprep.subr.mxu0 %v34_v33  ;;  %v5673_v23 = vld [vmem:[%s8468_s2 + $0xf0] ss:$8 sps:$4 sm:$0xff]   ;;  %v5676_v24 = vld [vmem:[%s8468_s2 + $0x1f4] ss:$8 sps:$4 sm:$0xff]   ;;  %v5677_v26 = vld [vmem:[%s8468_s2 + $0xe4] ss:$8 sps:$4 sm:$0xff]  }
  0x1f   :  { %5412 = vmatpush3.msra.mxu0 %v18_v35  ;;  %431 = vmatpush1.bf16.msra.mxu1 %v5655_v57  ;;  %v5674_v25 = vld [vmem:[%s8468_s2 + $0x1f0] ss:$8 sps:$4 sm:$0xff]   ;;  %v5679_v27 = vld [vmem:[%s8468_s2 + $0xe0] ss:$8 sps:$4 sm:$0xff]   ;;  %v5682_v28 = vld [vmem:[%s8468_s2 + $0x1e4] ss:$8 sps:$4 sm:$0xff]  }
  0x20   :  { %5413 = vmatprep.subr.mxu0 %v33_v38  ;;  %432 = vmatprep.subr.bf16.mxu1 %v5659_v58  ;;  %v5680_v29 = vld [vmem:[%s8468_s2 + $0x1e0] ss:$8 sps:$4 sm:$0xff]   ;;  %v5683_v30 = vld [vmem:[%s8468_s2 + $0xd4] ss:$8 sps:$4 sm:$0xff]   ;;  %v5685_v31 = vld [vmem:[%s8468_s2 + $0xd0] ss:$8 sps:$4 sm:$0xff]  }
  0x21   :  { %5414 = vmatpush3.msra.mxu0 %v17_v39  ;;  %v5688_v32 = vld [vmem:[%s8468_s2 + $0x1d4] ss:$8 sps:$4 sm:$0xff]   ;;  %v5686_v33 = vld [vmem:[%s8468_s2 + $0x1d0] ss:$8 sps:$4 sm:$0xff]   ;;  %v5689_v34 = vld [vmem:[%s8468_s2 + $0xc4] ss:$8 sps:$4 sm:$0xff]  }
  0x22   :  { %146 = vmatmul.mubr.f32.vlgmr.msra.gmra.mxu0 %v49_v40  ;;  %660 = vmatprep.subr.bf16.mxu0 %v5628_v43  ;;  %v72_v35 = vld [vmem:[%s8467_s1 + $0xb8] sm:$0xff]  ;;  %v5691_v36 = vld [vmem:[%s8468_s2 + $0xc0] ss:$8 sps:$4 sm:$0xff]   ;;  %v71_v37 = vld [vmem:[%s8467_s1 + $0xb0] sm:$0xff] }
  0x23   :  { %150 = vmatprep.mubr.f32.mxu0 %v52_v41  ;;  %661 = vmatpush1.bf16.msra.mxu0 %v5626_v42  ;;  %v5694_v38 = vld [vmem:[%s8468_s2 + $0x1c4] ss:$8 sps:$4 sm:$0xff]   ;;  %v5692_v39 = vld [vmem:[%s8468_s2 + $0x1c0] ss:$8 sps:$4 sm:$0xff]   ;;  %v5695_v40 = vld [vmem:[%s8468_s2 + $0xb4] ss:$8 sps:$4 sm:$0xff]  }
  0x24   :  { %662 = vmatprep.subr.bf16.mxu0 %v5634_v44  ;;  %433 = vmatpush1.bf16.msra.mxu1 %v5661_v15  ;;  %v74_v41 = vld [vmem:[%s8467_s1 + $0xc8] sm:$0xff]  ;;  %v5697_v42 = vld [vmem:[%s8468_s2 + $0xb0] ss:$8 sps:$4 sm:$0xff]   ;;  %v73_v43 = vld [vmem:[%s8467_s1 + $0xc0] sm:$0xff] }
  0x25   :  { %434 = vmatprep.subr.bf16.mxu1 %v5665_v18  ;;  %v5700_v44 = vld [vmem:[%s8468_s2 + $0x1b4] ss:$8 sps:$4 sm:$0xff]   ;;  %v5698_v45 = vld [vmem:[%s8468_s2 + $0x1b0] ss:$8 sps:$4 sm:$0xff]   ;;  %v5703_v48 = vld [vmem:[%s8468_s2 + $0xa0] ss:$8 sps:$4 sm:$0xff]  }
  0x26   :  { %151 = vmatmul.mubr.f32.gmra.mxu0 %v51_v46  ;;  %v5701_v46 = vld [vmem:[%s8468_s2 + $0xa4] ss:$8 sps:$4 sm:$0xff]   ;;  %v5704_v51 = vld [vmem:[%s8468_s2 + $0x1a0] ss:$8 sps:$4 sm:$0xff]   ;;  %v5707_v52 = vld [vmem:[%s8468_s2 + $0x94] ss:$8 sps:$4 sm:$0xff]  }
  0x27   :  { %155 = vmatprep.mubr.f32.mxu0 %v54_v49  ;;  %663 = vmatpush1.bf16.msra.mxu0 %v5632_v47  ;;  %v76_v47 = vld [vmem:[%s8467_s1 + $0xd8] sm:$0xff]  ;;  %v75_v49 = vld [vmem:[%s8467_s1 + $0xd0] sm:$0xff]  ;;  %v5713_v58 = vld [vmem:[%s8468_s2 + $0x84] ss:$8 sps:$4 sm:$0xff]  }
  0x28   :  { %664 = vmatprep.subr.bf16.mxu0 %v5640_v50  ;;  %435 = vmatpush1.bf16.msra.mxu1 %v5667_v19  ;;  %v5706_v50 = vld [vmem:[%s8468_s2 + $0x1a4] ss:$8 sps:$4 sm:$0xff]   ;;  %v5710_v57 = vld [vmem:[%s8468_s2 + $0x190] ss:$8 sps:$4 sm:$0xff]  }
  0x29   :  { %436 = vmatprep.subr.bf16.mxu1 %v5671_v22 }
  0x2a   :  { %156 = vmatmul.mubr.f32.gmra.mxu0 %v53_v53  ;;  %v78_v53 = vld [vmem:[%s8467_s1 + $0xe8] sm:$0xff] }
  0x2b   :  { %160 = vmatprep.mubr.f32.mxu0 %v56_v55  ;;  %665 = vmatpush1.bf16.msra.mxu0 %v5638_v54  ;;  %v5709_v54 = vld [vmem:[%s8468_s2 + $0x90] ss:$8 sps:$4 sm:$0xff]   ;;  %v77_v55 = vld [vmem:[%s8467_s1 + $0xe0] sm:$0xff] }
  0x2c   :  { %666 = vmatprep.subr.bf16.mxu0 %v5646_v56  ;;  %437 = vmatpush2.bf16.msra.mxu1 %v5673_v23  ;;  %v5712_v56 = vld [vmem:[%s8468_s2 + $0x194] ss:$8 sps:$4 sm:$0xff]  }
  0x2d   :  { %438 = vmatprep.subr.bf16.mxu1 %v5677_v26 }
  0x2e   :  { %161 = vmatmul.mubr.f32.gmra.mxu0 %v55_v59  ;;  %v80_v59 = vld [vmem:[%s8467_s1 + $0xf8] sm:$0xff] }
  0x2f   :  { %165 = vmatprep.mubr.f32.mxu0 %v58_v61  ;;  %667 = vmatpush1.bf16.msra.mxu0 %v5644_v60  ;;  %v5715_v60 = vld [vmem:[%s8468_s2 + $0x80] ss:$8 sps:$4 sm:$0xff]   ;;  %v79_v61 = vld [vmem:[%s8467_s1 + $0xf0] sm:$0xff] }
  0x30   :  { %668 = vmatprep.subr.bf16.mxu0 %v5652_v62  ;;  %439 = vmatpush2.bf16.msra.mxu1 %v5679_v27  ;;  %v5718_v62 = vld [vmem:[%s8468_s2 + $0x184] ss:$8 sps:$4 sm:$0xff]  }
  0x31   :  { %440 = vmatprep.subr.bf16.mxu1 %v5683_v30 }
  0x32   :  { %166 = vmatmul.mubr.f32.gmra.mxu0 %v57_v63  ;;  %v5716_v63 = vld [vmem:[%s8468_s2 + $0x180] ss:$8 sps:$4 sm:$0xff]  }
  0x33   :  { %170 = vmatprep.mubr.f32.mxu0 %v60_v1  ;;  %669 = vmatpush1.bf16.msra.mxu0 %v5650_v0  ;;  %v5721_v0 = vld [vmem:[%s8468_s2 + $0x274] ss:$8 sps:$4 sm:$0xff]  }
  0x34   :  { %670 = vmatprep.subr.bf16.mxu0 %v5658_v2  ;;  %441 = vmatpush2.bf16.msra.mxu1 %v5685_v31  ;;  %v5724_v1 = vld [vmem:[%s8468_s2 + $0x374] ss:$8 sps:$4 sm:$0xff]  }
  0x35   :  { %442 = vmatprep.subr.bf16.mxu1 %v5689_v34 }
  0x36   :  { %171 = vmatmul.mubr.f32.gmra.mxu0 %v59_v3 }
  0x37   :  { %175 = vmatprep.mubr.f32.mxu0 %v62_v5  ;;  %671 = vmatpush1.bf16.msra.mxu0 %v5656_v4 }
  0x38   :  { %672 = vmatprep.subr.bf16.mxu0 %v5664_v16  ;;  %443 = vmatpush2.bf16.msra.mxu1 %v5691_v36  ;;  %v5722_v36 = vld [vmem:[%s8468_s2 + $0x370] ss:$8 sps:$4 sm:$0xff]  }
  0x39   :  { %444 = vmatprep.subr.bf16.mxu1 %v5695_v40  ;;  %v5725_v40 = vld [vmem:[%s8468_s2 + $0x260] ss:$8 sps:$4 sm:$0xff]  }
  0x3a   :  { %176 = vmatmul.mubr.f32.gmra.mxu0 %v61_v6 }
  0x3b   :  { %180 = vmatprep.mubr.f32.mxu0 %v64_v7  ;;  %673 = vmatpush1.bf16.msra.mxu0 %v5662_v17 }
  0x3c   :  { %674 = vmatprep.subr.bf16.mxu0 %v5670_v20  ;;  %445 = vmatpush2.bf16.msra.mxu1 %v5697_v42  ;;  %v5733_v42 = vld [vmem:[%s8468_s2 + $0x254] ss:$8 sps:$4 sm:$0xff]  }
  0x3d   :  { %446 = vmatprep.subr.bf16.mxu1 %v5701_v46  ;;  %v5731_v46 = vld [vmem:[%s8468_s2 + $0x250] ss:$8 sps:$4 sm:$0xff]  }
  0x3e   :  { %181 = vmatmul.mubr.f32.gmra.mxu0 %v63_v8 }
  0x3f   :  { %185 = vmatprep.mubr.f32.mxu0 %v66_v9  ;;  %675 = vmatpush1.bf16.msra.mxu0 %v5668_v21 }
  0x40   :  { %676 = vmatprep.subr.bf16.mxu0 %v5676_v24  ;;  %447 = vmatpush2.bf16.msra.mxu1 %v5703_v48  ;;  %v5734_v48 = vld [vmem:[%s8468_s2 + $0x350] ss:$8 sps:$4 sm:$0xff]  }
  0x41   :  { %448 = vmatprep.subr.bf16.mxu1 %v5707_v52  ;;  %v5740_v52 = vld [vmem:[%s8468_s2 + $0x340] ss:$8 sps:$4 sm:$0xff]  }
  0x42   :  { %186 = vmatmul.mubr.f32.gmra.mxu0 %v65_v10 }
  0x43   :  { %190 = vmatprep.mubr.f32.mxu0 %v68_v11  ;;  %677 = vmatpush2.bf16.msra.mxu0 %v5674_v25 }
  0x44   :  { %678 = vmatprep.subr.bf16.mxu0 %v5682_v28  ;;  %449 = vmatpush2.bf16.msra.mxu1 %v5709_v54  ;;  %v5743_v54 = vld [vmem:[%s8468_s2 + $0x230] ss:$8 sps:$4 sm:$0xff]  }
  0x45   :  { %450 = vmatprep.subr.bf16.mxu1 %v5713_v58  ;;  %v5749_v58 = vld [vmem:[%s8468_s2 + $0x220] ss:$8 sps:$4 sm:$0xff]  }
  0x46   :  { %191 = vmatmul.mubr.f32.gmra.mxu0 %v67_v12 }
  0x47   :  { %195 = vmatprep.mubr.f32.mxu0 %v70_v13  ;;  %679 = vmatpush2.bf16.msra.mxu0 %v5680_v29 }
  0x48   :  { %680 = vmatprep.subr.bf16.mxu0 %v5688_v32  ;;  %451 = vmatpush2.bf16.msra.mxu1 %v5715_v60  ;;  %v5719_v32 = vld [vmem:[%s8468_s2 + $0x270] ss:$8 sps:$4 sm:$0xff]   ;;  %v5752_v60 = vld [vmem:[%s8468_s2 + $0x320] ss:$8 sps:$4 sm:$0xff]  }
  0x49   :  { %896 = vmatprep.subr.bf16.mxu1 %v5721_v0  ;;  %v5758_v0 = vld [vmem:[%s8468_s2 + $0x310] ss:$8 sps:$4 sm:$0xff]  }
  0x4a   :  { %196 = vmatmul.mubr.f32.gmra.mxu0 %v69_v14 }
  0x4b   :  { %681 = vmatpush2.bf16.msra.mxu0 %v5686_v33  ;;  %200 = vmatprep.mubr.f32.mxu0 %v72_v35  ;;  %v5727_v33 = vld [vmem:[%s8468_s2 + $0x264] ss:$8 sps:$4 sm:$0xff]  }
  0x4c   :  { %682 = vmatprep.subr.bf16.mxu0 %v5694_v38 }
  0x4e   :  { %201 = vmatmul.mubr.f32.gmra.mxu0 %v71_v37 }
  0x4f   :  { %683 = vmatpush2.bf16.msra.mxu0 %v5692_v39  ;;  %205 = vmatprep.mubr.f32.mxu0 %v74_v41  ;;  %v5730_v39 = vld [vmem:[%s8468_s2 + $0x364] ss:$8 sps:$4 sm:$0xff]  }
  0x50   :  { %684 = vmatprep.subr.bf16.mxu0 %v5700_v44 }
  0x52   :  { %206 = vmatmul.mubr.f32.gmra.mxu0 %v73_v43  ;;  %v5728_v43 = vld [vmem:[%s8468_s2 + $0x360] ss:$8 sps:$4 sm:$0xff]  }
  0x53   :  { %685 = vmatpush2.bf16.msra.mxu0 %v5698_v45  ;;  %210 = vmatprep.mubr.f32.mxu0 %v76_v47  ;;  %v5736_v45 = vld [vmem:[%s8468_s2 + $0x354] ss:$8 sps:$4 sm:$0xff]   ;;  %v5739_v47 = vld [vmem:[%s8468_s2 + $0x244] ss:$8 sps:$4 sm:$0xff]  }
  0x54   :  { %686 = vmatprep.subr.bf16.mxu0 %v5706_v50  ;;  %v5737_v50 = vld [vmem:[%s8468_s2 + $0x240] ss:$8 sps:$4 sm:$0xff]  }
  0x56   :  { %211 = vmatmul.mubr.f32.gmra.mxu0 %v75_v49  ;;  %v5742_v49 = vld [vmem:[%s8468_s2 + $0x344] ss:$8 sps:$4 sm:$0xff]  }
  0x57   :  { %687 = vmatpush2.bf16.msra.mxu0 %v5704_v51  ;;  %215 = vmatprep.mubr.f32.mxu0 %v78_v53  ;;  %v5745_v51 = vld [vmem:[%s8468_s2 + $0x234] ss:$8 sps:$4 sm:$0xff]  }
  0x58   :  { %688 = vmatprep.subr.bf16.mxu0 %v5712_v56  ;;  %v5748_v53 = vld [vmem:[%s8468_s2 + $0x334] ss:$8 sps:$4 sm:$0xff]   ;;  %v5746_v56 = vld [vmem:[%s8468_s2 + $0x330] ss:$8 sps:$4 sm:$0xff]  }
  0x5a   :  { %216 = vmatmul.mubr.f32.gmra.mxu0 %v77_v55  ;;  %v5751_v55 = vld [vmem:[%s8468_s2 + $0x224] ss:$8 sps:$4 sm:$0xff]  }
  0x5b   :  { %689 = vmatpush2.bf16.msra.mxu0 %v5710_v57  ;;  %220 = vmatprep.mubr.f32.mxu0 %v80_v59  ;;  %v5754_v57 = vld [vmem:[%s8468_s2 + $0x324] ss:$8 sps:$4 sm:$0xff]   ;;  %v5757_v59 = vld [vmem:[%s8468_s2 + $0x214] ss:$8 sps:$4 sm:$0xff]  }
  0x5c   :  { %690 = vmatprep.subr.bf16.mxu0 %v5718_v62  ;;  %v5755_v62 = vld [vmem:[%s8468_s2 + $0x210] ss:$8 sps:$4 sm:$0xff]  }
  0x5e   :  { %221 = vmatmul.mubr.f32.gmra.mxu0 %v79_v61  ;;  %v5760_v61 = vld [vmem:[%s8468_s2 + $0x314] ss:$8 sps:$4 sm:$0xff]  }
  0x5f   :  { %691 = vmatpush2.bf16.msra.mxu0 %v5716_v63  ;;  %v5763_v63 = vld [vmem:[%s8468_s2 + $0x204] ss:$8 sps:$4 sm:$0xff]  }
  0x60   :  { %1136 = vmatprep.subr.bf16.mxu0 %v5724_v1  ;;  %v5766_v1 = vld [vmem:[%s8468_s2 + $0x304] ss:$8 sps:$4 sm:$0xff]  }
  0xe2   :  { %v5415_v2 = vpop.f32.mrf.mxu0 }
  0xe4   :  { %v5416_v3 = vpop.f32.mrf.mxu0 }
  0xe5   :  { %v5417_v25 = vadd.f32 %v5416_v3, %v5415_v2  ;;  %v5761_v2 = vld [vmem:[%s8468_s2 + $0x200] ss:$8 sps:$4 sm:$0xff]   ;;  %v5769_v3 = vld [vmem:[%s8468_s2 + $0x2f4] ss:$8 sps:$4 sm:$0xff]  }
  0xe6   :  { %v5418_v4 = vpop.f32.mrf.mxu0 }
  0xe7   :  { %v226_v29 = vpack.c.bf16 %v5417_v25, %v5417_v25  ;;  %v5790_v25 = vld [vmem:[%s8468_s2 + $0x3c4] ss:$8 sps:$4 sm:$0xff]  }
  0xe8   :  { %v5419_v5 = vpop.f32.mrf.mxu0 }
  0xe9   :  { %v6806_v6 = vadd.f32 %v5419_v5, %v5418_v4  ;;  %v496_v38 = vrot.slane %v226_v29, 2  ;;  %v5764_v4 = vld [vmem:[%s8468_s2 + $0x300] ss:$8 sps:$4 sm:$0xff]   ;;  %v5772_v5 = vld [vmem:[%s8468_s2 + $0x3f4] ss:$8 sps:$4 sm:$0xff]  }
  0xea   :  { %v5421_v7 = vpop.f32.mrf.mxu0 }
  0xec   :  { %v5422_v8 = vpop.f32.mrf.mxu0 }
  0xed   :  { %v6808_v9 = vadd.f32 %v5422_v8, %v5421_v7  ;;  %v5767_v7 = vld [vmem:[%s8468_s2 + $0x2f0] ss:$8 sps:$4 sm:$0xff]   ;;  %v5775_v8 = vld [vmem:[%s8468_s2 + $0x2e4] ss:$8 sps:$4 sm:$0xff]  }
  0xee   :  { %v5424_v10 = vpop.f32.mrf.mxu0 }
  0xf0   :  { %v5425_v11 = vpop.f32.mrf.mxu0 }
  0xf1   :  { %v6810_v12 = vadd.f32 %v5425_v11, %v5424_v10  ;;  %v5770_v10 = vld [vmem:[%s8468_s2 + $0x3f0] ss:$8 sps:$4 sm:$0xff]   ;;  %v5778_v11 = vld [vmem:[%s8468_s2 + $0x3e4] ss:$8 sps:$4 sm:$0xff]  }
  0xf2   :  { %v5427_v13 = vpop.f32.mrf.mxu0 }
  0xf4   :  { %v5428_v14 = vpop.f32.mrf.mxu0 }
  0xf5   :  { %v6812_v15 = vadd.f32 %v5428_v14, %v5427_v13  ;;  %v5773_v13 = vld [vmem:[%s8468_s2 + $0x2e0] ss:$8 sps:$4 sm:$0xff]   ;;  %v5781_v14 = vld [vmem:[%s8468_s2 + $0x2d4] ss:$8 sps:$4 sm:$0xff]  }
  0xf6   :  { %v5430_v16 = vpop.f32.mrf.mxu0 }
  0xf8   :  { %v5431_v17 = vpop.f32.mrf.mxu0 }
  0xf9   :  { %v6814_v18 = vadd.f32 %v5431_v17, %v5430_v16  ;;  %v5776_v16 = vld [vmem:[%s8468_s2 + $0x3e0] ss:$8 sps:$4 sm:$0xff]   ;;  %v5784_v17 = vld [vmem:[%s8468_s2 + $0x3d4] ss:$8 sps:$4 sm:$0xff]  }
  0xfa   :  { %v5433_v19 = vpop.f32.mrf.mxu0 }
  0xfc   :  { %v5434_v20 = vpop.f32.mrf.mxu0 }
  0xfd   :  { %v6816_v21 = vadd.f32 %v5434_v20, %v5433_v19  ;;  %v5779_v19 = vld [vmem:[%s8468_s2 + $0x2d0] ss:$8 sps:$4 sm:$0xff]   ;;  %v5787_v20 = vld [vmem:[%s8468_s2 + $0x2c4] ss:$8 sps:$4 sm:$0xff]  }
  0xfe   :  { %v5436_v22 = vpop.f32.mrf.mxu0 }
 0x100   :  { %v5437_v23 = vpop.f32.mrf.mxu0 }
 0x101   :  { %v6818_v24 = vadd.f32 %v5437_v23, %v5436_v22  ;;  %v5782_v23 = vld [vmem:[%s8468_s2 + $0x3d0] ss:$8 sps:$4 sm:$0xff]  }
 0x102   :  { %v5439_v26 = vpop.f32.mrf.mxu0 }
 0x104   :  { %v5440_v27 = vpop.f32.mrf.mxu0 }
 0x105   :  { %v5441_v28 = vadd.f32 %v5440_v27, %v5439_v26  ;;  %v5785_v26 = vld [vmem:[%s8468_s2 + $0x2c0] ss:$8 sps:$4 sm:$0xff]   ;;  %v5793_v27 = vld [vmem:[%s8468_s2 + $0x2b4] ss:$8 sps:$4 sm:$0xff]  }
 0x106   :  { %v5442_v30 = vpop.f32.mrf.mxu0 }
 0x107   :  { %v227_v31 = vpack.c.bf16 %v5441_v28, %v5441_v28 }
 0x108   :  { %v5443_v34 = vpop.f32.mrf.mxu0 }
 0x109   :  { %v497_v35 = vrot.slane %v227_v31, 2  ;;  %452 = vmatprep.mubr.bf16.mxu1 %v227_v31  ;;  %v5444_v37 = vadd.f32 %v5443_v34, %v5442_v30  ;;  %v5796_v30 = vld [vmem:[%s8468_s2 + $0x3b4] ss:$8 sps:$4 sm:$0xff]  }
 0x10a   :  { %453 = vmatmul.mubr.bf16.vlgmr.msra.gmra.mxu1 %v226_v29  ;;  %v5445_v22 = vpop.f32.mrf.mxu0  ;;  %v5788_v29 = vld [vmem:[%s8468_s2 + $0x3c0] ss:$8 sps:$4 sm:$0xff]  }
 0x10b   :  { %897 = vmatpush1.bf16.msra.mxu1 %v5719_v32  ;;  %692 = vmatprep.mubr.bf16.mxu0 %v497_v35  ;;  %v702_v41 = vpack.c.bf16 %v5444_v37, %v5444_v37  ;;  %v5791_v32 = vld [vmem:[%s8468_s2 + $0x2b0] ss:$8 sps:$4 sm:$0xff]  }
 0x10c   :  { %693 = vmatmul.mubr.bf16.vlgmr.msra.gmra.mxu0 %v496_v38  ;;  %898 = vmatprep.subr.bf16.mxu1 %v5727_v33  ;;  %v5446_v28 = vpop.f32.mrf.mxu0  ;;  %v5799_v33 = vld [vmem:[%s8468_s2 + $0x2a4] ss:$8 sps:$4 sm:$0xff]   ;;  %v5794_v35 = vld [vmem:[%s8468_s2 + $0x3b0] ss:$8 sps:$4 sm:$0xff]   ;;  %v5797_v38 = vld [vmem:[%s8468_s2 + $0x2a0] ss:$8 sps:$4 sm:$0xff]  }
 0x10d   :  { %1137 = vmatpush1.bf16.msra.mxu0 %v5722_v36  ;;  %v973_v44 = vrot.slane %v702_v41, 2  ;;  %928 = vmatprep.mubr.bf16.mxu1 %v702_v41  ;;  %v5802_v36 = vld [vmem:[%s8468_s2 + $0x3a4] ss:$8 sps:$4 sm:$0xff]   ;;  %v5800_v41 = vld [vmem:[%s8468_s2 + $0x3a0] ss:$8 sps:$4 sm:$0xff]  }
 0x10e   :  { %1138 = vmatprep.subr.bf16.mxu0 %v5730_v39  ;;  %v6964_v31 = vpop.f32.mrf.mxu0  ;;  %v5805_v39 = vld [vmem:[%s8468_s2 + $0x294] ss:$8 sps:$4 sm:$0xff]  }
 0x10f   :  { %899 = vmatpush1.bf16.msra.mxu1 %v5725_v40  ;;  %1168 = vmatprep.mubr.bf16.mxu0 %v973_v44  ;;  %v5803_v44 = vld [vmem:[%s8468_s2 + $0x290] ss:$8 sps:$4 sm:$0xff]  }
 0x110   :  { %900 = vmatprep.subr.bf16.mxu1 %v5733_v42  ;;  %v6972_v34 = vpop.f32.mrf.mxu0  ;;  %v5808_v42 = vld [vmem:[%s8468_s2 + $0x394] ss:$8 sps:$4 sm:$0xff]  }
 0x111   :  { %1139 = vmatpush1.bf16.msra.mxu0 %v5728_v43 }
 0x112   :  { %1140 = vmatprep.subr.bf16.mxu0 %v5736_v45  ;;  %v6980_v37 = vpop.f32.mrf.mxu0  ;;  %v5811_v45 = vld [vmem:[%s8468_s2 + $0x284] ss:$8 sps:$4 sm:$0xff]  }
 0x113   :  { %901 = vmatpush1.bf16.msra.mxu1 %v5731_v46 }
 0x114   :  { %902 = vmatprep.subr.bf16.mxu1 %v5739_v47  ;;  %v6988_v40 = vpop.f32.mrf.mxu0  ;;  %v5806_v47 = vld [vmem:[%s8468_s2 + $0x390] ss:$8 sps:$4 sm:$0xff]  }
 0x115   :  { %1141 = vmatpush1.bf16.msra.mxu0 %v5734_v48  ;;  %v5447_v48 = vadd.f32 %v5446_v28, %v5445_v22  ;;  %v5850_v22 = vld [vmem:[%s8468_s2 + $0x524] ss:$8 sps:$4 sm:$0xff]   ;;  %v5851_v28 = vld [vmem:[%s8468_s2 + $0x410] ss:$8 sps:$4 sm:$0xff]  }
 0x116   :  { %1142 = vmatprep.subr.bf16.mxu0 %v5742_v49  ;;  %v5454_v43 = vpop.f32.mrf.mxu0 }
 0x117   :  { %903 = vmatpush1.bf16.msra.mxu1 %v5737_v50  ;;  %v5814_v50 = vld [vmem:[%s8468_s2 + $0x384] ss:$8 sps:$4 sm:$0xff]  }
 0x118   :  { %904 = vmatprep.subr.bf16.mxu1 %v5745_v51  ;;  %v5455_v46 = vpop.f32.mrf.mxu0 }
 0x119   :  { %1143 = vmatpush1.bf16.msra.mxu0 %v5740_v52  ;;  %v7005_v49 = vadd.f32 %v5455_v46, %v5454_v43  ;;  %v5809_v52 = vld [vmem:[%s8468_s2 + $0x280] ss:$8 sps:$4 sm:$0xff]   ;;  %v5874_v43 = vld [vmem:[%s8468_s2 + $0x5e4] ss:$8 sps:$4 sm:$0xff]  }
 0x11a   :  { %1144 = vmatprep.subr.bf16.mxu0 %v5748_v53  ;;  %v5457_v51 = vpop.f32.mrf.mxu0  ;;  %v5817_v53 = vld [vmem:[%s8468_s2 + $0x474] ss:$8 sps:$4 sm:$0xff]   ;;  %v5872_v46 = vld [vmem:[%s8468_s2 + $0x5e0] ss:$8 sps:$4 sm:$0xff]  }
 0x11b   :  { %905 = vmatpush1.bf16.msra.mxu1 %v5743_v54 }
 0x11c   :  { %906 = vmatprep.subr.bf16.mxu1 %v5751_v55  ;;  %v5458_v54 = vpop.f32.mrf.mxu0  ;;  %v5812_v55 = vld [vmem:[%s8468_s2 + $0x380] ss:$8 sps:$4 sm:$0xff]  }
 0x11d   :  { %1145 = vmatpush1.bf16.msra.mxu0 %v5746_v56  ;;  %v1178_v56 = vpack.c.bf16 %v5447_v48, %v5447_v48  ;;  %v5875_v48 = vld [vmem:[%s8468_s2 + $0x4d0] ss:$8 sps:$4 sm:$0xff]  }
 0x11e   :  { %1146 = vmatprep.subr.bf16.mxu0 %v5754_v57  ;;  %v7019_v57 = vadd.f32 %v5458_v54, %v5457_v51  ;;  %v5878_v51 = vld [vmem:[%s8468_s2 + $0x5d0] ss:$8 sps:$4 sm:$0xff]   ;;  %v5889_v54 = vld [vmem:[%s8468_s2 + $0x4b4] ss:$8 sps:$4 sm:$0xff]  }
 0x11f   :  { %907 = vmatpush1.bf16.msra.mxu1 %v5749_v58  ;;  %v701_v58 = vpack.c.bf16 %v6806_v6, %v6806_v6  ;;  %v5818_v6 = vld [vmem:[%s8468_s2 + $0x570] ss:$8 sps:$4 sm:$0xff]  }
 0x120   :  { %908 = vmatprep.subr.bf16.mxu1 %v5757_v59  ;;  %v5820_v59 = vld [vmem:[%s8468_s2 + $0x574] ss:$8 sps:$4 sm:$0xff]  }
 0x121   :  { %1147 = vmatpush1.bf16.msra.mxu0 %v5752_v60  ;;  %v5815_v60 = vld [vmem:[%s8468_s2 + $0x470] ss:$8 sps:$4 sm:$0xff]  }
 0x122   :  { %1148 = vmatprep.subr.bf16.mxu0 %v5760_v61  ;;  %v5823_v61 = vld [vmem:[%s8468_s2 + $0x464] ss:$8 sps:$4 sm:$0xff]  }
 0x123   :  { %909 = vmatpush1.bf16.msra.mxu1 %v5755_v62  ;;  %v1449_v62 = vrot.slane %v1178_v56, 2 }
 0x124   :  { %910 = vmatprep.subr.bf16.mxu1 %v5763_v63  ;;  %v972_v63 = vrot.slane %v701_v58, 2 }
 0x125   :  { %1149 = vmatpush1.bf16.msra.mxu0 %v5758_v0  ;;  %v5826_v0 = vld [vmem:[%s8468_s2 + $0x564] ss:$8 sps:$4 sm:$0xff]  }
 0x126   :  { %1150 = vmatprep.subr.bf16.mxu0 %v5766_v1  ;;  %v5821_v1 = vld [vmem:[%s8468_s2 + $0x460] ss:$8 sps:$4 sm:$0xff]  }
 0x127   :  { %911 = vmatpush1.bf16.msra.mxu1 %v5761_v2  ;;  %v5829_v2 = vld [vmem:[%s8468_s2 + $0x454] ss:$8 sps:$4 sm:$0xff]  }
 0x128   :  { %912 = vmatprep.subr.bf16.mxu1 %v5769_v3  ;;  %v5824_v3 = vld [vmem:[%s8468_s2 + $0x560] ss:$8 sps:$4 sm:$0xff]  }
 0x129   :  { %1151 = vmatpush1.bf16.msra.mxu0 %v5764_v4  ;;  %v5832_v4 = vld [vmem:[%s8468_s2 + $0x554] ss:$8 sps:$4 sm:$0xff]  }
 0x12a   :  { %1152 = vmatprep.subr.bf16.mxu0 %v5772_v5  ;;  %v5827_v5 = vld [vmem:[%s8468_s2 + $0x450] ss:$8 sps:$4 sm:$0xff]  }
 0x12b   :  { %913 = vmatpush2.bf16.msra.mxu1 %v5767_v7  ;;  %v5835_v7 = vld [vmem:[%s8468_s2 + $0x444] ss:$8 sps:$4 sm:$0xff]  }
 0x12c   :  { %914 = vmatprep.subr.bf16.mxu1 %v5775_v8  ;;  %v5830_v8 = vld [vmem:[%s8468_s2 + $0x550] ss:$8 sps:$4 sm:$0xff]  }
 0x12d   :  { %1153 = vmatpush2.bf16.msra.mxu0 %v5770_v10  ;;  %v5838_v10 = vld [vmem:[%s8468_s2 + $0x544] ss:$8 sps:$4 sm:$0xff]  }
 0x12e   :  { %1154 = vmatprep.subr.bf16.mxu0 %v5778_v11  ;;  %v5833_v11 = vld [vmem:[%s8468_s2 + $0x440] ss:$8 sps:$4 sm:$0xff]  }
 0x12f   :  { %915 = vmatpush2.bf16.msra.mxu1 %v5773_v13  ;;  %v5841_v13 = vld [vmem:[%s8468_s2 + $0x434] ss:$8 sps:$4 sm:$0xff]  }
 0x130   :  { %916 = vmatprep.subr.bf16.mxu1 %v5781_v14  ;;  %v5836_v14 = vld [vmem:[%s8468_s2 + $0x540] ss:$8 sps:$4 sm:$0xff]  }
 0x131   :  { %1155 = vmatpush2.bf16.msra.mxu0 %v5776_v16  ;;  %v5844_v16 = vld [vmem:[%s8468_s2 + $0x534] ss:$8 sps:$4 sm:$0xff]  }
 0x132   :  { %1156 = vmatprep.subr.bf16.mxu0 %v5784_v17  ;;  %v5839_v17 = vld [vmem:[%s8468_s2 + $0x430] ss:$8 sps:$4 sm:$0xff]  }
 0x133   :  { %917 = vmatpush2.bf16.msra.mxu1 %v5779_v19  ;;  %v5847_v19 = vld [vmem:[%s8468_s2 + $0x424] ss:$8 sps:$4 sm:$0xff]  }
 0x134   :  { %918 = vmatprep.subr.bf16.mxu1 %v5787_v20  ;;  %v5842_v20 = vld [vmem:[%s8468_s2 + $0x530] ss:$8 sps:$4 sm:$0xff]  }
 0x135   :  { %1157 = vmatpush2.bf16.msra.mxu0 %v5782_v23  ;;  %v5845_v23 = vld [vmem:[%s8468_s2 + $0x420] ss:$8 sps:$4 sm:$0xff]  }
 0x136   :  { %1158 = vmatprep.subr.bf16.mxu0 %v5790_v25  ;;  %v5853_v25 = vld [vmem:[%s8468_s2 + $0x414] ss:$8 sps:$4 sm:$0xff]  }
 0x137   :  { %919 = vmatpush2.bf16.msra.mxu1 %v5785_v26  ;;  %v5848_v26 = vld [vmem:[%s8468_s2 + $0x520] ss:$8 sps:$4 sm:$0xff]  }
 0x138   :  { %920 = vmatprep.subr.bf16.mxu1 %v5793_v27  ;;  %v5856_v27 = vld [vmem:[%s8468_s2 + $0x514] ss:$8 sps:$4 sm:$0xff]  }
 0x139   :  { %1159 = vmatpush2.bf16.msra.mxu0 %v5788_v29  ;;  %v5859_v29 = vld [vmem:[%s8468_s2 + $0x404] ss:$8 sps:$4 sm:$0xff]  }
 0x13a   :  { %1160 = vmatprep.subr.bf16.mxu0 %v5796_v30  ;;  %v5854_v30 = vld [vmem:[%s8468_s2 + $0x510] ss:$8 sps:$4 sm:$0xff]  }
 0x13b   :  { %921 = vmatpush2.bf16.msra.mxu1 %v5791_v32  ;;  %v5862_v32 = vld [vmem:[%s8468_s2 + $0x504] ss:$8 sps:$4 sm:$0xff]  }
 0x13c   :  { %922 = vmatprep.subr.bf16.mxu1 %v5799_v33  ;;  %v5857_v33 = vld [vmem:[%s8468_s2 + $0x400] ss:$8 sps:$4 sm:$0xff]  }
 0x13d   :  { %1161 = vmatpush2.bf16.msra.mxu0 %v5794_v35  ;;  %v5865_v35 = vld [vmem:[%s8468_s2 + $0x4f4] ss:$8 sps:$4 sm:$0xff]  }
 0x13e   :  { %1162 = vmatprep.subr.bf16.mxu0 %v5802_v36  ;;  %v5860_v36 = vld [vmem:[%s8468_s2 + $0x500] ss:$8 sps:$4 sm:$0xff]  }
 0x13f   :  { %923 = vmatpush2.bf16.msra.mxu1 %v5797_v38  ;;  %v5868_v38 = vld [vmem:[%s8468_s2 + $0x5f4] ss:$8 sps:$4 sm:$0xff]  }
 0x140   :  { %924 = vmatprep.subr.bf16.mxu1 %v5805_v39  ;;  %v5863_v39 = vld [vmem:[%s8468_s2 + $0x4f0] ss:$8 sps:$4 sm:$0xff]  }
 0x141   :  { %1163 = vmatpush2.bf16.msra.mxu0 %v5800_v41  ;;  %v5871_v41 = vld [vmem:[%s8468_s2 + $0x4e4] ss:$8 sps:$4 sm:$0xff]  }
 0x142   :  { %1164 = vmatprep.subr.bf16.mxu0 %v5808_v42  ;;  %v5866_v42 = vld [vmem:[%s8468_s2 + $0x5f0] ss:$8 sps:$4 sm:$0xff]  }
 0x143   :  { %925 = vmatpush2.bf16.msra.mxu1 %v5803_v44  ;;  %v5869_v44 = vld [vmem:[%s8468_s2 + $0x4e0] ss:$8 sps:$4 sm:$0xff]  }
 0x144   :  { %926 = vmatprep.subr.bf16.mxu1 %v5811_v45  ;;  %v5877_v45 = vld [vmem:[%s8468_s2 + $0x4d4] ss:$8 sps:$4 sm:$0xff]  }
 0x145   :  { %1165 = vmatpush2.bf16.msra.mxu0 %v5806_v47  ;;  %v5880_v47 = vld [vmem:[%s8468_s2 + $0x5d4] ss:$8 sps:$4 sm:$0xff]  }
 0x146   :  { %1166 = vmatprep.subr.bf16.mxu0 %v5814_v50  ;;  %v5883_v50 = vld [vmem:[%s8468_s2 + $0x4c4] ss:$8 sps:$4 sm:$0xff]  }
 0x147   :  { %927 = vmatpush2.bf16.msra.mxu1 %v5809_v52  ;;  %v5886_v52 = vld [vmem:[%s8468_s2 + $0x5c4] ss:$8 sps:$4 sm:$0xff]  }
 0x148   :  { %1372 = vmatprep.subr.bf16.mxu1 %v5817_v53  ;;  %v5881_v53 = vld [vmem:[%s8468_s2 + $0x4c0] ss:$8 sps:$4 sm:$0xff]  }
 0x149   :  { %1167 = vmatpush2.bf16.msra.mxu0 %v5812_v55  ;;  %v5884_v55 = vld [vmem:[%s8468_s2 + $0x5c0] ss:$8 sps:$4 sm:$0xff]  }
 0x14a   :  { %929 = vmatmul.mubr.bf16.vlgmr.msra.gmra.mxu1 %v701_v58  ;;  %1612 = vmatprep.subr.bf16.mxu0 %v5820_v59  ;;  %v5887_v58 = vld [vmem:[%s8468_s2 + $0x4b0] ss:$8 sps:$4 sm:$0xff]   ;;  %v5895_v59 = vld [vmem:[%s8468_s2 + $0x4a4] ss:$8 sps:$4 sm:$0xff]  }
 0x14b   :  { %1373 = vmatpush1.bf16.msra.mxu1 %v5815_v60  ;;  %1404 = vmatprep.mubr.bf16.mxu1 %v1178_v56  ;;  %v5892_v56 = vld [vmem:[%s8468_s2 + $0x5b4] ss:$8 sps:$4 sm:$0xff]   ;;  %v5890_v60 = vld [vmem:[%s8468_s2 + $0x5b0] ss:$8 sps:$4 sm:$0xff]  }
 0x14c   :  { %1169 = vmatmul.mubr.bf16.vlgmr.msra.gmra.mxu0 %v972_v63  ;;  %1374 = vmatprep.subr.bf16.mxu1 %v5823_v61  ;;  %v5898_v61 = vld [vmem:[%s8468_s2 + $0x5a4] ss:$8 sps:$4 sm:$0xff]   ;;  %v5896_v63 = vld [vmem:[%s8468_s2 + $0x5a0] ss:$8 sps:$4 sm:$0xff]  }
 0x14d   :  { %1613 = vmatpush1.bf16.msra.mxu0 %v5818_v6  ;;  %1644 = vmatprep.mubr.bf16.mxu0 %v1449_v62  ;;  %v5893_v6 = vld [vmem:[%s8468_s2 + $0x4a0] ss:$8 sps:$4 sm:$0xff]   ;;  %v5901_v62 = vld [vmem:[%s8468_s2 + $0x494] ss:$8 sps:$4 sm:$0xff]  }
 0x14e   :  { %1614 = vmatprep.subr.bf16.mxu0 %v5826_v0  ;;  %v5904_v0 = vld [vmem:[%s8468_s2 + $0x594] ss:$8 sps:$4 sm:$0xff]  }
 0x14f   :  { %1375 = vmatpush1.bf16.msra.mxu1 %v5821_v1  ;;  %v5899_v1 = vld [vmem:[%s8468_s2 + $0x490] ss:$8 sps:$4 sm:$0xff]  }
 0x150   :  { %1376 = vmatprep.subr.bf16.mxu1 %v5829_v2  ;;  %v5907_v2 = vld [vmem:[%s8468_s2 + $0x484] ss:$8 sps:$4 sm:$0xff]  }
 0x151   :  { %1615 = vmatpush1.bf16.msra.mxu0 %v5824_v3  ;;  %v5902_v3 = vld [vmem:[%s8468_s2 + $0x590] ss:$8 sps:$4 sm:$0xff]  }
 0x152   :  { %1616 = vmatprep.subr.bf16.mxu0 %v5832_v4  ;;  %v5450_v4 = vadd.f32 %v6972_v34, %v6964_v31  ;;  %v5908_v31 = vld [vmem:[%s8468_s2 + $0x580] ss:$8 sps:$4 sm:$0xff]  }
 0x153   :  { %1377 = vmatpush1.bf16.msra.mxu1 %v5827_v5  ;;  %v5910_v5 = vld [vmem:[%s8468_s2 + $0x584] ss:$8 sps:$4 sm:$0xff]  }
 0x154   :  { %1378 = vmatprep.subr.bf16.mxu1 %v5835_v7  ;;  %v5905_v7 = vld [vmem:[%s8468_s2 + $0x480] ss:$8 sps:$4 sm:$0xff]   ;;  %v1654_v34 = vpack.c.bf16 %v5450_v4, %v5450_v4  ;;  %v5985_v4 = vld [vmem:[%s8468_s2 + $0x6b4] ss:$8 sps:$4 sm:$0xff]  }
 0x155   :  { %1617 = vmatpush1.bf16.msra.mxu0 %v5830_v8  ;;  %v5913_v8 = vld [vmem:[%s8468_s2 + $0x674] ss:$8 sps:$4 sm:$0xff]  }
 0x156   :  { %1618 = vmatprep.subr.bf16.mxu0 %v5838_v10  ;;  %v1177_v10 = vpack.c.bf16 %v6808_v9, %v6808_v9  ;;  %v5914_v9 = vld [vmem:[%s8468_s2 + $0x770] ss:$8 sps:$4 sm:$0xff]  }
 0x157   :  { %1379 = vmatpush1.bf16.msra.mxu1 %v5833_v11  ;;  %v5916_v11 = vld [vmem:[%s8468_s2 + $0x774] ss:$8 sps:$4 sm:$0xff]  }
 0x158   :  { %1380 = vmatprep.subr.bf16.mxu1 %v5841_v13  ;;  %v5911_v13 = vld [vmem:[%s8468_s2 + $0x670] ss:$8 sps:$4 sm:$0xff]  }
 0x159   :  { %1619 = vmatpush1.bf16.msra.mxu0 %v5836_v14  ;;  %v5919_v14 = vld [vmem:[%s8468_s2 + $0x664] ss:$8 sps:$4 sm:$0xff]  }
 0x15a   :  { %1620 = vmatprep.subr.bf16.mxu0 %v5844_v16  ;;  %v1925_v16 = vrot.slane %v1654_v34, 2 }
 0x15b   :  { %1381 = vmatpush1.bf16.msra.mxu1 %v5839_v17  ;;  %v1448_v17 = vrot.slane %v1177_v10, 2 }
 0x15c   :  { %1382 = vmatprep.subr.bf16.mxu1 %v5847_v19  ;;  %v5922_v19 = vld [vmem:[%s8468_s2 + $0x764] ss:$8 sps:$4 sm:$0xff]  }
 0x15d   :  { %1621 = vmatpush1.bf16.msra.mxu0 %v5842_v20  ;;  %v5917_v20 = vld [vmem:[%s8468_s2 + $0x660] ss:$8 sps:$4 sm:$0xff]  }
 0x15e   :  { %1622 = vmatprep.subr.bf16.mxu0 %v5850_v22  ;;  %v5925_v22 = vld [vmem:[%s8468_s2 + $0x654] ss:$8 sps:$4 sm:$0xff]  }
 0x15f   :  { %1383 = vmatpush1.bf16.msra.mxu1 %v5845_v23  ;;  %v5920_v23 = vld [vmem:[%s8468_s2 + $0x760] ss:$8 sps:$4 sm:$0xff]  }
 0x160   :  { %1384 = vmatprep.subr.bf16.mxu1 %v5853_v25  ;;  %v5928_v25 = vld [vmem:[%s8468_s2 + $0x754] ss:$8 sps:$4 sm:$0xff]  }
 0x161   :  { %1623 = vmatpush1.bf16.msra.mxu0 %v5848_v26  ;;  %v5923_v26 = vld [vmem:[%s8468_s2 + $0x650] ss:$8 sps:$4 sm:$0xff]  }
 0x162   :  { %1624 = vmatprep.subr.bf16.mxu0 %v5856_v27  ;;  %v5931_v27 = vld [vmem:[%s8468_s2 + $0x644] ss:$8 sps:$4 sm:$0xff]  }
 0x163   :  { %1385 = vmatpush1.bf16.msra.mxu1 %v5851_v28  ;;  %v5926_v28 = vld [vmem:[%s8468_s2 + $0x750] ss:$8 sps:$4 sm:$0xff]  }
 0x164   :  { %1386 = vmatprep.subr.bf16.mxu1 %v5859_v29  ;;  %v5934_v29 = vld [vmem:[%s8468_s2 + $0x744] ss:$8 sps:$4 sm:$0xff]  }
 0x165   :  { %1625 = vmatpush1.bf16.msra.mxu0 %v5854_v30  ;;  %v5929_v30 = vld [vmem:[%s8468_s2 + $0x640] ss:$8 sps:$4 sm:$0xff]  }
 0x166   :  { %1626 = vmatprep.subr.bf16.mxu0 %v5862_v32  ;;  %v5937_v32 = vld [vmem:[%s8468_s2 + $0x634] ss:$8 sps:$4 sm:$0xff]  }
 0x167   :  { %1387 = vmatpush1.bf16.msra.mxu1 %v5857_v33  ;;  %v5932_v33 = vld [vmem:[%s8468_s2 + $0x740] ss:$8 sps:$4 sm:$0xff]  }
 0x168   :  { %1388 = vmatprep.subr.bf16.mxu1 %v5865_v35  ;;  %v5940_v35 = vld [vmem:[%s8468_s2 + $0x734] ss:$8 sps:$4 sm:$0xff]  }
 0x169   :  { %1627 = vmatpush1.bf16.msra.mxu0 %v5860_v36  ;;  %v5935_v36 = vld [vmem:[%s8468_s2 + $0x630] ss:$8 sps:$4 sm:$0xff]  }
 0x16a   :  { %1628 = vmatprep.subr.bf16.mxu0 %v5868_v38  ;;  %v5943_v38 = vld [vmem:[%s8468_s2 + $0x624] ss:$8 sps:$4 sm:$0xff]  }
 0x16b   :  { %1389 = vmatpush2.bf16.msra.mxu1 %v5863_v39  ;;  %v5938_v39 = vld [vmem:[%s8468_s2 + $0x730] ss:$8 sps:$4 sm:$0xff]  }
 0x16c   :  { %1390 = vmatprep.subr.bf16.mxu1 %v5871_v41  ;;  %v5946_v41 = vld [vmem:[%s8468_s2 + $0x724] ss:$8 sps:$4 sm:$0xff]  }
 0x16d   :  { %1629 = vmatpush2.bf16.msra.mxu0 %v5866_v42  ;;  %v5941_v42 = vld [vmem:[%s8468_s2 + $0x620] ss:$8 sps:$4 sm:$0xff]  }
 0x16e   :  { %1630 = vmatprep.subr.bf16.mxu0 %v5874_v43  ;;  %v5949_v43 = vld [vmem:[%s8468_s2 + $0x614] ss:$8 sps:$4 sm:$0xff]  }
 0x16f   :  { %1391 = vmatpush2.bf16.msra.mxu1 %v5869_v44  ;;  %v5944_v44 = vld [vmem:[%s8468_s2 + $0x720] ss:$8 sps:$4 sm:$0xff]  }
 0x170   :  { %1392 = vmatprep.subr.bf16.mxu1 %v5877_v45  ;;  %v5952_v45 = vld [vmem:[%s8468_s2 + $0x714] ss:$8 sps:$4 sm:$0xff]  }
 0x171   :  { %1631 = vmatpush2.bf16.msra.mxu0 %v5872_v46  ;;  %v5947_v46 = vld [vmem:[%s8468_s2 + $0x610] ss:$8 sps:$4 sm:$0xff]  }
 0x172   :  { %1632 = vmatprep.subr.bf16.mxu0 %v5880_v47  ;;  %v5955_v47 = vld [vmem:[%s8468_s2 + $0x604] ss:$8 sps:$4 sm:$0xff]  }
 0x173   :  { %1393 = vmatpush2.bf16.msra.mxu1 %v5875_v48  ;;  %v5950_v48 = vld [vmem:[%s8468_s2 + $0x710] ss:$8 sps:$4 sm:$0xff]  }
 0x174   :  { %1394 = vmatprep.subr.bf16.mxu1 %v5883_v50  ;;  %v5958_v50 = vld [vmem:[%s8468_s2 + $0x704] ss:$8 sps:$4 sm:$0xff]  }
 0x175   :  { %1633 = vmatpush2.bf16.msra.mxu0 %v5878_v51  ;;  %v5953_v51 = vld [vmem:[%s8468_s2 + $0x600] ss:$8 sps:$4 sm:$0xff]  }
 0x176   :  { %1634 = vmatprep.subr.bf16.mxu0 %v5886_v52  ;;  %v5961_v52 = vld [vmem:[%s8468_s2 + $0x6f4] ss:$8 sps:$4 sm:$0xff]  }
 0x177   :  { %1395 = vmatpush2.bf16.msra.mxu1 %v5881_v53  ;;  %v5956_v53 = vld [vmem:[%s8468_s2 + $0x700] ss:$8 sps:$4 sm:$0xff]  }
 0x178   :  { %1396 = vmatprep.subr.bf16.mxu1 %v5889_v54  ;;  %v5964_v54 = vld [vmem:[%s8468_s2 + $0x7f4] ss:$8 sps:$4 sm:$0xff]  }
 0x179   :  { %1635 = vmatpush2.bf16.msra.mxu0 %v5884_v55  ;;  %v5959_v55 = vld [vmem:[%s8468_s2 + $0x6f0] ss:$8 sps:$4 sm:$0xff]  }
 0x17a   :  { %1636 = vmatprep.subr.bf16.mxu0 %v5892_v56  ;;  %v5967_v56 = vld [vmem:[%s8468_s2 + $0x6e4] ss:$8 sps:$4 sm:$0xff]  }
 0x17b   :  { %1397 = vmatpush2.bf16.msra.mxu1 %v5887_v58  ;;  %v5962_v58 = vld [vmem:[%s8468_s2 + $0x7f0] ss:$8 sps:$4 sm:$0xff]  }
 0x17c   :  { %1398 = vmatprep.subr.bf16.mxu1 %v5895_v59  ;;  %v5970_v59 = vld [vmem:[%s8468_s2 + $0x7e4] ss:$8 sps:$4 sm:$0xff]  }
 0x17d   :  { %1637 = vmatpush2.bf16.msra.mxu0 %v5890_v60  ;;  %v5965_v60 = vld [vmem:[%s8468_s2 + $0x6e0] ss:$8 sps:$4 sm:$0xff]  }
 0x17e   :  { %1638 = vmatprep.subr.bf16.mxu0 %v5898_v61  ;;  %v5973_v61 = vld [vmem:[%s8468_s2 + $0x6d4] ss:$8 sps:$4 sm:$0xff]  }
 0x17f   :  { %1399 = vmatpush2.bf16.msra.mxu1 %v5893_v6  ;;  %v5968_v6 = vld [vmem:[%s8468_s2 + $0x7e0] ss:$8 sps:$4 sm:$0xff]  }
 0x180   :  { %1400 = vmatprep.subr.bf16.mxu1 %v5901_v62  ;;  %v5976_v62 = vld [vmem:[%s8468_s2 + $0x7d4] ss:$8 sps:$4 sm:$0xff]  }
 0x181   :  { %1639 = vmatpush2.bf16.msra.mxu0 %v5896_v63  ;;  %v5971_v63 = vld [vmem:[%s8468_s2 + $0x6d0] ss:$8 sps:$4 sm:$0xff]  }
 0x182   :  { %1640 = vmatprep.subr.bf16.mxu0 %v5904_v0  ;;  %v5979_v0 = vld [vmem:[%s8468_s2 + $0x6c4] ss:$8 sps:$4 sm:$0xff]  }
 0x183   :  { %1401 = vmatpush2.bf16.msra.mxu1 %v5899_v1  ;;  %v5974_v1 = vld [vmem:[%s8468_s2 + $0x7d0] ss:$8 sps:$4 sm:$0xff]  }
 0x184   :  { %1402 = vmatprep.subr.bf16.mxu1 %v5907_v2  ;;  %v5982_v2 = vld [vmem:[%s8468_s2 + $0x7c4] ss:$8 sps:$4 sm:$0xff]  }
 0x185   :  { %1641 = vmatpush2.bf16.msra.mxu0 %v5902_v3  ;;  %v5977_v3 = vld [vmem:[%s8468_s2 + $0x6c0] ss:$8 sps:$4 sm:$0xff]  }
 0x186   :  { %1642 = vmatprep.subr.bf16.mxu0 %v5910_v5  ;;  %v5980_v5 = vld [vmem:[%s8468_s2 + $0x7c0] ss:$8 sps:$4 sm:$0xff]  }
 0x187   :  { %1403 = vmatpush2.bf16.msra.mxu1 %v5905_v7  ;;  %v5988_v7 = vld [vmem:[%s8468_s2 + $0x7b4] ss:$8 sps:$4 sm:$0xff]  }
 0x188   :  { %1848 = vmatprep.subr.bf16.mxu1 %v5913_v8  ;;  %v5983_v8 = vld [vmem:[%s8468_s2 + $0x6b0] ss:$8 sps:$4 sm:$0xff]  }
 0x189   :  { %1643 = vmatpush2.bf16.msra.mxu0 %v5908_v31  ;;  %v5991_v31 = vld [vmem:[%s8468_s2 + $0x6a4] ss:$8 sps:$4 sm:$0xff]  }
 0x18a   :  { %1405 = vmatmul.mubr.bf16.vlgmr.msra.gmra.mxu1 %v1177_v10  ;;  %2088 = vmatprep.subr.bf16.mxu0 %v5916_v11  ;;  %v5994_v10 = vld [vmem:[%s8468_s2 + $0x7a4] ss:$8 sps:$4 sm:$0xff]   ;;  %v5989_v11 = vld [vmem:[%s8468_s2 + $0x6a0] ss:$8 sps:$4 sm:$0xff]  }
 0x18b   :  { %1849 = vmatpush1.bf16.msra.mxu1 %v5911_v13  ;;  %1880 = vmatprep.mubr.bf16.mxu1 %v1654_v34  ;;  %v5986_v34 = vld [vmem:[%s8468_s2 + $0x7b0] ss:$8 sps:$4 sm:$0xff]   ;;  %v5997_v13 = vld [vmem:[%s8468_s2 + $0x694] ss:$8 sps:$4 sm:$0xff]  }
 0x18c   :  { %1645 = vmatmul.mubr.bf16.vlgmr.msra.gmra.mxu0 %v1448_v17  ;;  %1850 = vmatprep.subr.bf16.mxu1 %v5919_v14  ;;  %v5992_v14 = vld [vmem:[%s8468_s2 + $0x7a0] ss:$8 sps:$4 sm:$0xff]   ;;  %v6003_v17 = vld [vmem:[%s8468_s2 + $0x684] ss:$8 sps:$4 sm:$0xff]  }
 0x18d   :  { %2089 = vmatpush1.bf16.msra.mxu0 %v5914_v9  ;;  %2120 = vmatprep.mubr.bf16.mxu0 %v1925_v16  ;;  %v6000_v9 = vld [vmem:[%s8468_s2 + $0x794] ss:$8 sps:$4 sm:$0xff]   ;;  %v5995_v16 = vld [vmem:[%s8468_s2 + $0x690] ss:$8 sps:$4 sm:$0xff]  }
 0x18e   :  { %2090 = vmatprep.subr.bf16.mxu0 %v5922_v19  ;;  %v5998_v19 = vld [vmem:[%s8468_s2 + $0x790] ss:$8 sps:$4 sm:$0xff]  }
 0x18f   :  { %1851 = vmatpush1.bf16.msra.mxu1 %v5917_v20  ;;  %v6006_v20 = vld [vmem:[%s8468_s2 + $0x784] ss:$8 sps:$4 sm:$0xff]  }
 0x190   :  { %1852 = vmatprep.subr.bf16.mxu1 %v5925_v22  ;;  %v5453_v22 = vadd.f32 %v6988_v40, %v6980_v37  ;;  %v6012_v37 = vld [vmem:[%s8468_s2 + $0x974] ss:$8 sps:$4 sm:$0xff]  }
 0x191   :  { %2091 = vmatpush1.bf16.msra.mxu0 %v5920_v23  ;;  %v6001_v23 = vld [vmem:[%s8468_s2 + $0x680] ss:$8 sps:$4 sm:$0xff]  }
 0x192   :  { %2092 = vmatprep.subr.bf16.mxu0 %v5928_v25  ;;  %v6009_v25 = vld [vmem:[%s8468_s2 + $0x874] ss:$8 sps:$4 sm:$0xff]   ;;  %v2130_v40 = vpack.c.bf16 %v5453_v22, %v5453_v22  ;;  %v6066_v22 = vld [vmem:[%s8468_s2 + $0x9e4] ss:$8 sps:$4 sm:$0xff]  }
 0x193   :  { %1853 = vmatpush1.bf16.msra.mxu1 %v5923_v26  ;;  %v6004_v26 = vld [vmem:[%s8468_s2 + $0x780] ss:$8 sps:$4 sm:$0xff]  }
 0x194   :  { %1854 = vmatprep.subr.bf16.mxu1 %v5931_v27  ;;  %v1653_v27 = vpack.c.bf16 %v6810_v12, %v6810_v12  ;;  %v6010_v12 = vld [vmem:[%s8468_s2 + $0x970] ss:$8 sps:$4 sm:$0xff]  }
 0x195   :  { %2093 = vmatpush1.bf16.msra.mxu0 %v5926_v28  ;;  %v7415_v28 = vpop.f32.mrf.mxu0 }
 0x196   :  { %2094 = vmatprep.subr.bf16.mxu0 %v5934_v29  ;;  %v6007_v29 = vld [vmem:[%s8468_s2 + $0x870] ss:$8 sps:$4 sm:$0xff]  }
 0x197   :  { %1855 = vmatpush1.bf16.msra.mxu1 %v5929_v30  ;;  %v6015_v30 = vld [vmem:[%s8468_s2 + $0x864] ss:$8 sps:$4 sm:$0xff]  }
 0x198   :  { %1856 = vmatprep.subr.bf16.mxu1 %v5937_v32  ;;  %v1924_v32 = vrot.slane %v1653_v27, 2 }
 0x199   :  { %2095 = vmatpush1.bf16.msra.mxu0 %v5932_v33  ;;  %v7429_v33 = vpop.f32.mrf.mxu0 }
 0x19a   :  { %2096 = vmatprep.subr.bf16.mxu0 %v5940_v35 }
 0x19b   :  { %1857 = vmatpush1.bf16.msra.mxu1 %v5935_v36  ;;  %v6018_v36 = vld [vmem:[%s8468_s2 + $0x964] ss:$8 sps:$4 sm:$0xff]  }
 0x19c   :  { %1858 = vmatprep.subr.bf16.mxu1 %v5943_v38  ;;  %v2401_v38 = vrot.slane %v2130_v40, 2 }
 0x19d   :  { %2097 = vmatpush1.bf16.msra.mxu0 %v5938_v39  ;;  %v6013_v39 = vld [vmem:[%s8468_s2 + $0x860] ss:$8 sps:$4 sm:$0xff]  }
 0x19e   :  { %2098 = vmatprep.subr.bf16.mxu0 %v5946_v41 }
 0x19f   :  { %1859 = vmatpush1.bf16.msra.mxu1 %v5941_v42 }
 0x1a0   :  { %1860 = vmatprep.subr.bf16.mxu1 %v5949_v43  ;;  %v6021_v43 = vld [vmem:[%s8468_s2 + $0x854] ss:$8 sps:$4 sm:$0xff]  }
 0x1a1   :  { %2099 = vmatpush1.bf16.msra.mxu0 %v5944_v44 }
 0x1a2   :  { %2100 = vmatprep.subr.bf16.mxu0 %v5952_v45  ;;  %v6016_v45 = vld [vmem:[%s8468_s2 + $0x960] ss:$8 sps:$4 sm:$0xff]  }
 0x1a3   :  { %1861 = vmatpush1.bf16.msra.mxu1 %v5947_v46 }
 0x1a4   :  { %1862 = vmatprep.subr.bf16.mxu1 %v5955_v47 }
 0x1a5   :  { %2101 = vmatpush1.bf16.msra.mxu0 %v5950_v48  ;;  %v6024_v48 = vld [vmem:[%s8468_s2 + $0x954] ss:$8 sps:$4 sm:$0xff]  }
 0x1a6   :  { %2102 = vmatprep.subr.bf16.mxu0 %v5958_v50 }
 0x1a7   :  { %1863 = vmatpush1.bf16.msra.mxu1 %v5953_v51  ;;  %v6019_v51 = vld [vmem:[%s8468_s2 + $0x850] ss:$8 sps:$4 sm:$0xff]  }
 0x1a8   :  { %1864 = vmatprep.subr.bf16.mxu1 %v5961_v52 }
 0x1a9   :  { %2103 = vmatpush1.bf16.msra.mxu0 %v5956_v53 }
 0x1aa   :  { %2104 = vmatprep.subr.bf16.mxu0 %v5964_v54 }
 0x1ab   :  { %1865 = vmatpush2.bf16.msra.mxu1 %v5959_v55  ;;  %v6027_v55 = vld [vmem:[%s8468_s2 + $0x844] ss:$8 sps:$4 sm:$0xff]  }
 0x1ac   :  { %1866 = vmatprep.subr.bf16.mxu1 %v5967_v56  ;;  %v6022_v56 = vld [vmem:[%s8468_s2 + $0x950] ss:$8 sps:$4 sm:$0xff]  }
 0x1ad   :  { %2105 = vmatpush2.bf16.msra.mxu0 %v5962_v58 }
 0x1ae   :  { %2106 = vmatprep.subr.bf16.mxu0 %v5970_v59 }
 0x1af   :  { %1867 = vmatpush2.bf16.msra.mxu1 %v5965_v60  ;;  %v6030_v60 = vld [vmem:[%s8468_s2 + $0x944] ss:$8 sps:$4 sm:$0xff]  }
 0x1b0   :  { %1868 = vmatprep.subr.bf16.mxu1 %v5973_v61  ;;  %v6025_v61 = vld [vmem:[%s8468_s2 + $0x840] ss:$8 sps:$4 sm:$0xff]  }
 0x1b1   :  { %2107 = vmatpush2.bf16.msra.mxu0 %v5968_v6  ;;  %v6033_v6 = vld [vmem:[%s8468_s2 + $0x834] ss:$8 sps:$4 sm:$0xff]  }
 0x1b2   :  { %2108 = vmatprep.subr.bf16.mxu0 %v5976_v62  ;;  %v6028_v62 = vld [vmem:[%s8468_s2 + $0x940] ss:$8 sps:$4 sm:$0xff]  }
 0x1b3   :  { %1869 = vmatpush2.bf16.msra.mxu1 %v5971_v63  ;;  %v6036_v63 = vld [vmem:[%s8468_s2 + $0x934] ss:$8 sps:$4 sm:$0xff]  }
 0x1b4   :  { %1870 = vmatprep.subr.bf16.mxu1 %v5979_v0  ;;  %v6031_v0 = vld [vmem:[%s8468_s2 + $0x830] ss:$8 sps:$4 sm:$0xff]  }
 0x1b5   :  { %2109 = vmatpush2.bf16.msra.mxu0 %v5974_v1  ;;  %v6039_v1 = vld [vmem:[%s8468_s2 + $0x824] ss:$8 sps:$4 sm:$0xff]  }
 0x1b6   :  { %2110 = vmatprep.subr.bf16.mxu0 %v5982_v2  ;;  %v6034_v2 = vld [vmem:[%s8468_s2 + $0x930] ss:$8 sps:$4 sm:$0xff]  }
 0x1b7   :  { %1871 = vmatpush2.bf16.msra.mxu1 %v5977_v3  ;;  %v6042_v3 = vld [vmem:[%s8468_s2 + $0x924] ss:$8 sps:$4 sm:$0xff]  }
 0x1b8   :  { %1872 = vmatprep.subr.bf16.mxu1 %v5985_v4  ;;  %v6037_v4 = vld [vmem:[%s8468_s2 + $0x820] ss:$8 sps:$4 sm:$0xff]  }
 0x1b9   :  { %2111 = vmatpush2.bf16.msra.mxu0 %v5980_v5  ;;  %v6045_v5 = vld [vmem:[%s8468_s2 + $0x814] ss:$8 sps:$4 sm:$0xff]  }
 0x1ba   :  { %2112 = vmatprep.subr.bf16.mxu0 %v5988_v7  ;;  %v6040_v7 = vld [vmem:[%s8468_s2 + $0x920] ss:$8 sps:$4 sm:$0xff]  }
 0x1bb   :  { %1873 = vmatpush2.bf16.msra.mxu1 %v5983_v8  ;;  %v6048_v8 = vld [vmem:[%s8468_s2 + $0x914] ss:$8 sps:$4 sm:$0xff]  }
 0x1bc   :  { %1874 = vmatprep.subr.bf16.mxu1 %v5991_v31  ;;  %v6043_v31 = vld [vmem:[%s8468_s2 + $0x810] ss:$8 sps:$4 sm:$0xff]  }
 0x1bd   :  { %2113 = vmatpush2.bf16.msra.mxu0 %v5986_v34  ;;  %v6051_v34 = vld [vmem:[%s8468_s2 + $0x804] ss:$8 sps:$4 sm:$0xff]  }
 0x1be   :  { %2114 = vmatprep.subr.bf16.mxu0 %v5994_v10  ;;  %v6046_v10 = vld [vmem:[%s8468_s2 + $0x910] ss:$8 sps:$4 sm:$0xff]  }
 0x1bf   :  { %1875 = vmatpush2.bf16.msra.mxu1 %v5989_v11  ;;  %v6054_v11 = vld [vmem:[%s8468_s2 + $0x904] ss:$8 sps:$4 sm:$0xff]  }
 0x1c0   :  { %1876 = vmatprep.subr.bf16.mxu1 %v5997_v13  ;;  %v6049_v13 = vld [vmem:[%s8468_s2 + $0x800] ss:$8 sps:$4 sm:$0xff]  }
 0x1c1   :  { %2115 = vmatpush2.bf16.msra.mxu0 %v5992_v14  ;;  %v6057_v14 = vld [vmem:[%s8468_s2 + $0x8f4] ss:$8 sps:$4 sm:$0xff]  }
 0x1c2   :  { %2116 = vmatprep.subr.bf16.mxu0 %v6000_v9  ;;  %v6052_v9 = vld [vmem:[%s8468_s2 + $0x900] ss:$8 sps:$4 sm:$0xff]  }
 0x1c3   :  { %1877 = vmatpush2.bf16.msra.mxu1 %v5995_v16  ;;  %v6060_v16 = vld [vmem:[%s8468_s2 + $0x9f4] ss:$8 sps:$4 sm:$0xff]  }
 0x1c4   :  { %1878 = vmatprep.subr.bf16.mxu1 %v6003_v17  ;;  %v6055_v17 = vld [vmem:[%s8468_s2 + $0x8f0] ss:$8 sps:$4 sm:$0xff]  }
 0x1c5   :  { %2117 = vmatpush2.bf16.msra.mxu0 %v5998_v19  ;;  %v6063_v19 = vld [vmem:[%s8468_s2 + $0x8e4] ss:$8 sps:$4 sm:$0xff]  }
 0x1c6   :  { %2118 = vmatprep.subr.bf16.mxu0 %v6006_v20  ;;  %v6058_v20 = vld [vmem:[%s8468_s2 + $0x9f0] ss:$8 sps:$4 sm:$0xff]  }
 0x1c7   :  { %1879 = vmatpush2.bf16.msra.mxu1 %v6001_v23  ;;  %v6061_v23 = vld [vmem:[%s8468_s2 + $0x8e0] ss:$8 sps:$4 sm:$0xff]  }
 0x1c8   :  { %2324 = vmatprep.subr.bf16.mxu1 %v6009_v25  ;;  %v6069_v25 = vld [vmem:[%s8468_s2 + $0x8d4] ss:$8 sps:$4 sm:$0xff]  }
 0x1c9   :  { %2119 = vmatpush2.bf16.msra.mxu0 %v6004_v26  ;;  %v6064_v26 = vld [vmem:[%s8468_s2 + $0x9e0] ss:$8 sps:$4 sm:$0xff]  }
 0x1ca   :  { %1881 = vmatmul.mubr.bf16.vlgmr.msra.gmra.mxu1 %v1653_v27  ;;  %v454_v35 = vpop.f32.mrf.mxu1  ;;  %2564 = vmatprep.subr.bf16.mxu0 %v6012_v37  ;;  %v6072_v27 = vld [vmem:[%s8468_s2 + $0x9d4] ss:$8 sps:$4 sm:$0xff]   ;;  %v6067_v37 = vld [vmem:[%s8468_s2 + $0x8d0] ss:$8 sps:$4 sm:$0xff]  }
 0x1cb   :  { %2325 = vmatpush1.bf16.msra.mxu1 %v6007_v29  ;;  %2356 = vmatprep.mubr.bf16.mxu1 %v2130_v40  ;;  %v6075_v40 = vld [vmem:[%s8468_s2 + $0x8c4] ss:$8 sps:$4 sm:$0xff]   ;;  %v6070_v29 = vld [vmem:[%s8468_s2 + $0x9d0] ss:$8 sps:$4 sm:$0xff]  }
 0x1cc   :  { %2121 = vmatmul.mubr.bf16.vlgmr.msra.gmra.mxu0 %v1924_v32  ;;  %v456_v41 = vpop.f32.mrf.mxu1  ;;  %v694_v42 = vpop.f32.mrf.mxu0  ;;  %2326 = vmatprep.subr.bf16.mxu1 %v6015_v30  ;;  %v6078_v30 = vld [vmem:[%s8468_s2 + $0x9c4] ss:$8 sps:$4 sm:$0xff]   ;;  %v6081_v32 = vld [vmem:[%s8468_s2 + $0x8b4] ss:$8 sps:$4 sm:$0xff]  }
 0x1cd   :  { %v4034_v44 = vrot.slane %v694_v42, 4  ;;  %2565 = vmatpush1.bf16.msra.mxu0 %v6010_v12  ;;  %2596 = vmatprep.mubr.bf16.mxu0 %v2401_v38  ;;  %v6073_v12 = vld [vmem:[%s8468_s2 + $0x8c0] ss:$8 sps:$4 sm:$0xff]   ;;  %v6079_v38 = vld [vmem:[%s8468_s2 + $0x8b0] ss:$8 sps:$4 sm:$0xff]  }
 0x1ce   :  { %v458_v46 = vpop.f32.mrf.mxu1  ;;  %v696_v47 = vpop.f32.mrf.mxu0  ;;  %2566 = vmatprep.subr.bf16.mxu0 %v6018_v36  ;;  %v6084_v36 = vld [vmem:[%s8468_s2 + $0x9b4] ss:$8 sps:$4 sm:$0xff]   ;;  %v6090_v42 = vld [vmem:[%s8468_s2 + $0x9a4] ss:$8 sps:$4 sm:$0xff]  }
 0x1cf   :  { %v4067_v50 = vrot.slane %v696_v47, 4  ;;  %2327 = vmatpush1.bf16.msra.mxu1 %v6013_v39  ;;  %v7450_v52 = vsel %vm4057_vm0, %v454_v35, %v4034_v44  ;;  %v6076_v35 = vld [vmem:[%s8468_s2 + $0x9c0] ss:$8 sps:$4 sm:$0xff]   ;;  %v6087_v39 = vld [vmem:[%s8468_s2 + $0x8a4] ss:$8 sps:$4 sm:$0xff]  }
 0x1d0   :  { %v459_v53 = vpop.f32.mrf.mxu1  ;;  %v698_v54 = vpop.f32.mrf.mxu0  ;;  %2328 = vmatprep.subr.bf16.mxu1 %v6021_v43  ;;  %v6085_v43 = vld [vmem:[%s8468_s2 + $0x8a0] ss:$8 sps:$4 sm:$0xff]   ;;  %v6093_v44 = vld [vmem:[%s8468_s2 + $0x894] ss:$8 sps:$4 sm:$0xff]   ;;  %v6091_v47 = vld [vmem:[%s8468_s2 + $0x890] ss:$8 sps:$4 sm:$0xff]  }
 0x1d1   :  { %2567 = vmatpush1.bf16.msra.mxu0 %v6016_v45  ;;  %v7459_v58 = vsel %vm4057_vm0, %v456_v41, %v4067_v50  ;;  %v6082_v41 = vld [vmem:[%s8468_s2 + $0x9b0] ss:$8 sps:$4 sm:$0xff]   ;;  %v6088_v45 = vld [vmem:[%s8468_s2 + $0x9a0] ss:$8 sps:$4 sm:$0xff]   ;;  %v6096_v46 = vld [vmem:[%s8468_s2 + $0x994] ss:$8 sps:$4 sm:$0xff]  }
 0x1d2   :  { %v699_v59 = vpop.f32.mrf.mxu0  ;;  %2568 = vmatprep.subr.bf16.mxu0 %v6024_v48  ;;  %v6099_v48 = vld [vmem:[%s8468_s2 + $0x884] ss:$8 sps:$4 sm:$0xff]   ;;  %v6094_v50 = vld [vmem:[%s8468_s2 + $0x990] ss:$8 sps:$4 sm:$0xff]   ;;  %v6097_v53 = vld [vmem:[%s8468_s2 + $0x880] ss:$8 sps:$4 sm:$0xff]  }
 0x1d3   :  { %2329 = vmatpush1.bf16.msra.mxu1 %v6019_v51  ;;  %v6102_v51 = vld [vmem:[%s8468_s2 + $0x984] ss:$8 sps:$4 sm:$0xff]   ;;  %v6105_v54 = vld [vmem:[%s8468_s2 + $0xa74] ss:$8 sps:$4 sm:$0xff]  }
 0x1d4   :  { %2330 = vmatprep.subr.bf16.mxu1 %v6027_v55  ;;  %v6100_v55 = vld [vmem:[%s8468_s2 + $0x980] ss:$8 sps:$4 sm:$0xff]   ;;  %v6108_v59 = vld [vmem:[%s8468_s2 + $0xb74] ss:$8 sps:$4 sm:$0xff]  }
 0x1d5   :  { %2569 = vmatpush1.bf16.msra.mxu0 %v6022_v56  ;;  %v2129_v56 = vpack.c.bf16 %v6812_v15, %v6812_v15  ;;  %v6106_v15 = vld [vmem:[%s8468_s2 + $0xb70] ss:$8 sps:$4 sm:$0xff]  }
 0x1d6   :  { %2570 = vmatprep.subr.bf16.mxu0 %v6030_v60  ;;  %v2606_v60 = vpack.c.bf16 %v7005_v49, %v7005_v49  ;;  %v6114_v49 = vld [vmem:[%s8468_s2 + $0xb64] ss:$8 sps:$4 sm:$0xff]  }
 0x1d7   :  { %2331 = vmatpush1.bf16.msra.mxu1 %v6025_v61  ;;  %v6103_v61 = vld [vmem:[%s8468_s2 + $0xa70] ss:$8 sps:$4 sm:$0xff]  }
 0x1d8   :  { %2332 = vmatprep.subr.bf16.mxu1 %v6033_v6  ;;  %v6111_v6 = vld [vmem:[%s8468_s2 + $0xa64] ss:$8 sps:$4 sm:$0xff]  }
 0x1d9   :  { %2571 = vmatpush1.bf16.msra.mxu0 %v6028_v62  ;;  %v2400_v62 = vrot.slane %v2129_v56, 2 }
 0x1da   :  { %2572 = vmatprep.subr.bf16.mxu0 %v6036_v63 }
 0x1db   :  { %2333 = vmatpush1.bf16.msra.mxu1 %v6031_v0  ;;  %v2877_v0 = vrot.slane %v2606_v60, 2 }
 0x1dc   :  { %2334 = vmatprep.subr.bf16.mxu1 %v6039_v1  ;;  %v6109_v1 = vld [vmem:[%s8468_s2 + $0xa60] ss:$8 sps:$4 sm:$0xff]  }
 0x1dd   :  { %2573 = vmatpush1.bf16.msra.mxu0 %v6034_v2 }
 0x1de   :  { %2574 = vmatprep.subr.bf16.mxu0 %v6042_v3 }
 0x1df   :  { %2335 = vmatpush1.bf16.msra.mxu1 %v6037_v4  ;;  %v6117_v4 = vld [vmem:[%s8468_s2 + $0xa54] ss:$8 sps:$4 sm:$0xff]  }
 0x1e0   :  { %2336 = vmatprep.subr.bf16.mxu1 %v6045_v5 }
 0x1e1   :  { %2575 = vmatpush1.bf16.msra.mxu0 %v6040_v7  ;;  %v6112_v7 = vld [vmem:[%s8468_s2 + $0xb60] ss:$8 sps:$4 sm:$0xff]  }
 0x1e2   :  { %2576 = vmatprep.subr.bf16.mxu0 %v6048_v8 }
 0x1e3   :  { %2337 = vmatpush1.bf16.msra.mxu1 %v6043_v31 }
 0x1e4   :  { %2338 = vmatprep.subr.bf16.mxu1 %v6051_v34  ;;  %v6120_v34 = vld [vmem:[%s8468_s2 + $0xb54] ss:$8 sps:$4 sm:$0xff]  }
 0x1e5   :  { %2577 = vmatpush1.bf16.msra.mxu0 %v6046_v10 }
 0x1e6   :  { %2578 = vmatprep.subr.bf16.mxu0 %v6054_v11  ;;  %v6115_v11 = vld [vmem:[%s8468_s2 + $0xa50] ss:$8 sps:$4 sm:$0xff]  }
 0x1e7   :  { %2339 = vmatpush1.bf16.msra.mxu1 %v6049_v13 }
 0x1e8   :  { %2340 = vmatprep.subr.bf16.mxu1 %v6057_v14 }
 0x1e9   :  { %2579 = vmatpush1.bf16.msra.mxu0 %v6052_v9 }
 0x1ea   :  { %2580 = vmatprep.subr.bf16.mxu0 %v6060_v16  ;;  %v6123_v16 = vld [vmem:[%s8468_s2 + $0xa44] ss:$8 sps:$4 sm:$0xff]  }
 0x1eb   :  { %2341 = vmatpush2.bf16.msra.mxu1 %v6055_v17  ;;  %v6118_v17 = vld [vmem:[%s8468_s2 + $0xb50] ss:$8 sps:$4 sm:$0xff]  }
 0x1ec   :  { %2342 = vmatprep.subr.bf16.mxu1 %v6063_v19 }
 0x1ed   :  { %2581 = vmatpush2.bf16.msra.mxu0 %v6058_v20 }
 0x1ee   :  { %2582 = vmatprep.subr.bf16.mxu0 %v6066_v22  ;;  %v6126_v22 = vld [vmem:[%s8468_s2 + $0xb44] ss:$8 sps:$4 sm:$0xff]  }
 0x1ef   :  { %2343 = vmatpush2.bf16.msra.mxu1 %v6061_v23  ;;  %v6121_v23 = vld [vmem:[%s8468_s2 + $0xa40] ss:$8 sps:$4 sm:$0xff]  }
 0x1f0   :  { %2344 = vmatprep.subr.bf16.mxu1 %v6069_v25  ;;  %v6129_v25 = vld [vmem:[%s8468_s2 + $0xa34] ss:$8 sps:$4 sm:$0xff]  }
 0x1f1   :  { %2583 = vmatpush2.bf16.msra.mxu0 %v6064_v26  ;;  %v6124_v26 = vld [vmem:[%s8468_s2 + $0xb40] ss:$8 sps:$4 sm:$0xff]  }
 0x1f2   :  { %2584 = vmatprep.subr.bf16.mxu0 %v6072_v27  ;;  %v6132_v27 = vld [vmem:[%s8468_s2 + $0xb34] ss:$8 sps:$4 sm:$0xff]  }
 0x1f3   :  { %2345 = vmatpush2.bf16.msra.mxu1 %v6067_v37  ;;  %v6127_v37 = vld [vmem:[%s8468_s2 + $0xa30] ss:$8 sps:$4 sm:$0xff]  }
 0x1f4   :  { %2346 = vmatprep.subr.bf16.mxu1 %v6075_v40  ;;  %v6135_v40 = vld [vmem:[%s8468_s2 + $0xa24] ss:$8 sps:$4 sm:$0xff]  }
 0x1f5   :  { %2585 = vmatpush2.bf16.msra.mxu0 %v6070_v29  ;;  %v6130_v29 = vld [vmem:[%s8468_s2 + $0xb30] ss:$8 sps:$4 sm:$0xff]  }
 0x1f6   :  { %2586 = vmatprep.subr.bf16.mxu0 %v6078_v30  ;;  %v6138_v30 = vld [vmem:[%s8468_s2 + $0xb24] ss:$8 sps:$4 sm:$0xff]  }
 0x1f7   :  { %2347 = vmatpush2.bf16.msra.mxu1 %v6073_v12  ;;  %v6133_v12 = vld [vmem:[%s8468_s2 + $0xa20] ss:$8 sps:$4 sm:$0xff]  }
 0x1f8   :  { %2348 = vmatprep.subr.bf16.mxu1 %v6081_v32  ;;  %v6141_v32 = vld [vmem:[%s8468_s2 + $0xa14] ss:$8 sps:$4 sm:$0xff]  }
 0x1f9   :  { %2587 = vmatpush2.bf16.msra.mxu0 %v6076_v35  ;;  %v6136_v35 = vld [vmem:[%s8468_s2 + $0xb20] ss:$8 sps:$4 sm:$0xff]  }
 0x1fa   :  { %2588 = vmatprep.subr.bf16.mxu0 %v6084_v36  ;;  %v6144_v36 = vld [vmem:[%s8468_s2 + $0xb14] ss:$8 sps:$4 sm:$0xff]  }
 0x1fb   :  { %2349 = vmatpush2.bf16.msra.mxu1 %v6079_v38  ;;  %v6139_v38 = vld [vmem:[%s8468_s2 + $0xa10] ss:$8 sps:$4 sm:$0xff]  }
 0x1fc   :  { %2350 = vmatprep.subr.bf16.mxu1 %v6087_v39  ;;  %v6147_v39 = vld [vmem:[%s8468_s2 + $0xa04] ss:$8 sps:$4 sm:$0xff]  }
 0x1fd   :  { %2589 = vmatpush2.bf16.msra.mxu0 %v6082_v41  ;;  %v6142_v41 = vld [vmem:[%s8468_s2 + $0xb10] ss:$8 sps:$4 sm:$0xff]  }
 0x1fe   :  { %2590 = vmatprep.subr.bf16.mxu0 %v6090_v42  ;;  %v6150_v42 = vld [vmem:[%s8468_s2 + $0xb04] ss:$8 sps:$4 sm:$0xff]  }
 0x1ff   :  { %2351 = vmatpush2.bf16.msra.mxu1 %v6085_v43  ;;  %v6145_v43 = vld [vmem:[%s8468_s2 + $0xa00] ss:$8 sps:$4 sm:$0xff]  }
 0x200   :  { %2352 = vmatprep.subr.bf16.mxu1 %v6093_v44  ;;  %v6153_v44 = vld [vmem:[%s8468_s2 + $0xaf4] ss:$8 sps:$4 sm:$0xff]  }
 0x201   :  { %2591 = vmatpush2.bf16.msra.mxu0 %v6088_v45  ;;  %v6148_v45 = vld [vmem:[%s8468_s2 + $0xb00] ss:$8 sps:$4 sm:$0xff]  }
 0x202   :  { %2592 = vmatprep.subr.bf16.mxu0 %v6096_v46  ;;  %v6156_v46 = vld [vmem:[%s8468_s2 + $0xbf4] ss:$8 sps:$4 sm:$0xff]  }
 0x203   :  { %2353 = vmatpush2.bf16.msra.mxu1 %v6091_v47  ;;  %v6151_v47 = vld [vmem:[%s8468_s2 + $0xaf0] ss:$8 sps:$4 sm:$0xff]  }
 0x204   :  { %2354 = vmatprep.subr.bf16.mxu1 %v6099_v48  ;;  %v6159_v48 = vld [vmem:[%s8468_s2 + $0xae4] ss:$8 sps:$4 sm:$0xff]  }
 0x205   :  { %2593 = vmatpush2.bf16.msra.mxu0 %v6094_v50  ;;  %v6154_v50 = vld [vmem:[%s8468_s2 + $0xbf0] ss:$8 sps:$4 sm:$0xff]  }
 0x206   :  { %2594 = vmatprep.subr.bf16.mxu0 %v6102_v51  ;;  %v6162_v51 = vld [vmem:[%s8468_s2 + $0xbe4] ss:$8 sps:$4 sm:$0xff]  }
 0x207   :  { %2355 = vmatpush2.bf16.msra.mxu1 %v6097_v53  ;;  %v6157_v53 = vld [vmem:[%s8468_s2 + $0xae0] ss:$8 sps:$4 sm:$0xff]  }
 0x208   :  { %2800 = vmatprep.subr.bf16.mxu1 %v6105_v54  ;;  %v6165_v54 = vld [vmem:[%s8468_s2 + $0xad4] ss:$8 sps:$4 sm:$0xff]  }
 0x209   :  { %2595 = vmatpush2.bf16.msra.mxu0 %v6100_v55  ;;  %v6160_v55 = vld [vmem:[%s8468_s2 + $0xbe0] ss:$8 sps:$4 sm:$0xff]  }
 0x20a   :  { %v930_v63 = vpop.f32.mrf.mxu1  ;;  %2357 = vmatmul.mubr.bf16.vlgmr.msra.gmra.mxu1 %v2129_v56  ;;  %3040 = vmatprep.subr.bf16.mxu0 %v6108_v59  ;;  %v6168_v56 = vld [vmem:[%s8468_s2 + $0xbd4] ss:$8 sps:$4 sm:$0xff]   ;;  %v6163_v59 = vld [vmem:[%s8468_s2 + $0xad0] ss:$8 sps:$4 sm:$0xff]  }
 0x20b   :  { %2801 = vmatpush1.bf16.msra.mxu1 %v6103_v61  ;;  %2832 = vmatprep.mubr.bf16.mxu1 %v2606_v60  ;;  %v6171_v60 = vld [vmem:[%s8468_s2 + $0xac4] ss:$8 sps:$4 sm:$0xff]   ;;  %v6166_v61 = vld [vmem:[%s8468_s2 + $0xbd0] ss:$8 sps:$4 sm:$0xff]  }
 0x20c   :  { %v932_v2 = vpop.f32.mrf.mxu1  ;;  %v1170_v3 = vpop.f32.mrf.mxu0  ;;  %2597 = vmatmul.mubr.bf16.vlgmr.msra.gmra.mxu0 %v2400_v62  ;;  %2802 = vmatprep.subr.bf16.mxu1 %v6111_v6  ;;  %v6174_v6 = vld [vmem:[%s8468_s2 + $0xbc4] ss:$8 sps:$4 sm:$0xff]   ;;  %v6177_v62 = vld [vmem:[%s8468_s2 + $0xab4] ss:$8 sps:$4 sm:$0xff]  }
 0x20d   :  { %v4037_v5 = vrot.slane %v1170_v3, 4  ;;  %3041 = vmatpush1.bf16.msra.mxu0 %v6106_v15  ;;  %3072 = vmatprep.mubr.bf16.mxu0 %v2877_v0  ;;  %v6169_v15 = vld [vmem:[%s8468_s2 + $0xac0] ss:$8 sps:$4 sm:$0xff]   ;;  %v6175_v0 = vld [vmem:[%s8468_s2 + $0xab0] ss:$8 sps:$4 sm:$0xff]  }
 0x20e   :  { %v934_v8 = vpop.f32.mrf.mxu1  ;;  %v1172_v31 = vpop.f32.mrf.mxu0  ;;  %3042 = vmatprep.subr.bf16.mxu0 %v6114_v49  ;;  %v6180_v49 = vld [vmem:[%s8468_s2 + $0xbb4] ss:$8 sps:$4 sm:$0xff]   ;;  %v6186_v3 = vld [vmem:[%s8468_s2 + $0xba4] ss:$8 sps:$4 sm:$0xff]  }
 0x20f   :  { %v4070_v10 = vrot.slane %v1172_v31, 4  ;;  %2803 = vmatpush1.bf16.msra.mxu1 %v6109_v1  ;;  %v7652_v13 = vsel %vm4057_vm0, %v930_v63, %v4037_v5  ;;  %v6172_v63 = vld [vmem:[%s8468_s2 + $0xbc0] ss:$8 sps:$4 sm:$0xff]   ;;  %v6183_v1 = vld [vmem:[%s8468_s2 + $0xaa4] ss:$8 sps:$4 sm:$0xff]  }
 0x210   :  { %v935_v14 = vpop.f32.mrf.mxu1  ;;  %v1174_v9 = vpop.f32.mrf.mxu0  ;;  %2804 = vmatprep.subr.bf16.mxu1 %v6117_v4  ;;  %v6181_v4 = vld [vmem:[%s8468_s2 + $0xaa0] ss:$8 sps:$4 sm:$0xff]   ;;  %v6189_v5 = vld [vmem:[%s8468_s2 + $0xa94] ss:$8 sps:$4 sm:$0xff]   ;;  %v6187_v31 = vld [vmem:[%s8468_s2 + $0xa90] ss:$8 sps:$4 sm:$0xff]  }
 0x211   :  { %3043 = vmatpush1.bf16.msra.mxu0 %v6112_v7  ;;  %v7661_v19 = vsel %vm4057_vm0, %v932_v2, %v4070_v10  ;;  %v6178_v2 = vld [vmem:[%s8468_s2 + $0xbb0] ss:$8 sps:$4 sm:$0xff]   ;;  %v6184_v7 = vld [vmem:[%s8468_s2 + $0xba0] ss:$8 sps:$4 sm:$0xff]   ;;  %v6192_v8 = vld [vmem:[%s8468_s2 + $0xb94] ss:$8 sps:$4 sm:$0xff]  }
 0x212   :  { %v1175_v20 = vpop.f32.mrf.mxu0  ;;  %3044 = vmatprep.subr.bf16.mxu0 %v6120_v34  ;;  %v6195_v34 = vld [vmem:[%s8468_s2 + $0xa84] ss:$8 sps:$4 sm:$0xff]   ;;  %v6190_v10 = vld [vmem:[%s8468_s2 + $0xb90] ss:$8 sps:$4 sm:$0xff]   ;;  %v6193_v14 = vld [vmem:[%s8468_s2 + $0xa80] ss:$8 sps:$4 sm:$0xff]  }
 0x213   :  { %2805 = vmatpush1.bf16.msra.mxu1 %v6115_v11  ;;  %v6198_v11 = vld [vmem:[%s8468_s2 + $0xb84] ss:$8 sps:$4 sm:$0xff]   ;;  %v6201_v9 = vld [vmem:[%s8468_s2 + $0xc74] ss:$8 sps:$4 sm:$0xff]  }
 0x214   :  { %2806 = vmatprep.subr.bf16.mxu1 %v6123_v16  ;;  %v6196_v16 = vld [vmem:[%s8468_s2 + $0xb80] ss:$8 sps:$4 sm:$0xff]   ;;  %v6204_v20 = vld [vmem:[%s8468_s2 + $0xd74] ss:$8 sps:$4 sm:$0xff]  }
 0x215   :  { %3045 = vmatpush1.bf16.msra.mxu0 %v6118_v17  ;;  %v2605_v17 = vpack.c.bf16 %v6814_v18, %v6814_v18  ;;  %v6202_v18 = vld [vmem:[%s8468_s2 + $0xd70] ss:$8 sps:$4 sm:$0xff]  }
 0x216   :  { %3046 = vmatprep.subr.bf16.mxu0 %v6126_v22  ;;  %v3082_v22 = vpack.c.bf16 %v7019_v57, %v7019_v57  ;;  %v6210_v57 = vld [vmem:[%s8468_s2 + $0xd64] ss:$8 sps:$4 sm:$0xff]  }
 0x217   :  { %2807 = vmatpush1.bf16.msra.mxu1 %v6121_v23  ;;  %v6199_v23 = vld [vmem:[%s8468_s2 + $0xc70] ss:$8 sps:$4 sm:$0xff]  }
 0x218   :  { %2808 = vmatprep.subr.bf16.mxu1 %v6129_v25  ;;  %v6207_v25 = vld [vmem:[%s8468_s2 + $0xc64] ss:$8 sps:$4 sm:$0xff]  }
 0x219   :  { %3047 = vmatpush1.bf16.msra.mxu0 %v6124_v26  ;;  %v2876_v26 = vrot.slane %v2605_v17, 2 }
 0x21a   :  { %3048 = vmatprep.subr.bf16.mxu0 %v6132_v27 }
 0x21b   :  { %2809 = vmatpush1.bf16.msra.mxu1 %v6127_v37  ;;  %v3353_v37 = vrot.slane %v3082_v22, 2 }
 0x21c   :  { %2810 = vmatprep.subr.bf16.mxu1 %v6135_v40  ;;  %v6205_v40 = vld [vmem:[%s8468_s2 + $0xc60] ss:$8 sps:$4 sm:$0xff]  }
 0x21d   :  { %3049 = vmatpush1.bf16.msra.mxu0 %v6130_v29 }
 0x21e   :  { %3050 = vmatprep.subr.bf16.mxu0 %v6138_v30 }
 0x21f   :  { %2811 = vmatpush1.bf16.msra.mxu1 %v6133_v12  ;;  %v6213_v12 = vld [vmem:[%s8468_s2 + $0xc54] ss:$8 sps:$4 sm:$0xff]  }
 0x220   :  { %2812 = vmatprep.subr.bf16.mxu1 %v6141_v32 }
 0x221   :  { %3051 = vmatpush1.bf16.msra.mxu0 %v6136_v35  ;;  %v6208_v35 = vld [vmem:[%s8468_s2 + $0xd60] ss:$8 sps:$4 sm:$0xff]  }
 0x222   :  { %3052 = vmatprep.subr.bf16.mxu0 %v6144_v36 }
 0x223   :  { %2813 = vmatpush1.bf16.msra.mxu1 %v6139_v38 }
 0x224   :  { %2814 = vmatprep.subr.bf16.mxu1 %v6147_v39  ;;  %v6216_v39 = vld [vmem:[%s8468_s2 + $0xd54] ss:$8 sps:$4 sm:$0xff]  }
 0x225   :  { %3053 = vmatpush1.bf16.msra.mxu0 %v6142_v41 }
 0x226   :  { %3054 = vmatprep.subr.bf16.mxu0 %v6150_v42  ;;  %v6211_v42 = vld [vmem:[%s8468_s2 + $0xc50] ss:$8 sps:$4 sm:$0xff]  }
 0x227   :  { %2815 = vmatpush1.bf16.msra.mxu1 %v6145_v43 }
 0x228   :  { %2816 = vmatprep.subr.bf16.mxu1 %v6153_v44 }
 0x229   :  { %3055 = vmatpush1.bf16.msra.mxu0 %v6148_v45 }
 0x22a   :  { %3056 = vmatprep.subr.bf16.mxu0 %v6156_v46  ;;  %v6219_v46 = vld [vmem:[%s8468_s2 + $0xc44] ss:$8 sps:$4 sm:$0xff]  }
 0x22b   :  { %2817 = vmatpush2.bf16.msra.mxu1 %v6151_v47  ;;  %v6214_v47 = vld [vmem:[%s8468_s2 + $0xd50] ss:$8 sps:$4 sm:$0xff]  }
 0x22c   :  { %2818 = vmatprep.subr.bf16.mxu1 %v6159_v48 }
 0x22d   :  { %3057 = vmatpush2.bf16.msra.mxu0 %v6154_v50 }
 0x22e   :  { %3058 = vmatprep.subr.bf16.mxu0 %v6162_v51  ;;  %v6222_v51 = vld [vmem:[%s8468_s2 + $0xd44] ss:$8 sps:$4 sm:$0xff]  }
 0x22f   :  { %2819 = vmatpush2.bf16.msra.mxu1 %v6157_v53  ;;  %v6217_v53 = vld [vmem:[%s8468_s2 + $0xc40] ss:$8 sps:$4 sm:$0xff]  }
 0x230   :  { %2820 = vmatprep.subr.bf16.mxu1 %v6165_v54  ;;  %v6225_v54 = vld [vmem:[%s8468_s2 + $0xc34] ss:$8 sps:$4 sm:$0xff]  }
 0x231   :  { %3059 = vmatpush2.bf16.msra.mxu0 %v6160_v55  ;;  %v6220_v55 = vld [vmem:[%s8468_s2 + $0xd40] ss:$8 sps:$4 sm:$0xff]  }
 0x232   :  { %3060 = vmatprep.subr.bf16.mxu0 %v6168_v56  ;;  %v6228_v56 = vld [vmem:[%s8468_s2 + $0xd34] ss:$8 sps:$4 sm:$0xff]  }
 0x233   :  { %2821 = vmatpush2.bf16.msra.mxu1 %v6163_v59  ;;  %v6223_v59 = vld [vmem:[%s8468_s2 + $0xc30] ss:$8 sps:$4 sm:$0xff]  }
 0x234   :  { %2822 = vmatprep.subr.bf16.mxu1 %v6171_v60  ;;  %v6231_v60 = vld [vmem:[%s8468_s2 + $0xc24] ss:$8 sps:$4 sm:$0xff]  }
 0x235   :  { %3061 = vmatpush2.bf16.msra.mxu0 %v6166_v61  ;;  %v6226_v61 = vld [vmem:[%s8468_s2 + $0xd30] ss:$8 sps:$4 sm:$0xff]  }
 0x236   :  { %3062 = vmatprep.subr.bf16.mxu0 %v6174_v6  ;;  %v6234_v6 = vld [vmem:[%s8468_s2 + $0xd24] ss:$8 sps:$4 sm:$0xff]  }
 0x237   :  { %2823 = vmatpush2.bf16.msra.mxu1 %v6169_v15  ;;  %v6229_v15 = vld [vmem:[%s8468_s2 + $0xc20] ss:$8 sps:$4 sm:$0xff]  }
 0x238   :  { %2824 = vmatprep.subr.bf16.mxu1 %v6177_v62  ;;  %v6237_v62 = vld [vmem:[%s8468_s2 + $0xc14] ss:$8 sps:$4 sm:$0xff]  }
 0x239   :  { %3063 = vmatpush2.bf16.msra.mxu0 %v6172_v63  ;;  %v6232_v63 = vld [vmem:[%s8468_s2 + $0xd20] ss:$8 sps:$4 sm:$0xff]  }
 0x23a   :  { %3064 = vmatprep.subr.bf16.mxu0 %v6180_v49  ;;  %v6240_v49 = vld [vmem:[%s8468_s2 + $0xd14] ss:$8 sps:$4 sm:$0xff]  }
 0x23b   :  { %2825 = vmatpush2.bf16.msra.mxu1 %v6175_v0  ;;  %v6235_v0 = vld [vmem:[%s8468_s2 + $0xc10] ss:$8 sps:$4 sm:$0xff]  }
 0x23c   :  { %2826 = vmatprep.subr.bf16.mxu1 %v6183_v1  ;;  %v6243_v1 = vld [vmem:[%s8468_s2 + $0xc04] ss:$8 sps:$4 sm:$0xff]  }
 0x23d   :  { %3065 = vmatpush2.bf16.msra.mxu0 %v6178_v2  ;;  %v6238_v2 = vld [vmem:[%s8468_s2 + $0xd10] ss:$8 sps:$4 sm:$0xff]  }
 0x23e   :  { %3066 = vmatprep.subr.bf16.mxu0 %v6186_v3  ;;  %v6246_v3 = vld [vmem:[%s8468_s2 + $0xd04] ss:$8 sps:$4 sm:$0xff]  }
 0x23f   :  { %2827 = vmatpush2.bf16.msra.mxu1 %v6181_v4  ;;  %v6241_v4 = vld [vmem:[%s8468_s2 + $0xc00] ss:$8 sps:$4 sm:$0xff]  }
 0x240   :  { %2828 = vmatprep.subr.bf16.mxu1 %v6189_v5  ;;  %v6249_v5 = vld [vmem:[%s8468_s2 + $0xcf4] ss:$8 sps:$4 sm:$0xff]  }
 0x241   :  { %3067 = vmatpush2.bf16.msra.mxu0 %v6184_v7  ;;  %v6244_v7 = vld [vmem:[%s8468_s2 + $0xd00] ss:$8 sps:$4 sm:$0xff]  }
 0x242   :  { %3068 = vmatprep.subr.bf16.mxu0 %v6192_v8  ;;  %v6252_v8 = vld [vmem:[%s8468_s2 + $0xdf4] ss:$8 sps:$4 sm:$0xff]  }
 0x243   :  { %2829 = vmatpush2.bf16.msra.mxu1 %v6187_v31  ;;  %v6247_v31 = vld [vmem:[%s8468_s2 + $0xcf0] ss:$8 sps:$4 sm:$0xff]  }
 0x244   :  { %2830 = vmatprep.subr.bf16.mxu1 %v6195_v34  ;;  %v6255_v34 = vld [vmem:[%s8468_s2 + $0xce4] ss:$8 sps:$4 sm:$0xff]  }
 0x245   :  { %3069 = vmatpush2.bf16.msra.mxu0 %v6190_v10  ;;  %v6250_v10 = vld [vmem:[%s8468_s2 + $0xdf0] ss:$8 sps:$4 sm:$0xff]  }
 0x246   :  { %3070 = vmatprep.subr.bf16.mxu0 %v6198_v11  ;;  %v6258_v11 = vld [vmem:[%s8468_s2 + $0xde4] ss:$8 sps:$4 sm:$0xff]  }
 0x247   :  { %2831 = vmatpush2.bf16.msra.mxu1 %v6193_v14  ;;  %v6253_v14 = vld [vmem:[%s8468_s2 + $0xce0] ss:$8 sps:$4 sm:$0xff]  }
 0x248   :  { %3276 = vmatprep.subr.bf16.mxu1 %v6201_v9  ;;  %v6261_v9 = vld [vmem:[%s8468_s2 + $0xcd4] ss:$8 sps:$4 sm:$0xff]  }
 0x249   :  { %3071 = vmatpush2.bf16.msra.mxu0 %v6196_v16  ;;  %v6256_v16 = vld [vmem:[%s8468_s2 + $0xde0] ss:$8 sps:$4 sm:$0xff]  }
 0x24a   :  { %v1406_v27 = vpop.f32.mrf.mxu1  ;;  %2833 = vmatmul.mubr.bf16.vlgmr.msra.gmra.mxu1 %v2605_v17  ;;  %3516 = vmatprep.subr.bf16.mxu0 %v6204_v20  ;;  %v6264_v17 = vld [vmem:[%s8468_s2 + $0xdd4] ss:$8 sps:$4 sm:$0xff]   ;;  %v6259_v20 = vld [vmem:[%s8468_s2 + $0xcd0] ss:$8 sps:$4 sm:$0xff]  }
 0x24b   :  { %3277 = vmatpush1.bf16.msra.mxu1 %v6199_v23  ;;  %3308 = vmatprep.mubr.bf16.mxu1 %v3082_v22  ;;  %v6267_v22 = vld [vmem:[%s8468_s2 + $0xcc4] ss:$8 sps:$4 sm:$0xff]   ;;  %v6262_v23 = vld [vmem:[%s8468_s2 + $0xdd0] ss:$8 sps:$4 sm:$0xff]  }
 0x24c   :  { %v1408_v29 = vpop.f32.mrf.mxu1  ;;  %v1646_v30 = vpop.f32.mrf.mxu0  ;;  %3073 = vmatmul.mubr.bf16.vlgmr.msra.gmra.mxu0 %v2876_v26  ;;  %3278 = vmatprep.subr.bf16.mxu1 %v6207_v25  ;;  %v6270_v25 = vld [vmem:[%s8468_s2 + $0xdc4] ss:$8 sps:$4 sm:$0xff]   ;;  %v6273_v26 = vld [vmem:[%s8468_s2 + $0xcb4] ss:$8 sps:$4 sm:$0xff]  }
 0x24d   :  { %v4040_v32 = vrot.slane %v1646_v30, 4  ;;  %3517 = vmatpush1.bf16.msra.mxu0 %v6202_v18  ;;  %3548 = vmatprep.mubr.bf16.mxu0 %v3353_v37  ;;  %v6265_v18 = vld [vmem:[%s8468_s2 + $0xcc0] ss:$8 sps:$4 sm:$0xff]   ;;  %v6271_v37 = vld [vmem:[%s8468_s2 + $0xcb0] ss:$8 sps:$4 sm:$0xff]  }
 0x24e   :  { %v1410_v36 = vpop.f32.mrf.mxu1  ;;  %v1648_v38 = vpop.f32.mrf.mxu0  ;;  %3518 = vmatprep.subr.bf16.mxu0 %v6210_v57  ;;  %v6276_v57 = vld [vmem:[%s8468_s2 + $0xdb4] ss:$8 sps:$4 sm:$0xff]   ;;  %v6282_v30 = vld [vmem:[%s8468_s2 + $0xda4] ss:$8 sps:$4 sm:$0xff]  }
 0x24f   :  { %v4073_v41 = vrot.slane %v1648_v38, 4  ;;  %3279 = vmatpush1.bf16.msra.mxu1 %v6205_v40  ;;  %v7854_v43 = vsel %vm4057_vm0, %v1406_v27, %v4040_v32  ;;  %v6268_v27 = vld [vmem:[%s8468_s2 + $0xdc0] ss:$8 sps:$4 sm:$0xff]   ;;  %v6279_v40 = vld [vmem:[%s8468_s2 + $0xca4] ss:$8 sps:$4 sm:$0xff]  }
 0x250   :  { %v1411_v44 = vpop.f32.mrf.mxu1  ;;  %v1650_v45 = vpop.f32.mrf.mxu0  ;;  %3280 = vmatprep.subr.bf16.mxu1 %v6213_v12  ;;  %v6277_v12 = vld [vmem:[%s8468_s2 + $0xca0] ss:$8 sps:$4 sm:$0xff]   ;;  %v6285_v32 = vld [vmem:[%s8468_s2 + $0xc94] ss:$8 sps:$4 sm:$0xff]   ;;  %v6283_v38 = vld [vmem:[%s8468_s2 + $0xc90] ss:$8 sps:$4 sm:$0xff]  }
 0x251   :  { %3519 = vmatpush1.bf16.msra.mxu0 %v6208_v35  ;;  %v7863_v48 = vsel %vm4057_vm0, %v1408_v29, %v4073_v41  ;;  %v6274_v29 = vld [vmem:[%s8468_s2 + $0xdb0] ss:$8 sps:$4 sm:$0xff]   ;;  %v6280_v35 = vld [vmem:[%s8468_s2 + $0xda0] ss:$8 sps:$4 sm:$0xff]   ;;  %v6288_v36 = vld [vmem:[%s8468_s2 + $0xd94] ss:$8 sps:$4 sm:$0xff]   ;;  %v5462_v44 = vadd.f32 %v7429_v33, %v7415_v28 }
 0x252   :  { %v1651_v50 = vpop.f32.mrf.mxu0  ;;  %3520 = vmatprep.subr.bf16.mxu0 %v6216_v39  ;;  %v6291_v39 = vld [vmem:[%s8468_s2 + $0xc84] ss:$8 sps:$4 sm:$0xff]   ;;  %v6286_v41 = vld [vmem:[%s8468_s2 + $0xd90] ss:$8 sps:$4 sm:$0xff]   ;;  %v6289_v45 = vld [vmem:[%s8468_s2 + $0xc80] ss:$8 sps:$4 sm:$0xff]  }
 0x253   :  { %3281 = vmatpush1.bf16.msra.mxu1 %v6211_v42  ;;  %v6294_v42 = vld [vmem:[%s8468_s2 + $0xd84] ss:$8 sps:$4 sm:$0xff]   ;;  %v3081_v50 = vpack.c.bf16 %v6816_v21, %v6816_v21  ;;  %v6300_v28 = vld [vmem:[%s8468_s2 + $0xf74] ss:$8 sps:$4 sm:$0xff]   ;;  %v3558_v33 = vpack.c.bf16 %v5462_v44, %v5462_v44  ;;  %v6298_v21 = vld [vmem:[%s8468_s2 + $0xf70] ss:$8 sps:$4 sm:$0xff]  }
 0x254   :  { %3282 = vmatprep.subr.bf16.mxu1 %v6219_v46  ;;  %v6297_v46 = vld [vmem:[%s8468_s2 + $0xe74] ss:$8 sps:$4 sm:$0xff]   ;;  %v6349_v44 = vld [vmem:[%s8468_s2 + $0xee0] ss:$8 sps:$4 sm:$0xff]  }
 0x255   :  { %3521 = vmatpush1.bf16.msra.mxu0 %v6214_v47  ;;  %v6292_v47 = vld [vmem:[%s8468_s2 + $0xd80] ss:$8 sps:$4 sm:$0xff]  }
 0x256   :  { %3522 = vmatprep.subr.bf16.mxu0 %v6222_v51  ;;  %v6295_v51 = vld [vmem:[%s8468_s2 + $0xe70] ss:$8 sps:$4 sm:$0xff]  }
 0x257   :  { %3283 = vmatpush1.bf16.msra.mxu1 %v6217_v53  ;;  %v6303_v53 = vld [vmem:[%s8468_s2 + $0xe64] ss:$8 sps:$4 sm:$0xff]  }
 0x258   :  { %3284 = vmatprep.subr.bf16.mxu1 %v6225_v54  ;;  %v3352_v54 = vrot.slane %v3081_v50, 2 }
 0x259   :  { %3523 = vmatpush1.bf16.msra.mxu0 %v6220_v55 }
 0x25a   :  { %3524 = vmatprep.subr.bf16.mxu0 %v6228_v56  ;;  %v6306_v56 = vld [vmem:[%s8468_s2 + $0xf64] ss:$8 sps:$4 sm:$0xff]  }
 0x25b   :  { %3285 = vmatpush1.bf16.msra.mxu1 %v6223_v59  ;;  %v3829_v59 = vrot.slane %v3558_v33, 2 }
 0x25c   :  { %3286 = vmatprep.subr.bf16.mxu1 %v6231_v60  ;;  %v6301_v60 = vld [vmem:[%s8468_s2 + $0xe60] ss:$8 sps:$4 sm:$0xff]  }
 0x25d   :  { %3525 = vmatpush1.bf16.msra.mxu0 %v6226_v61 }
 0x25e   :  { %3526 = vmatprep.subr.bf16.mxu0 %v6234_v6 }
 0x25f   :  { %3287 = vmatpush1.bf16.msra.mxu1 %v6229_v15  ;;  %v6309_v15 = vld [vmem:[%s8468_s2 + $0xe54] ss:$8 sps:$4 sm:$0xff]  }
 0x260   :  { %3288 = vmatprep.subr.bf16.mxu1 %v6237_v62 }
 0x261   :  { %3527 = vmatpush1.bf16.msra.mxu0 %v6232_v63  ;;  %v6304_v63 = vld [vmem:[%s8468_s2 + $0xf60] ss:$8 sps:$4 sm:$0xff]  }
 0x262   :  { %3528 = vmatprep.subr.bf16.mxu0 %v6240_v49 }
 0x263   :  { %3289 = vmatpush1.bf16.msra.mxu1 %v6235_v0 }
 0x264   :  { %3290 = vmatprep.subr.bf16.mxu1 %v6243_v1  ;;  %v6312_v1 = vld [vmem:[%s8468_s2 + $0xf54] ss:$8 sps:$4 sm:$0xff]  }
 0x265   :  { %3529 = vmatpush1.bf16.msra.mxu0 %v6238_v2 }
 0x266   :  { %3530 = vmatprep.subr.bf16.mxu0 %v6246_v3  ;;  %v6307_v3 = vld [vmem:[%s8468_s2 + $0xe50] ss:$8 sps:$4 sm:$0xff]  }
 0x267   :  { %3291 = vmatpush1.bf16.msra.mxu1 %v6241_v4 }
 0x268   :  { %3292 = vmatprep.subr.bf16.mxu1 %v6249_v5 }
 0x269   :  { %3531 = vmatpush1.bf16.msra.mxu0 %v6244_v7 }
 0x26a   :  { %3532 = vmatprep.subr.bf16.mxu0 %v6252_v8  ;;  %v6315_v8 = vld [vmem:[%s8468_s2 + $0xe44] ss:$8 sps:$4 sm:$0xff]  }
 0x26b   :  { %3293 = vmatpush2.bf16.msra.mxu1 %v6247_v31  ;;  %v6310_v31 = vld [vmem:[%s8468_s2 + $0xf50] ss:$8 sps:$4 sm:$0xff]  }
 0x26c   :  { %3294 = vmatprep.subr.bf16.mxu1 %v6255_v34 }
 0x26d   :  { %3533 = vmatpush2.bf16.msra.mxu0 %v6250_v10 }
 0x26e   :  { %3534 = vmatprep.subr.bf16.mxu0 %v6258_v11  ;;  %v6318_v11 = vld [vmem:[%s8468_s2 + $0xf44] ss:$8 sps:$4 sm:$0xff]  }
 0x26f   :  { %3295 = vmatpush2.bf16.msra.mxu1 %v6253_v14  ;;  %v6313_v14 = vld [vmem:[%s8468_s2 + $0xe40] ss:$8 sps:$4 sm:$0xff]  }
 0x270   :  { %3296 = vmatprep.subr.bf16.mxu1 %v6261_v9  ;;  %v6321_v9 = vld [vmem:[%s8468_s2 + $0xe34] ss:$8 sps:$4 sm:$0xff]  }
 0x271   :  { %3535 = vmatpush2.bf16.msra.mxu0 %v6256_v16  ;;  %v6316_v16 = vld [vmem:[%s8468_s2 + $0xf40] ss:$8 sps:$4 sm:$0xff]  }
 0x272   :  { %3536 = vmatprep.subr.bf16.mxu0 %v6264_v17  ;;  %v6324_v17 = vld [vmem:[%s8468_s2 + $0xf34] ss:$8 sps:$4 sm:$0xff]  }
 0x273   :  { %3297 = vmatpush2.bf16.msra.mxu1 %v6259_v20  ;;  %v6319_v20 = vld [vmem:[%s8468_s2 + $0xe30] ss:$8 sps:$4 sm:$0xff]  }
 0x274   :  { %3298 = vmatprep.subr.bf16.mxu1 %v6267_v22  ;;  %v6327_v22 = vld [vmem:[%s8468_s2 + $0xe24] ss:$8 sps:$4 sm:$0xff]  }
 0x275   :  { %3537 = vmatpush2.bf16.msra.mxu0 %v6262_v23  ;;  %v6322_v23 = vld [vmem:[%s8468_s2 + $0xf30] ss:$8 sps:$4 sm:$0xff]  }
 0x276   :  { %3538 = vmatprep.subr.bf16.mxu0 %v6270_v25  ;;  %v6330_v25 = vld [vmem:[%s8468_s2 + $0xf24] ss:$8 sps:$4 sm:$0xff]  }
 0x277   :  { %3299 = vmatpush2.bf16.msra.mxu1 %v6265_v18  ;;  %v6325_v18 = vld [vmem:[%s8468_s2 + $0xe20] ss:$8 sps:$4 sm:$0xff]  }
 0x278   :  { %3300 = vmatprep.subr.bf16.mxu1 %v6273_v26  ;;  %v6333_v26 = vld [vmem:[%s8468_s2 + $0xe14] ss:$8 sps:$4 sm:$0xff]  }
 0x279   :  { %3539 = vmatpush2.bf16.msra.mxu0 %v6268_v27  ;;  %v6328_v27 = vld [vmem:[%s8468_s2 + $0xf20] ss:$8 sps:$4 sm:$0xff]  }
 0x27a   :  { %3540 = vmatprep.subr.bf16.mxu0 %v6276_v57  ;;  %v6336_v57 = vld [vmem:[%s8468_s2 + $0xf14] ss:$8 sps:$4 sm:$0xff]  }
 0x27b   :  { %3301 = vmatpush2.bf16.msra.mxu1 %v6271_v37  ;;  %v6331_v37 = vld [vmem:[%s8468_s2 + $0xe10] ss:$8 sps:$4 sm:$0xff]  }
 0x27c   :  { %3302 = vmatprep.subr.bf16.mxu1 %v6279_v40  ;;  %v6339_v40 = vld [vmem:[%s8468_s2 + $0xe04] ss:$8 sps:$4 sm:$0xff]  }
 0x27d   :  { %3541 = vmatpush2.bf16.msra.mxu0 %v6274_v29  ;;  %v6334_v29 = vld [vmem:[%s8468_s2 + $0xf10] ss:$8 sps:$4 sm:$0xff]  }
 0x27e   :  { %3542 = vmatprep.subr.bf16.mxu0 %v6282_v30  ;;  %v6342_v30 = vld [vmem:[%s8468_s2 + $0xf04] ss:$8 sps:$4 sm:$0xff]  }
 0x27f   :  { %3303 = vmatpush2.bf16.msra.mxu1 %v6277_v12  ;;  %v6337_v12 = vld [vmem:[%s8468_s2 + $0xe00] ss:$8 sps:$4 sm:$0xff]  }
 0x280   :  { %3304 = vmatprep.subr.bf16.mxu1 %v6285_v32  ;;  %v6345_v32 = vld [vmem:[%s8468_s2 + $0xef4] ss:$8 sps:$4 sm:$0xff]  }
 0x281   :  { %3543 = vmatpush2.bf16.msra.mxu0 %v6280_v35  ;;  %v6340_v35 = vld [vmem:[%s8468_s2 + $0xf00] ss:$8 sps:$4 sm:$0xff]  }
 0x282   :  { %3544 = vmatprep.subr.bf16.mxu0 %v6288_v36  ;;  %v6348_v36 = vld [vmem:[%s8468_s2 + $0xff4] ss:$8 sps:$4 sm:$0xff]  }
 0x283   :  { %3305 = vmatpush2.bf16.msra.mxu1 %v6283_v38  ;;  %v6343_v38 = vld [vmem:[%s8468_s2 + $0xef0] ss:$8 sps:$4 sm:$0xff]  }
 0x284   :  { %3306 = vmatprep.subr.bf16.mxu1 %v6291_v39  ;;  %v6351_v39 = vld [vmem:[%s8468_s2 + $0xee4] ss:$8 sps:$4 sm:$0xff]  }
 0x285   :  { %3545 = vmatpush2.bf16.msra.mxu0 %v6286_v41  ;;  %v6346_v41 = vld [vmem:[%s8468_s2 + $0xff0] ss:$8 sps:$4 sm:$0xff]  }
 0x286   :  { %3546 = vmatprep.subr.bf16.mxu0 %v6294_v42  ;;  %v6354_v42 = vld [vmem:[%s8468_s2 + $0xfe4] ss:$8 sps:$4 sm:$0xff]  }
 0x287   :  { %3307 = vmatpush2.bf16.msra.mxu1 %v6289_v45  ;;  %v6357_v45 = vld [vmem:[%s8468_s2 + $0xed4] ss:$8 sps:$4 sm:$0xff]  }
 0x288   :  { %3752 = vmatprep.subr.bf16.mxu1 %v6297_v46  ;;  %v6352_v46 = vld [vmem:[%s8468_s2 + $0xfe0] ss:$8 sps:$4 sm:$0xff]  }
 0x289   :  { %3547 = vmatpush2.bf16.msra.mxu0 %v6292_v47  ;;  %v6360_v47 = vld [vmem:[%s8468_s2 + $0xfd4] ss:$8 sps:$4 sm:$0xff]  }
 0x28a   :  { %v1882_v55 = vpop.f32.mrf.mxu1  ;;  %3309 = vmatmul.mubr.bf16.vlgmr.msra.gmra.mxu1 %v3081_v50  ;;  %3992 = vmatprep.subr.bf16.mxu0 %v6300_v28  ;;  %v6355_v50 = vld [vmem:[%s8468_s2 + $0xed0] ss:$8 sps:$4 sm:$0xff]   ;;  %v6363_v28 = vld [vmem:[%s8468_s2 + $0xec4] ss:$8 sps:$4 sm:$0xff]  }
 0x28b   :  { %3753 = vmatpush1.bf16.msra.mxu1 %v6295_v51  ;;  %3784 = vmatprep.mubr.bf16.mxu1 %v3558_v33  ;;  %v6358_v33 = vld [vmem:[%s8468_s2 + $0xfd0] ss:$8 sps:$4 sm:$0xff]   ;;  %v6366_v51 = vld [vmem:[%s8468_s2 + $0xfc4] ss:$8 sps:$4 sm:$0xff]  }
 0x28c   :  { %v1884_v61 = vpop.f32.mrf.mxu1  ;;  %v2122_v6 = vpop.f32.mrf.mxu0  ;;  %3549 = vmatmul.mubr.bf16.vlgmr.msra.gmra.mxu0 %v3352_v54  ;;  %3754 = vmatprep.subr.bf16.mxu1 %v6303_v53  ;;  %v6361_v53 = vld [vmem:[%s8468_s2 + $0xec0] ss:$8 sps:$4 sm:$0xff]  }
 0x28d   :  { %v4043_v62 = vrot.slane %v2122_v6, 4  ;;  %3993 = vmatpush1.bf16.msra.mxu0 %v6298_v21  ;;  %4024 = vmatprep.mubr.bf16.mxu0 %v3829_v59  ;;  %v6369_v21 = vld [vmem:[%s8468_s2 + $0xeb4] ss:$8 sps:$4 sm:$0xff]   ;;  %v6364_v54 = vld [vmem:[%s8468_s2 + $0xfc0] ss:$8 sps:$4 sm:$0xff]  }
 0x28e   :  { %v1886_v49 = vpop.f32.mrf.mxu1  ;;  %v2124_v0 = vpop.f32.mrf.mxu0  ;;  %3994 = vmatprep.subr.bf16.mxu0 %v6306_v56  ;;  %v6367_v56 = vld [vmem:[%s8468_s2 + $0xeb0] ss:$8 sps:$4 sm:$0xff]   ;;  %v6375_v59 = vld [vmem:[%s8468_s2 + $0xea4] ss:$8 sps:$4 sm:$0xff]   ;;  %v6373_v6 = vld [vmem:[%s8468_s2 + $0xea0] ss:$8 sps:$4 sm:$0xff]  }
 0x28f   :  { %v4076_v2 = vrot.slane %v2124_v0, 4  ;;  %3755 = vmatpush1.bf16.msra.mxu1 %v6301_v60  ;;  %v8056_v4 = vsel %vm4057_vm0, %v1882_v55, %v4043_v62  ;;  %v6372_v55 = vld [vmem:[%s8468_s2 + $0xfb4] ss:$8 sps:$4 sm:$0xff]   ;;  %v6370_v60 = vld [vmem:[%s8468_s2 + $0xfb0] ss:$8 sps:$4 sm:$0xff]  }
 0x290   :  { %v1887_v5 = vpop.f32.mrf.mxu1  ;;  %v2126_v7 = vpop.f32.mrf.mxu0  ;;  %3756 = vmatprep.subr.bf16.mxu1 %v6309_v15  ;;  %v6381_v15 = vld [vmem:[%s8468_s2 + $0xe94] ss:$8 sps:$4 sm:$0xff]   ;;  %v6376_v62 = vld [vmem:[%s8468_s2 + $0xfa0] ss:$8 sps:$4 sm:$0xff]   ;;  %v6379_v49 = vld [vmem:[%s8468_s2 + $0xe90] ss:$8 sps:$4 sm:$0xff]  }
 0x291   :  { %3995 = vmatpush1.bf16.msra.mxu0 %v6304_v63  ;;  %v8065_v34 = vsel %vm4057_vm0, %v1884_v61, %v4076_v2  ;;  %v6378_v61 = vld [vmem:[%s8468_s2 + $0xfa4] ss:$8 sps:$4 sm:$0xff]   ;;  %v6384_v63 = vld [vmem:[%s8468_s2 + $0xf94] ss:$8 sps:$4 sm:$0xff]   ;;  %v6388_v5 = vld [vmem:[%s8468_s2 + $0xf80] ss:$8 sps:$4 sm:$0xff]   ;;  %v3557_v7 = vpack.c.bf16 %v6818_v24, %v6818_v24 }
 0x292   :  { %v2127_v10 = vpop.f32.mrf.mxu0  ;;  %3996 = vmatprep.subr.bf16.mxu0 %v6312_v1  ;;  %v6387_v0 = vld [vmem:[%s8468_s2 + $0xe84] ss:$8 sps:$4 sm:$0xff]   ;;  %v6382_v1 = vld [vmem:[%s8468_s2 + $0xf90] ss:$8 sps:$4 sm:$0xff]  }
 0x293   :  { %3757 = vmatpush1.bf16.msra.mxu1 %v6307_v3  ;;  %v6390_v2 = vld [vmem:[%s8468_s2 + $0xf84] ss:$8 sps:$4 sm:$0xff]   ;;  %v6385_v3 = vld [vmem:[%s8468_s2 + $0xe80] ss:$8 sps:$4 sm:$0xff]  }
 0x294   :  { %3758 = vmatprep.subr.bf16.mxu1 %v6315_v8  ;;  %v3828_v8 = vrot.slane %v3557_v7, 2 }
 0x295   :  { %3997 = vmatpush1.bf16.msra.mxu0 %v6310_v31 }
 0x296   :  { %3998 = vmatprep.subr.bf16.mxu0 %v6318_v11 }
 0x297   :  { %3759 = vmatpush1.bf16.msra.mxu1 %v6313_v14 }
 0x298   :  { %3760 = vmatprep.subr.bf16.mxu1 %v6321_v9 }
 0x299   :  { %3999 = vmatpush1.bf16.msra.mxu0 %v6316_v16 }
 0x29a   :  { %4000 = vmatprep.subr.bf16.mxu0 %v6324_v17 }
 0x29b   :  { %3761 = vmatpush1.bf16.msra.mxu1 %v6319_v20 }
 0x29c   :  { %3762 = vmatprep.subr.bf16.mxu1 %v6327_v22 }
 0x29d   :  { %4001 = vmatpush1.bf16.msra.mxu0 %v6322_v23 }
 0x29e   :  { %4002 = vmatprep.subr.bf16.mxu0 %v6330_v25 }
 0x29f   :  { %3763 = vmatpush1.bf16.msra.mxu1 %v6325_v18 }
 0x2a0   :  { %3764 = vmatprep.subr.bf16.mxu1 %v6333_v26 }
 0x2a1   :  { %4003 = vmatpush1.bf16.msra.mxu0 %v6328_v27 }
 0x2a2   :  { %4004 = vmatprep.subr.bf16.mxu0 %v6336_v57 }
 0x2a3   :  { %3765 = vmatpush1.bf16.msra.mxu1 %v6331_v37 }
 0x2a4   :  { %3766 = vmatprep.subr.bf16.mxu1 %v6339_v40 }
 0x2a5   :  { %4005 = vmatpush1.bf16.msra.mxu0 %v6334_v29 }
 0x2a6   :  { %4006 = vmatprep.subr.bf16.mxu0 %v6342_v30 }
 0x2a7   :  { %3767 = vmatpush1.bf16.msra.mxu1 %v6337_v12 }
 0x2a8   :  { %3768 = vmatprep.subr.bf16.mxu1 %v6345_v32 }
 0x2a9   :  { %4007 = vmatpush1.bf16.msra.mxu0 %v6340_v35 }
 0x2aa   :  { %4008 = vmatprep.subr.bf16.mxu0 %v6348_v36 }
 0x2ab   :  { %3769 = vmatpush2.bf16.msra.mxu1 %v6343_v38  ;;  %v4106_v38 = vld [vmem:[%s8469_s3 + $0x40] sm:$0xff] }
 0x2ac   :  { %3770 = vmatprep.subr.bf16.mxu1 %v6351_v39 }
 0x2ad   :  { %4009 = vmatpush2.bf16.msra.mxu0 %v6346_v41 }
 0x2ae   :  { %4010 = vmatprep.subr.bf16.mxu0 %v6354_v42 }
 0x2af   :  { %3771 = vmatpush2.bf16.msra.mxu1 %v6349_v44 }
 0x2b0   :  { %3772 = vmatprep.subr.bf16.mxu1 %v6357_v45 }
 0x2b1   :  { %4011 = vmatpush2.bf16.msra.mxu0 %v6352_v46 }
 0x2b2   :  { %4012 = vmatprep.subr.bf16.mxu0 %v6360_v47  ;;  %v4098_v47 = vld [vmem:[%s8469_s3] sm:$0xff] }
 0x2b3   :  { %3773 = vmatpush2.bf16.msra.mxu1 %v6355_v50 }
 0x2b4   :  { %3774 = vmatprep.subr.bf16.mxu1 %v6363_v28 }
 0x2b5   :  { %4013 = vmatpush2.bf16.msra.mxu0 %v6358_v33 }
 0x2b6   :  { %4014 = vmatprep.subr.bf16.mxu0 %v6366_v51 }
 0x2b7   :  { %3775 = vmatpush2.bf16.msra.mxu1 %v6361_v53 }
 0x2b8   :  { %3776 = vmatprep.subr.bf16.mxu1 %v6369_v21 }
 0x2b9   :  { %4015 = vmatpush2.bf16.msra.mxu0 %v6364_v54 }
 0x2ba   :  { %4016 = vmatprep.subr.bf16.mxu0 %v6372_v55 }
 0x2bb   :  { %3777 = vmatpush2.bf16.msra.mxu1 %v6367_v56 }
 0x2bc   :  { %3778 = vmatprep.subr.bf16.mxu1 %v6375_v59 }
 0x2bd   :  { %4017 = vmatpush2.bf16.msra.mxu0 %v6370_v60 }
 0x2be   :  { %4018 = vmatprep.subr.bf16.mxu0 %v6378_v61 }
 0x2bf   :  { %3779 = vmatpush2.bf16.msra.mxu1 %v6373_v6 }
 0x2c0   :  { %3780 = vmatprep.subr.bf16.mxu1 %v6381_v15 }
 0x2c1   :  { %4019 = vmatpush2.bf16.msra.mxu0 %v6376_v62 }
 0x2c2   :  { %4020 = vmatprep.subr.bf16.mxu0 %v6384_v63 }
 0x2c3   :  { %3781 = vmatpush2.bf16.msra.mxu1 %v6379_v49 }
 0x2c4   :  { %3782 = vmatprep.subr.bf16.mxu1 %v6387_v0  ;;  %v4110_v0 = vld [vmem:[%s8469_s3 + $0x60] sm:$0xff] }
 0x2c5   :  { %4021 = vmatpush2.bf16.msra.mxu0 %v6382_v1  ;;  %v4111_v1 = vld [vmem:[%s8469_s3 + $0x68] sm:$0xff] }
 0x2c6   :  { %4022 = vmatprep.subr.bf16.mxu0 %v6390_v2  ;;  %v4103_v2 = vld [vmem:[%s8469_s3 + $0x28] sm:$0xff] }
 0x2c7   :  { %3783 = vmatpush2.bf16.msra.mxu1 %v6385_v3  ;;  %v4112_v3 = vld [vmem:[%s8469_s3 + $0x70] sm:$0xff] }
 0x2c9   :  { %4023 = vmatpush2.bf16.msra.mxu0 %v6388_v5  ;;  %v4104_v5 = vld [vmem:[%s8469_s3 + $0x30] sm:$0xff] }
 0x2ca   :  { %v2358_v31 = vpop.f32.mrf.mxu1  ;;  %3785 = vmatmul.mubr.bf16.vlgmr.msra.gmra.mxu1 %v3557_v7  ;;  %v4113_v7 = vld [vmem:[%s8469_s3 + $0x78] sm:$0xff] }
 0x2cb   :  { %5555 = vmatprep.mubr.f32.mxu1 %v4106_v38 }
 0x2cc   :  { %v2360_v10 = vpop.f32.mrf.mxu1  ;;  %v2598_v11 = vpop.f32.mrf.mxu0  ;;  %4025 = vmatmul.mubr.bf16.vlgmr.msra.gmra.mxu0 %v3828_v8  ;;  %v4105_v8 = vld [vmem:[%s8469_s3 + $0x38] sm:$0xff] }
 0x2cd   :  { %v4046_v14 = vrot.slane %v2598_v11, 4  ;;  %5543 = vmatprep.mubr.f32.mxu0 %v4098_v47  ;;  %v4116_v11 = vld [vmem:[%s8469_s3 + $0x90] sm:$0xff] }
 0x2ce   :  { %v2362_v9 = vpop.f32.mrf.mxu1  ;;  %v2600_v16 = vpop.f32.mrf.mxu0 }
 0x2cf   :  { %v4079_v17 = vrot.slane %v2600_v16, 4  ;;  %v8223_v20 = vsel %vm4057_vm0, %v2358_v31, %v4046_v14  ;;  %v4114_v31 = vld [vmem:[%s8469_s3 + $0x80] sm:$0xff]  ;;  %v4117_v14 = vld [vmem:[%s8469_s3 + $0x98] sm:$0xff]  ;;  %v4119_v16 = vld [vmem:[%s8469_s3 + $0xa8] sm:$0xff] }
 0x2d0   :  { %v2363_v22 = vpop.f32.mrf.mxu1  ;;  %v2602_v23 = vpop.f32.mrf.mxu0  ;;  %v4118_v9 = vld [vmem:[%s8469_s3 + $0xa0] sm:$0xff] }
 0x2d1   :  { %v4094_v24 = vsel %vm4057_vm0, %v2360_v10, %v4079_v17  ;;  %v4115_v10 = vld [vmem:[%s8469_s3 + $0x88] sm:$0xff]  ;;  %v4120_v17 = vld [vmem:[%s8469_s3 + $0xb0] sm:$0xff]  ;;  %v4122_v22 = vld [vmem:[%s8469_s3 + $0xc0] sm:$0xff] }
 0x2d2   :  { %v2603_v25 = vpop.f32.mrf.mxu0  ;;  %v4123_v23 = vld [vmem:[%s8469_s3 + $0xc8] sm:$0xff] }
 0x2d3   :  { %v4125_v25 = vld [vmem:[%s8469_s3 + $0xd8] sm:$0xff] }
 0x30a   :  { %v2834_v18 = vpop.f32.mrf.mxu1 }
 0x30c   :  { %v2836_v26 = vpop.f32.mrf.mxu1  ;;  %v3074_v27 = vpop.f32.mrf.mxu0 }
 0x30d   :  { %v4049_v57 = vrot.slane %v3074_v27, 4  ;;  %v4128_v27 = vld [vmem:[%s8469_s3 + $0xf0] sm:$0xff] }
 0x30e   :  { %v2838_v37 = vpop.f32.mrf.mxu1  ;;  %v3076_v40 = vpop.f32.mrf.mxu0 }
 0x30f   :  { %v4082_v29 = vrot.slane %v3076_v40, 4  ;;  %v8227_v30 = vsel %vm4057_vm0, %v2834_v18, %v4049_v57  ;;  %v4126_v18 = vld [vmem:[%s8469_s3 + $0xe0] sm:$0xff]  ;;  %v4129_v57 = vld [vmem:[%s8469_s3 + $0xf8] sm:$0xff] }
 0x310   :  { %v2839_v12 = vpop.f32.mrf.mxu1  ;;  %v3078_v32 = vpop.f32.mrf.mxu0 }
 0x311   :  { %v4095_v35 = vsel %vm4057_vm0, %v2836_v26, %v4082_v29  ;;  %v4127_v26 = vld [vmem:[%s8469_s3 + $0xe8] sm:$0xff] }
 0x312   :  { %v3079_v36 = vpop.f32.mrf.mxu0 }
 0x34a   :  { %v3310_v39 = vpop.f32.mrf.mxu1 }
 0x34c   :  { %v3312_v41 = vpop.f32.mrf.mxu1  ;;  %v3550_v42 = vpop.f32.mrf.mxu0 }
 0x34d   :  { %v4052_v44 = vrot.slane %v3550_v42, 4 }
 0x34e   :  { %v3314_v45 = vpop.f32.mrf.mxu1  ;;  %v3552_v46 = vpop.f32.mrf.mxu0 }
 0x34f   :  { %v4085_v50 = vrot.slane %v3552_v46, 4  ;;  %v4064_v28 = vsel %vm4057_vm0, %v3310_v39, %v4052_v44 }
 0x350   :  { %v3315_v33 = vpop.f32.mrf.mxu1  ;;  %v3554_v51 = vpop.f32.mrf.mxu0 }
 0x351   :  { %v4096_v53 = vsel %vm4057_vm0, %v3312_v41, %v4085_v50 }
 0x352   :  { %v3555_v21 = vpop.f32.mrf.mxu0 }
 0x38a   :  { %v3786_v54 = vpop.f32.mrf.mxu1 }
 0x38c   :  { %v3788_v55 = vpop.f32.mrf.mxu1  ;;  %v4026_v56 = vpop.f32.mrf.mxu0 }
 0x38d   :  { %v4055_v49 = vrot.slane %v4026_v56, 4 }
 0x38e   :  { %v3790_v59 = vpop.f32.mrf.mxu1  ;;  %v4028_v60 = vpop.f32.mrf.mxu0 }
 0x38f   :  { %v4088_v61 = vrot.slane %v4028_v60, 4 }
 0x390   :  { %v3791_v6 = vpop.f32.mrf.mxu1  ;;  %v4030_v15 = vpop.f32.mrf.mxu0 }
 0x391   :  { %v4097_v62 = vsel %vm4057_vm0, %v3788_v55, %v4088_v61 }
 0x392   :  { %v4031_v63 = vpop.f32.mrf.mxu0  ;;  %5511 = vmatprep.subr.mxu0 %v4097_v62  ;;  %5591 = vmatprep.subr.mxu1 %v4097_v62 }
 0x393   :  { %5512 = vmatpush3.msra.mxu0 %v4097_v62  ;;  %5607 = vmatpush3.msra.mxu1 %v4097_v62 }
 0x394   :  { %5513 = vmatprep.subr.mxu0 %v4096_v53  ;;  %5592 = vmatprep.subr.mxu1 %v4096_v53 }
 0x395   :  { %5514 = vmatpush3.msra.mxu0 %v4096_v53  ;;  %5608 = vmatpush3.msra.mxu1 %v4096_v53 }
 0x396   :  { %5515 = vmatprep.subr.mxu0 %v4095_v35  ;;  %5593 = vmatprep.subr.mxu1 %v4095_v35 }
 0x397   :  { %5516 = vmatpush3.msra.mxu0 %v4095_v35  ;;  %5609 = vmatpush3.msra.mxu1 %v4095_v35 }
 0x398   :  { %5517 = vmatprep.subr.mxu0 %v4094_v24  ;;  %5594 = vmatprep.subr.mxu1 %v4094_v24 }
 0x399   :  { %5518 = vmatpush3.msra.mxu0 %v4094_v24  ;;  %5610 = vmatpush3.msra.mxu1 %v4094_v24  ;;  %v4124_v24 = vld [vmem:[%s8469_s3 + $0xd0] sm:$0xff] }
 0x39a   :  { %5519 = vmatprep.subr.mxu0 %v8065_v34  ;;  %5595 = vmatprep.subr.mxu1 %v8065_v34 }
 0x39b   :  { %5520 = vmatpush3.msra.mxu0 %v8065_v34  ;;  %5611 = vmatpush3.msra.mxu1 %v8065_v34  ;;  %v4065_v34 = vsel %vm4057_vm0, %v3786_v54, %v4055_v49 }
 0x39c   :  { %5521 = vmatprep.subr.mxu0 %v7863_v48  ;;  %5596 = vmatprep.subr.mxu1 %v7863_v48 }
 0x39d   :  { %5522 = vmatpush3.msra.mxu0 %v7863_v48  ;;  %5612 = vmatpush3.msra.mxu1 %v7863_v48  ;;  %v4109_v48 = vld [vmem:[%s8469_s3 + $0x58] sm:$0xff] }
 0x39e   :  { %5523 = vmatprep.subr.mxu0 %v7661_v19  ;;  %5597 = vmatprep.subr.mxu1 %v7661_v19 }
 0x39f   :  { %5524 = vmatpush3.msra.mxu0 %v7661_v19  ;;  %5613 = vmatpush3.msra.mxu1 %v7661_v19  ;;  %v4099_v19 = vld [vmem:[%s8469_s3 + $0x8] sm:$0xff] }
 0x3a0   :  { %5525 = vmatprep.subr.mxu0 %v7459_v58  ;;  %5598 = vmatprep.subr.mxu1 %v7459_v58 }
 0x3a1   :  { %5526 = vmatpush3.msra.mxu0 %v7459_v58  ;;  %5614 = vmatpush3.msra.mxu1 %v7459_v58  ;;  %v4107_v58 = vld [vmem:[%s8469_s3 + $0x48] sm:$0xff] }
 0x3a2   :  { %5527 = vmatprep.subr.mxu0 %v4065_v34  ;;  %5599 = vmatprep.subr.mxu1 %v4065_v34 }
 0x3a3   :  { %5528 = vmatpush3.msra.mxu0 %v4065_v34  ;;  %5615 = vmatpush3.msra.mxu1 %v4065_v34 }
 0x3a4   :  { %5529 = vmatprep.subr.mxu0 %v4064_v28  ;;  %5600 = vmatprep.subr.mxu1 %v4064_v28 }
 0x3a5   :  { %5530 = vmatpush3.msra.mxu0 %v4064_v28  ;;  %5616 = vmatpush3.msra.mxu1 %v4064_v28 }
 0x3a6   :  { %5531 = vmatprep.subr.mxu0 %v8227_v30  ;;  %5601 = vmatprep.subr.mxu1 %v8227_v30 }
 0x3a7   :  { %5532 = vmatpush3.msra.mxu0 %v8227_v30  ;;  %5617 = vmatpush3.msra.mxu1 %v8227_v30 }
 0x3a8   :  { %5533 = vmatprep.subr.mxu0 %v8223_v20  ;;  %5602 = vmatprep.subr.mxu1 %v8223_v20 }
 0x3a9   :  { %5534 = vmatpush3.msra.mxu0 %v8223_v20  ;;  %5618 = vmatpush3.msra.mxu1 %v8223_v20  ;;  %v4121_v20 = vld [vmem:[%s8469_s3 + $0xb8] sm:$0xff] }
 0x3aa   :  { %5535 = vmatprep.subr.mxu0 %v8056_v4  ;;  %5603 = vmatprep.subr.mxu1 %v8056_v4 }
 0x3ab   :  { %5536 = vmatpush3.msra.mxu0 %v8056_v4  ;;  %5619 = vmatpush3.msra.mxu1 %v8056_v4  ;;  %v4101_v4 = vld [vmem:[%s8469_s3 + $0x18] sm:$0xff] }
 0x3ac   :  { %5537 = vmatprep.subr.mxu0 %v7854_v43  ;;  %5604 = vmatprep.subr.mxu1 %v7854_v43 }
 0x3ad   :  { %5538 = vmatpush3.msra.mxu0 %v7854_v43  ;;  %5620 = vmatpush3.msra.mxu1 %v7854_v43  ;;  %v4108_v43 = vld [vmem:[%s8469_s3 + $0x50] sm:$0xff] }
 0x3ae   :  { %5539 = vmatprep.subr.mxu0 %v7652_v13  ;;  %5605 = vmatprep.subr.mxu1 %v7652_v13 }
 0x3af   :  { %5540 = vmatpush3.msra.mxu0 %v7652_v13  ;;  %5621 = vmatpush3.msra.mxu1 %v7652_v13  ;;  %v4100_v13 = vld [vmem:[%s8469_s3 + $0x10] sm:$0xff] }
 0x3b0   :  { %5541 = vmatprep.subr.mxu0 %v7450_v52  ;;  %5606 = vmatprep.subr.mxu1 %v7450_v52 }
 0x3b1   :  { %5542 = vmatpush3.msra.mxu0 %v7450_v52  ;;  %5622 = vmatpush3.msra.mxu1 %v7450_v52  ;;  %v4102_v52 = vld [vmem:[%s8469_s3 + $0x20] sm:$0xff] }
 0x3b2   :  { %5556 = vmatmul.mubr.f32.vlgmr.msra.gmra.mxu1 %v4107_v58  ;;  %5544 = vmatmul.mubr.f32.vlgmr.msra.gmra.mxu0 %v4099_v19 }
 0x3b3   :  { %5558 = vmatprep.mubr.f32.mxu1 %v4108_v43  ;;  %5546 = vmatprep.mubr.f32.mxu0 %v4100_v13 }
 0x3b6   :  { %5559 = vmatmul.mubr.f32.gmra.mxu1 %v4109_v48  ;;  %5547 = vmatmul.mubr.f32.gmra.mxu0 %v4101_v4 }
 0x3b7   :  { %5561 = vmatprep.mubr.f32.mxu1 %v4110_v0  ;;  %5549 = vmatprep.mubr.f32.mxu0 %v4102_v52 }
 0x3ba   :  { %5562 = vmatmul.mubr.f32.gmra.mxu1 %v4111_v1  ;;  %5550 = vmatmul.mubr.f32.gmra.mxu0 %v4103_v2 }
 0x3bb   :  { %5564 = vmatprep.mubr.f32.mxu1 %v4112_v3  ;;  %5552 = vmatprep.mubr.f32.mxu0 %v4104_v5 }
 0x3be   :  { %5565 = vmatmul.mubr.f32.gmra.mxu1 %v4113_v7  ;;  %5553 = vmatmul.mubr.f32.gmra.mxu0 %v4105_v8 }
 0x3bf   :  { %5567 = vmatprep.mubr.f32.mxu1 %v4114_v31 }
 0x3c2   :  { %5568 = vmatmul.mubr.f32.gmra.mxu1 %v4115_v10 }
 0x3c3   :  { %5570 = vmatprep.mubr.f32.mxu1 %v4116_v11 }
 0x3c6   :  { %5571 = vmatmul.mubr.f32.gmra.mxu1 %v4117_v14 }
 0x3c7   :  { %5573 = vmatprep.mubr.f32.mxu1 %v4118_v9 }
 0x3ca   :  { %5574 = vmatmul.mubr.f32.gmra.mxu1 %v4119_v16 }
 0x3cb   :  { %5576 = vmatprep.mubr.f32.mxu1 %v4120_v17 }
 0x3ce   :  { %5577 = vmatmul.mubr.f32.gmra.mxu1 %v4121_v20 }
 0x3cf   :  { %5579 = vmatprep.mubr.f32.mxu1 %v4122_v22 }
 0x3d2   :  { %5580 = vmatmul.mubr.f32.gmra.mxu1 %v4123_v23 }
 0x3d3   :  { %5582 = vmatprep.mubr.f32.mxu1 %v4124_v24 }
 0x3d6   :  { %5583 = vmatmul.mubr.f32.gmra.mxu1 %v4125_v25 }
 0x3d7   :  { %5585 = vmatprep.mubr.f32.mxu1 %v4126_v18 }
 0x3da   :  { %5586 = vmatmul.mubr.f32.gmra.mxu1 %v4127_v26 }
 0x3db   :  { %5588 = vmatprep.mubr.f32.mxu1 %v4128_v27 }
 0x3de   :  { %5589 = vmatmul.mubr.f32.gmra.mxu1 %v4129_v57 }
 0x472   :  { %v5557_v37 = vpop.f32.mrf.mxu1  ;;  %v5545_v40 = vpop.f32.mrf.mxu0 }
 0x473   :  { %4364 = vst [vmem:[%s8470_s4 + $0x48] sm:$0xff] %v5557_v37  ;;  %4356 = vst [vmem:[%s8470_s4 + $0x8] sm:$0xff] %v5545_v40 }
 0x474   :  { %v4236_v29 = vpop.f32.mrf.mxu1  ;;  %v4196_v30 = vpop.f32.mrf.mxu0 }
 0x475   :  { %4363 = vst [vmem:[%s8470_s4 + $0x40] sm:$0xff] %v4236_v29  ;;  %4355 = vst [vmem:[%s8470_s4] sm:$0xff] %v4196_v30 }
 0x476   :  { %v5560_v12 = vpop.f32.mrf.mxu1  ;;  %v5548_v32 = vpop.f32.mrf.mxu0 }
 0x477   :  { %4366 = vst [vmem:[%s8470_s4 + $0x58] sm:$0xff] %v5560_v12  ;;  %4358 = vst [vmem:[%s8470_s4 + $0x18] sm:$0xff] %v5548_v32 }
 0x478   :  { %v4246_v35 = vpop.f32.mrf.mxu1  ;;  %v4206_v36 = vpop.f32.mrf.mxu0 }
 0x479   :  { %4365 = vst [vmem:[%s8470_s4 + $0x50] sm:$0xff] %v4246_v35  ;;  %4357 = vst [vmem:[%s8470_s4 + $0x10] sm:$0xff] %v4206_v36 }
 0x47a   :  { %v5563_v38 = vpop.f32.mrf.mxu1  ;;  %v5551_v39 = vpop.f32.mrf.mxu0 }
 0x47b   :  { %4368 = vst [vmem:[%s8470_s4 + $0x68] sm:$0xff] %v5563_v38  ;;  %4360 = vst [vmem:[%s8470_s4 + $0x28] sm:$0xff] %v5551_v39 }
 0x47c   :  { %v4256_v41 = vpop.f32.mrf.mxu1  ;;  %v4216_v42 = vpop.f32.mrf.mxu0 }
 0x47d   :  { %4367 = vst [vmem:[%s8470_s4 + $0x60] sm:$0xff] %v4256_v41  ;;  %4359 = vst [vmem:[%s8470_s4 + $0x20] sm:$0xff] %v4216_v42 }
 0x47e   :  { %v5566_v44 = vpop.f32.mrf.mxu1  ;;  %v5554_v45 = vpop.f32.mrf.mxu0 }
 0x47f   :  { %4370 = vst [vmem:[%s8470_s4 + $0x78] sm:$0xff] %v5566_v44  ;;  %4362 = vst [vmem:[%s8470_s4 + $0x38] sm:$0xff] %v5554_v45 }
 0x480   :  { %v4266_v46 = vpop.f32.mrf.mxu1  ;;  %v4226_v47 = vpop.f32.mrf.mxu0 }
 0x481   :  { %4369 = vst [vmem:[%s8470_s4 + $0x70] sm:$0xff] %v4266_v46  ;;  %4361 = vst [vmem:[%s8470_s4 + $0x30] sm:$0xff] %v4226_v47 }
 0x482   :  { %v5569_v50 = vpop.f32.mrf.mxu1 }
 0x483   :  { %4372 = vst [vmem:[%s8470_s4 + $0x88] sm:$0xff] %v5569_v50 }
 0x484   :  { %v4276_v28 = vpop.f32.mrf.mxu1 }
 0x485   :  { %4371 = vst [vmem:[%s8470_s4 + $0x80] sm:$0xff] %v4276_v28 }
 0x486   :  { %v5572_v33 = vpop.f32.mrf.mxu1 }
 0x487   :  { %4374 = vst [vmem:[%s8470_s4 + $0x98] sm:$0xff] %v5572_v33 }
 0x488   :  { %v4286_v51 = vpop.f32.mrf.mxu1 }
 0x489   :  { %4373 = vst [vmem:[%s8470_s4 + $0x90] sm:$0xff] %v4286_v51 }
 0x48a   :  { %v5575_v53 = vpop.f32.mrf.mxu1 }
 0x48b   :  { %4376 = vst [vmem:[%s8470_s4 + $0xa8] sm:$0xff] %v5575_v53 }
 0x48c   :  { %v4296_v21 = vpop.f32.mrf.mxu1 }
 0x48d   :  { %4375 = vst [vmem:[%s8470_s4 + $0xa0] sm:$0xff] %v4296_v21 }
 0x48e   :  { %v5578_v54 = vpop.f32.mrf.mxu1 }
 0x48f   :  { %4378 = vst [vmem:[%s8470_s4 + $0xb8] sm:$0xff] %v5578_v54 }
 0x490   :  { %v4306_v55 = vpop.f32.mrf.mxu1 }
 0x491   :  { %4377 = vst [vmem:[%s8470_s4 + $0xb0] sm:$0xff] %v4306_v55 }
 0x492   :  { %v5581_v56 = vpop.f32.mrf.mxu1 }
 0x493   :  { %4380 = vst [vmem:[%s8470_s4 + $0xc8] sm:$0xff] %v5581_v56 }
 0x494   :  { %v4316_v59 = vpop.f32.mrf.mxu1 }
 0x495   :  { %4379 = vst [vmem:[%s8470_s4 + $0xc0] sm:$0xff] %v4316_v59 }
 0x496   :  { %v5584_v60 = vpop.f32.mrf.mxu1 }
 0x497   :  { %4382 = vst [vmem:[%s8470_s4 + $0xd8] sm:$0xff] %v5584_v60 }
 0x498   :  { %v4326_v61 = vpop.f32.mrf.mxu1 }
 0x499   :  { %4381 = vst [vmem:[%s8470_s4 + $0xd0] sm:$0xff] %v4326_v61 }
 0x49a   :  { %v5587_v6 = vpop.f32.mrf.mxu1 }
 0x49b   :  { %4384 = vst [vmem:[%s8470_s4 + $0xe8] sm:$0xff] %v5587_v6 }
 0x49c   :  { %v4336_v15 = vpop.f32.mrf.mxu1 }
 0x49d   :  { %4383 = vst [vmem:[%s8470_s4 + $0xe0] sm:$0xff] %v4336_v15 }
 0x49e   :  { %v5590_v62 = vpop.f32.mrf.mxu1 }
 0x49f   :  { %4386 = vst [vmem:[%s8470_s4 + $0xf8] sm:$0xff] %v5590_v62 }
 0x4a0   :  { %v4346_v63 = vpop.f32.mrf.mxu1 }
 0x4a1   :  { %4385 = vst [vmem:[%s8470_s4 + $0xf0] sm:$0xff] %v4346_v63 }

</bundles_post_ra>
